<compile_context>
chip_gen: v6e
topology: v6e:2x2x1
jax: 0.10.0
libtpu: 0.0.40
codegen_flags: <defaults>
</compile_context>

<pallas_src>
import functools
import math

import jax
import jax.numpy as jnp
from jax.experimental import pallas as pl
from jax.experimental.pallas import tpu as pltpu

_MASK_VALUE = -0.7 * float(jnp.finfo(jnp.float32).max)
_VMEM_LIMIT = 48 * 1024 * 1024  # fits v7x's 64 MiB physical; plenty on v5e/v6e


# ----------------------------------------------------------------------------
# helpers: tile-size / head-block selection
# ----------------------------------------------------------------------------
def _pick_tile(dim, target, align=128):
    """Largest tile <= target that is a multiple of `align` and divides `dim`;
    falls back to the full dimension (always a legal block size)."""
    if dim <= target:
        return dim
    t = (target // align) * align
    while t >= align:
        if dim % t == 0:
            return t
        t -= align
    return dim


def _pick_head_block(n_head, head_dim, lane=128):
    """Smallest divisor h of n_head with h*head_dim a multiple of 128 so that
    q/k/v/output tiles are lane-dense (requires n_embd % 128 == 0)."""
    for h in range(1, n_head + 1):
        if n_head % h == 0 and (h * head_dim) % lane == 0:
            return h
    return n_head


# ----------------------------------------------------------------------------
# Kernel 1: tiled, pipelined linear layer  out = x @ w + b  (c_attn, c_proj)
# ----------------------------------------------------------------------------
def _linear_kernel(x_ref, w_ref, b_ref, o_ref, acc_ref):
    @pl.when(pl.program_id(2) == 0)
    def _init():
        acc_ref[...] = jnp.zeros_like(acc_ref)

    acc_ref[...] += jnp.dot(
        x_ref[...].astype(jnp.bfloat16),
        w_ref[...].astype(jnp.bfloat16),
        preferred_element_type=jnp.float32,
    )

    @pl.when(pl.program_id(2) == pl.num_programs(2) - 1)
    def _finalize():
        o_ref[...] = (acc_ref[...] + b_ref[...].astype(jnp.float32)).astype(o_ref.dtype)


def linear(x, w, b, *, tm_target=256, tn_target=512, tk_target=512):
    """x: (M, K), w: (K, N), b: (1, N) -> (M, N)."""
    M, K = x.shape
    K2, N = w.shape
    assert K == K2
    tm = _pick_tile(M, tm_target, 128)
    tn = _pick_tile(N, tn_target, 128)
    tk = _pick_tile(K, tk_target, 128)
    grid = (M // tm, N // tn, K // tk)
    return pl.pallas_call(
        _linear_kernel,
        out_shape=jax.ShapeDtypeStruct((M, N), x.dtype),
        grid=grid,
        in_specs=[
            pl.BlockSpec((tm, tk), lambda i, j, k: (i, k)),
            pl.BlockSpec((tk, tn), lambda i, j, k: (k, j)),
            pl.BlockSpec((1, tn), lambda i, j, k: (0, j)),
        ],
        out_specs=pl.BlockSpec((tm, tn), lambda i, j, k: (i, j)),
        scratch_shapes=[pltpu.VMEM((tm, tn), jnp.float32)],
        compiler_params=pltpu.CompilerParams(
            dimension_semantics=("parallel", "parallel", "arbitrary"),
            vmem_limit_bytes=_VMEM_LIMIT,
        ),
    )(x, w, b)


# ----------------------------------------------------------------------------
# Kernel 2: causal flash attention operating directly on the fused qkv tensor.
# Grid: (B, head_blocks, q_blocks, kv_blocks); heads are packed per step.
# ----------------------------------------------------------------------------
def _flash_attn_kernel(q_ref, k_ref, v_ref, o_ref, m_ref, l_ref, acc_ref,
                       *, head_dim, heads_per_block, tq, tk, scale):
    qi = pl.program_id(2)
    ki = pl.program_id(3)

    @pl.when(ki == 0)
    def _init():
        m_ref[...] = jnp.full_like(m_ref, _MASK_VALUE)
        l_ref[...] = jnp.zeros_like(l_ref)
        acc_ref[...] = jnp.zeros_like(acc_ref)

    # Skip kv blocks that lie entirely above the causal diagonal (~2x less MXU).
    @pl.when(ki * tk < (qi + 1) * tq)
    def _compute():
        q = q_ref[0]  # (tq, heads_per_block * head_dim)
        k = k_ref[0]  # (tk, heads_per_block * head_dim)
        v = v_ref[0]  # (tk, heads_per_block * head_dim)
        row = qi * tq + jax.lax.broadcasted_iota(jnp.int32, (tq, tk), 0)
        col = ki * tk + jax.lax.broadcasted_iota(jnp.int32, (tq, tk), 1)
        causal = col <= row
        for h in range(heads_per_block):
            sl = slice(h * head_dim, (h + 1) * head_dim)
            q_h = q[:, sl].astype(jnp.bfloat16)
            k_h = k[:, sl].astype(jnp.bfloat16)
            v_h = v[:, sl].astype(jnp.bfloat16)
            # QK^T: contract last dims (no explicit transpose -> no XLU copy)
            s = jax.lax.dot_general(
                q_h, k_h, (((1,), (1,)), ((), ())),
                preferred_element_type=jnp.float32) * scale
            s = jnp.where(causal, s, _MASK_VALUE)
            # online softmax (f32)
            m_prev = m_ref[h]                                    # (tq, 1)
            m_new = jnp.maximum(m_prev, jnp.max(s, axis=-1, keepdims=True))
            alpha = jnp.exp(m_prev - m_new)
            p = jnp.exp(s - m_new)
            l_ref[h] = alpha * l_ref[h] + jnp.sum(p, axis=-1, keepdims=True)
            pv = jax.lax.dot_general(
                p.astype(jnp.bfloat16), v_h, (((1,), (0,)), ((), ())),
                preferred_element_type=jnp.float32)
            acc_ref[:, sl] = alpha * acc_ref[:, sl] + pv
            m_ref[h] = m_new

    @pl.when(ki == pl.num_programs(3) - 1)
    def _finalize():
        pieces = []
        for h in range(heads_per_block):
            sl = slice(h * head_dim, (h + 1) * head_dim)
            inv_l = pl.reciprocal(l_ref[h], approx=True)         # (tq, 1)
            pieces.append(acc_ref[:, sl] * inv_l)
        # single lane-dense (>=128 wide) store of all packed heads
        o_ref[0] = jnp.concatenate(pieces, axis=-1).astype(o_ref.dtype)


def causal_attention_fused(qkv, n_head, *, q_block_target=256, kv_block_target=256):
    """qkv: (B, T, 3*C) fused projection -> attention output (B, T, C)."""
    B, T, three_c = qkv.shape
    C = three_c // 3
    assert C % n_head == 0
    head_dim = C // n_head
    assert C % 128 == 0, "n_embd must be a multiple of 128 for lane-dense tiles"

    h_blk = _pick_head_block(n_head, head_dim)
    d_blk = h_blk * head_dim
    n_head_blocks = n_head // h_blk

    tq = _pick_tile(T, q_block_target, 128)
    tk = _pick_tile(T, kv_block_target, 128)
    grid = (B, n_head_blocks, T // tq, T // tk)
    scale = 1.0 / math.sqrt(head_dim)

    kernel = functools.partial(
        _flash_attn_kernel, head_dim=head_dim, heads_per_block=h_blk,
        tq=tq, tk=tk, scale=scale)

    # head slicing is pure DMA addressing on the fused qkv tensor
    q_spec = pl.BlockSpec((1, tq, d_blk), lambda b, h, qi, ki: (b, qi, h))
    k_spec = pl.BlockSpec((1, tk, d_blk),
                          lambda b, h, qi, ki: (b, ki, n_head_blocks + h))
    v_spec = pl.BlockSpec((1, tk, d_blk),
                          lambda b, h, qi, ki: (b, ki, 2 * n_head_blocks + h))
    o_spec = pl.BlockSpec((1, tq, d_blk), lambda b, h, qi, ki: (b, qi, h))

    return pl.pallas_call(
        kernel,
        out_shape=jax.ShapeDtypeStruct((B, T, C), qkv.dtype),
        grid=grid,
        in_specs=[q_spec, k_spec, v_spec],
        out_specs=o_spec,
        scratch_shapes=[
            pltpu.VMEM((h_blk, tq, 1), jnp.float32),   # running max m
            pltpu.VMEM((h_blk, tq, 1), jnp.float32),   # running sum l
            pltpu.VMEM((tq, d_blk), jnp.float32),      # output accumulator
        ],
        compiler_params=pltpu.CompilerParams(
            dimension_semantics=("parallel", "parallel", "parallel", "arbitrary"),
            vmem_limit_bytes=_VMEM_LIMIT,
        ),
    )(qkv, qkv, qkv)


# ----------------------------------------------------------------------------
# Module forward: c_attn -> fused causal attention -> c_proj
# (no split / head transposes in the wrapper; reshapes are metadata-only)
# ----------------------------------------------------------------------------
def causal_self_attention(x, params, n_head):
    B, T, C = x.shape
    qkv = linear(x.reshape(B * T, C), params["w_attn"], params["b_attn"])
    qkv = qkv.reshape(B, T, 3 * C)
    y = causal_attention_fused(qkv, n_head)          # (B, T, C) directly
    y = linear(y.reshape(B * T, C), params["w_proj"], params["b_proj"])
    return y.reshape(B, T, C)


def init_params(key, n_embd):
    """Deterministic synthetic init (shapes from nn.Linear; weights stored (in, out))."""
    k1, k2, k3, k4 = jax.random.split(key, 4)
    bound = 1.0 / math.sqrt(n_embd)
    return {
        "w_attn": jax.random.uniform(k1, (n_embd, 3 * n_embd), jnp.float32, -bound, bound),
        "b_attn": jax.random.uniform(k2, (1, 3 * n_embd), jnp.float32, -bound, bound),
        "w_proj": jax.random.uniform(k3, (n_embd, n_embd), jnp.float32, -bound, bound),
        "b_proj": jax.random.uniform(k4, (1, n_embd), jnp.float32, -bound, bound),
    }


# ----------------------------------------------------------------------------
# pure-JAX f32 reference (mirrors the PyTorch module) for a tolerance check
# ----------------------------------------------------------------------------
def _reference(x, params, n_head):
    B, T, C = x.shape
    hd = C // n_head
    qkv = x @ params["w_attn"] + params["b_attn"][0]
    q, k, v = jnp.split(qkv, 3, axis=-1)
    q = q.reshape(B, T, n_head, hd).transpose(0, 2, 1, 3)
    k = k.reshape(B, T, n_head, hd).transpose(0, 2, 1, 3)
    v = v.reshape(B, T, n_head, hd).transpose(0, 2, 1, 3)
    s = jnp.einsum("bhqd,bhkd->bhqk", q, k) / math.sqrt(hd)
    mask = jnp.tril(jnp.ones((T, T), dtype=bool))
    s = jnp.where(mask[None, None], s, -jnp.inf)
    p = jax.nn.softmax(s, axis=-1)
    y = jnp.einsum("bhqk,bhkd->bhqd", p, v)
    y = y.transpose(0, 2, 1, 3).reshape(B, T, C)
    return y @ params["w_proj"] + params["b_proj"][0]


if __name__ == "__main__":
    # small config consistent with the module: n_embd % n_head == 0,
    # n_embd a multiple of 128 so head-packed tiles are lane-dense.
    B, T, C, n_head = 2, 128, 256, 4

    key = jax.random.PRNGKey(0)
    kx, kp = jax.random.split(key)
    x = jax.random.normal(kx, (B, T, C), dtype=jnp.float32)
    params = init_params(kp, C)

    fwd = jax.jit(functools.partial(causal_self_attention, n_head=n_head))
    y = jax.block_until_ready(fwd(x, params))
    assert y.shape == (B, T, C) and y.dtype == jnp.float32

    # kernel uses bf16 MXU operands + approx reciprocal -> tolerance compare
    y_ref = _reference(x, params, n_head)
    assert jnp.allclose(y, y_ref, atol=3e-2, rtol=3e-2), float(
        jnp.max(jnp.abs(y - y_ref)))

    print("KERNEL_OK")
</pallas_src>

<mosaic_0001>
module attributes {stable_mosaic.version = 11 : i64} {
  func.func @_flash_attn_kernel(%arg0: i32, %arg1: i32, %arg2: i32, %arg3: i32, %arg4: memref<1x128x128xf32, #tpu.memory_space<vmem>>, %arg5: memref<1x128x128xf32, #tpu.memory_space<vmem>>, %arg6: memref<1x128x128xf32, #tpu.memory_space<vmem>>, %arg7: memref<1x128x128xf32, #tpu.memory_space<vmem>>, %arg8: memref<2x128x1xf32, #tpu.memory_space<vmem>>, %arg9: memref<2x128x1xf32, #tpu.memory_space<vmem>>, %arg10: memref<128x128xf32, #tpu.memory_space<vmem>>) attributes {dimension_semantics = [#tpu.dimension_semantics<parallel>, #tpu.dimension_semantics<parallel>, #tpu.dimension_semantics<parallel>, #tpu.dimension_semantics<arbitrary>], iteration_bounds = array<i64: 2, 2, 1, 1>, scalar_prefetch = 0 : i64, scratch_operands = 3 : i64, tpu.core_type = #tpu.core_type<tc>, window_params = [{transform_indices = @transform_0, window_bounds = array<i64: 1, 128, 128>}, {transform_indices = @transform_1, window_bounds = array<i64: 1, 128, 128>}, {transform_indices = @transform_2, window_bounds = array<i64: 1, 128, 128>}, {transform_indices = @transform_3, window_bounds = array<i64: 1, 128, 128>}]} {
    %c0_i32 = arith.constant 0 : i32
    %0 = arith.cmpi eq, %arg3, %c0_i32 : i32
    %1 = arith.extui %0 : i1 to i32
    %c0_i32_0 = arith.constant 0 : i32
    %2 = arith.cmpi ne, %1, %c0_i32_0 : i32
    scf.if %2 {
      %cst = arith.constant -2.38197633E+38 : f32
      %12 = vector.broadcast %cst : f32 to vector<2x128x1xf32>
      %c0 = arith.constant 0 : index
      %c0_5 = arith.constant 0 : index
      %c0_6 = arith.constant 0 : index
      %13 = vector.load %arg8[%c0, %c0_5, %c0_6] : memref<2x128x1xf32, #tpu.memory_space<vmem>>, vector<2x128x1xf32>
      tpu.vector_store %arg8[%c0, %c0_5, %c0_6], %12 {strides = array<i32>} : memref<2x128x1xf32, #tpu.memory_space<vmem>>, vector<2x128x1xf32>,
      %cst_7 = arith.constant 0.000000e+00 : f32
      %14 = vector.broadcast %cst_7 : f32 to vector<2x128x1xf32>
      %c0_8 = arith.constant 0 : index
      %c0_9 = arith.constant 0 : index
      %c0_10 = arith.constant 0 : index
      %15 = vector.load %arg9[%c0_8, %c0_9, %c0_10] : memref<2x128x1xf32, #tpu.memory_space<vmem>>, vector<2x128x1xf32>
      tpu.vector_store %arg9[%c0_8, %c0_9, %c0_10], %14 {strides = array<i32>} : memref<2x128x1xf32, #tpu.memory_space<vmem>>, vector<2x128x1xf32>,
      %cst_11 = arith.constant 0.000000e+00 : f32
      %16 = vector.broadcast %cst_11 : f32 to vector<128x128xf32>
      %c0_12 = arith.constant 0 : index
      %c0_13 = arith.constant 0 : index
      %17 = vector.load %arg10[%c0_12, %c0_13] : memref<128x128xf32, #tpu.memory_space<vmem>>, vector<128x128xf32>
      tpu.vector_store %arg10[%c0_12, %c0_13], %16 {strides = array<i32>} : memref<128x128xf32, #tpu.memory_space<vmem>>, vector<128x128xf32>,
    } else {
    }
    %c128_i32 = arith.constant 128 : i32
    %3 = arith.muli %arg3, %c128_i32 : i32
    %c1_i32 = arith.constant 1 : i32
    %4 = arith.addi %arg2, %c1_i32 : i32
    %c128_i32_1 = arith.constant 128 : i32
    %5 = arith.muli %4, %c128_i32_1 : i32
    %6 = arith.cmpi slt, %3, %5 : i32
    %7 = arith.extui %6 : i1 to i32
    %c0_i32_2 = arith.constant 0 : i32
    %8 = arith.cmpi ne, %7, %c0_i32_2 : i32
    scf.if %8 {
      %c0 = arith.constant 0 : index
      %c0_5 = arith.constant 0 : index
      %c0_6 = arith.constant 0 : index
      %12 = vector.load %arg4[%c0, %c0_5, %c0_6] : memref<1x128x128xf32, #tpu.memory_space<vmem>>, vector<1x128x128xf32>
      %13 = vector.shape_cast %12 : vector<1x128x128xf32> to vector<128x128xf32>
      %c0_7 = arith.constant 0 : index
      %c0_8 = arith.constant 0 : index
      %c0_9 = arith.constant 0 : index
      %14 = vector.load %arg5[%c0_7, %c0_8, %c0_9] : memref<1x128x128xf32, #tpu.memory_space<vmem>>, vector<1x128x128xf32>
      %15 = vector.shape_cast %14 : vector<1x128x128xf32> to vector<128x128xf32>
      %c0_10 = arith.constant 0 : index
      %c0_11 = arith.constant 0 : index
      %c0_12 = arith.constant 0 : index
      %16 = vector.load %arg6[%c0_10, %c0_11, %c0_12] : memref<1x128x128xf32, #tpu.memory_space<vmem>>, vector<1x128x128xf32>
      %17 = vector.shape_cast %16 : vector<1x128x128xf32> to vector<128x128xf32>
      %c128_i32_13 = arith.constant 128 : i32
      %18 = arith.muli %arg2, %c128_i32_13 : i32
      %19 = tpu.iota {dimensions = array<i32: 0>} : vector<128x128xi32>
      %20 = vector.broadcast %18 : i32 to vector<128x128xi32>
      %21 = arith.addi %20, %19 : vector<128x128xi32>
      %c128_i32_14 = arith.constant 128 : i32
      %22 = arith.muli %arg3, %c128_i32_14 : i32
      %23 = tpu.iota {dimensions = array<i32: 1>} : vector<128x128xi32>
      %24 = vector.broadcast %22 : i32 to vector<128x128xi32>
      %25 = arith.addi %24, %23 : vector<128x128xi32>
      %26 = arith.cmpi sle, %25, %21 : vector<128x128xi32>
      %27 = vector.extract_strided_slice %13 {offsets = [0, 0], sizes = [128, 64], strides = [1, 1]} : vector<128x128xf32> to vector<128x64xf32>
      %28 = arith.truncf %27 : vector<128x64xf32> to vector<128x64xbf16>
      %29 = vector.extract_strided_slice %15 {offsets = [0, 0], sizes = [128, 64], strides = [1, 1]} : vector<128x128xf32> to vector<128x64xf32>
      %30 = arith.truncf %29 : vector<128x64xf32> to vector<128x64xbf16>
      %31 = vector.extract_strided_slice %17 {offsets = [0, 0], sizes = [128, 64], strides = [1, 1]} : vector<128x128xf32> to vector<128x64xf32>
      %32 = arith.truncf %31 : vector<128x64xf32> to vector<128x64xbf16>
      %cst = arith.constant dense<0.000000e+00> : vector<128x128xf32>
      %33 = tpu.matmul %28, %30, %cst {dimension_numbers = #tpu.dot_dimension_numbers<[1], [1], [0], [0], [0, 0, 1, 0], [], []>} : vector<128x64xbf16>, vector<128x64xbf16>, vector<128x128xf32> -> vector<128x128xf32>
      %cst_15 = arith.constant 1.250000e-01 : f32
      %34 = vector.broadcast %cst_15 : f32 to vector<128x128xf32>
      %35 = arith.mulf %33, %34 : vector<128x128xf32>
      %cst_16 = arith.constant -2.38197633E+38 : f32
      %36 = vector.broadcast %cst_16 : f32 to vector<128x128xf32>
      %37 = arith.select %26, %35, %36 : vector<128x128xi1>, vector<128x128xf32>
      %c0_17 = arith.constant 0 : index
      %c0_18 = arith.constant 0 : index
      %c0_19 = arith.constant 0 : index
      %38 = vector.load %arg8[%c0_17, %c0_18, %c0_19] : memref<2x128x1xf32, #tpu.memory_space<vmem>>, vector<1x128x1xf32>
      %39 = vector.shape_cast %38 : vector<1x128x1xf32> to vector<128x1xf32>
      %cst_20 = arith.constant dense<0xFF800000> : vector<128xf32>
      %40 = vector.multi_reduction <maximumf>, %37, %cst_20 [1] : vector<128x128xf32> to vector<128xf32>
      %41 = vector.shape_cast %40 : vector<128xf32> to vector<128x1xf32>
      %42 = arith.maximumf %39, %41 : vector<128x1xf32>
      %43 = arith.subf %39, %42 : vector<128x1xf32>
      %44 = math.exp %43 : vector<128x1xf32>
      %45 = vector.broadcast %42 : vector<128x1xf32> to vector<128x128xf32>
      %46 = arith.subf %37, %45 : vector<128x128xf32>
      %47 = math.exp %46 : vector<128x128xf32>
      %c0_21 = arith.constant 0 : index
      %c0_22 = arith.constant 0 : index
      %c0_23 = arith.constant 0 : index
      %48 = vector.load %arg9[%c0_21, %c0_22, %c0_23] : memref<2x128x1xf32, #tpu.memory_space<vmem>>, vector<1x128x1xf32>
      %49 = vector.shape_cast %48 : vector<1x128x1xf32> to vector<128x1xf32>
      %50 = arith.mulf %44, %49 : vector<128x1xf32>
      %cst_24 = arith.constant dense<0.000000e+00> : vector<128xf32>
      %51 = vector.multi_reduction <add>, %47, %cst_24 [1] : vector<128x128xf32> to vector<128xf32>
      %52 = vector.shape_cast %51 : vector<128xf32> to vector<128x1xf32>
      %53 = arith.addf %50, %52 : vector<128x1xf32>
      %c0_25 = arith.constant 0 : index
      %c0_26 = arith.constant 0 : index
      %c0_27 = arith.constant 0 : index
      %54 = vector.load %arg9[%c0_25, %c0_26, %c0_27] : memref<2x128x1xf32, #tpu.memory_space<vmem>>, vector<1x128x1xf32>
      %55 = vector.shape_cast %54 : vector<1x128x1xf32> to vector<128x1xf32>
      %56 = vector.shape_cast %53 : vector<128x1xf32> to vector<1x128x1xf32>
      tpu.vector_store %arg9[%c0_25, %c0_26, %c0_27], %56 {strides = array<i32>} : memref<2x128x1xf32, #tpu.memory_space<vmem>>, vector<1x128x1xf32>,
      %57 = arith.truncf %47 : vector<128x128xf32> to vector<128x128xbf16>
      %cst_28 = arith.constant dense<0.000000e+00> : vector<128x64xf32>
      %58 = tpu.matmul %57, %32, %cst_28 {dimension_numbers = #tpu.dot_dimension_numbers<[1], [0], [0], [1], [0, 0, 1, 1], [], []>} : vector<128x128xbf16>, vector<128x64xbf16>, vector<128x64xf32> -> vector<128x64xf32>
      %c0_29 = arith.constant 0 : index
      %c0_30 = arith.constant 0 : index
      %59 = vector.load %arg10[%c0_29, %c0_30] : memref<128x128xf32, #tpu.memory_space<vmem>>, vector<128x64xf32>
      %60 = vector.broadcast %44 : vector<128x1xf32> to vector<128x64xf32>
      %61 = arith.mulf %60, %59 : vector<128x64xf32>
      %62 = arith.addf %61, %58 : vector<128x64xf32>
      %c0_31 = arith.constant 0 : index
      %c0_32 = arith.constant 0 : index
      %63 = vector.load %arg10[%c0_31, %c0_32] : memref<128x128xf32, #tpu.memory_space<vmem>>, vector<128x64xf32>
      tpu.vector_store %arg10[%c0_31, %c0_32], %62 {strides = array<i32>} : memref<128x128xf32, #tpu.memory_space<vmem>>, vector<128x64xf32>,
      %c0_33 = arith.constant 0 : index
      %c0_34 = arith.constant 0 : index
      %c0_35 = arith.constant 0 : index
      %64 = vector.load %arg8[%c0_33, %c0_34, %c0_35] : memref<2x128x1xf32, #tpu.memory_space<vmem>>, vector<1x128x1xf32>
      %65 = vector.shape_cast %64 : vector<1x128x1xf32> to vector<128x1xf32>
      %66 = vector.shape_cast %42 : vector<128x1xf32> to vector<1x128x1xf32>
      tpu.vector_store %arg8[%c0_33, %c0_34, %c0_35], %66 {strides = array<i32>} : memref<2x128x1xf32, #tpu.memory_space<vmem>>, vector<1x128x1xf32>,
      %67 = vector.extract_strided_slice %13 {offsets = [0, 64], sizes = [128, 64], strides = [1, 1]} : vector<128x128xf32> to vector<128x64xf32>
      %68 = arith.truncf %67 : vector<128x64xf32> to vector<128x64xbf16>
      %69 = vector.extract_strided_slice %15 {offsets = [0, 64], sizes = [128, 64], strides = [1, 1]} : vector<128x128xf32> to vector<128x64xf32>
      %70 = arith.truncf %69 : vector<128x64xf32> to vector<128x64xbf16>
      %71 = vector.extract_strided_slice %17 {offsets = [0, 64], sizes = [128, 64], strides = [1, 1]} : vector<128x128xf32> to vector<128x64xf32>
      %72 = arith.truncf %71 : vector<128x64xf32> to vector<128x64xbf16>
      %cst_36 = arith.constant dense<0.000000e+00> : vector<128x128xf32>
      %73 = tpu.matmul %68, %70, %cst_36 {dimension_numbers = #tpu.dot_dimension_numbers<[1], [1], [0], [0], [0, 0, 1, 0], [], []>} : vector<128x64xbf16>, vector<128x64xbf16>, vector<128x128xf32> -> vector<128x128xf32>
      %cst_37 = arith.constant 1.250000e-01 : f32
      %74 = vector.broadcast %cst_37 : f32 to vector<128x128xf32>
      %75 = arith.mulf %73, %74 : vector<128x128xf32>
      %cst_38 = arith.constant -2.38197633E+38 : f32
      %76 = vector.broadcast %cst_38 : f32 to vector<128x128xf32>
      %77 = arith.select %26, %75, %76 : vector<128x128xi1>, vector<128x128xf32>
      %c1 = arith.constant 1 : index
      %c0_39 = arith.constant 0 : index
      %c0_40 = arith.constant 0 : index
      %78 = vector.load %arg8[%c1, %c0_39, %c0_40] : memref<2x128x1xf32, #tpu.memory_space<vmem>>, vector<1x128x1xf32>
      %79 = vector.shape_cast %78 : vector<1x128x1xf32> to vector<128x1xf32>
      %cst_41 = arith.constant dense<0xFF800000> : vector<128xf32>
      %80 = vector.multi_reduction <maximumf>, %77, %cst_41 [1] : vector<128x128xf32> to vector<128xf32>
      %81 = vector.shape_cast %80 : vector<128xf32> to vector<128x1xf32>
      %82 = arith.maximumf %79, %81 : vector<128x1xf32>
      %83 = arith.subf %79, %82 : vector<128x1xf32>
      %84 = math.exp %83 : vector<128x1xf32>
      %85 = vector.broadcast %82 : vector<128x1xf32> to vector<128x128xf32>
      %86 = arith.subf %77, %85 : vector<128x128xf32>
      %87 = math.exp %86 : vector<128x128xf32>
      %c1_42 = arith.constant 1 : index
      %c0_43 = arith.constant 0 : index
      %c0_44 = arith.constant 0 : index
      %88 = vector.load %arg9[%c1_42, %c0_43, %c0_44] : memref<2x128x1xf32, #tpu.memory_space<vmem>>, vector<1x128x1xf32>
      %89 = vector.shape_cast %88 : vector<1x128x1xf32> to vector<128x1xf32>
      %90 = arith.mulf %84, %89 : vector<128x1xf32>
      %cst_45 = arith.constant dense<0.000000e+00> : vector<128xf32>
      %91 = vector.multi_reduction <add>, %87, %cst_45 [1] : vector<128x128xf32> to vector<128xf32>
      %92 = vector.shape_cast %91 : vector<128xf32> to vector<128x1xf32>
      %93 = arith.addf %90, %92 : vector<128x1xf32>
      %c1_46 = arith.constant 1 : index
      %c0_47 = arith.constant 0 : index
      %c0_48 = arith.constant 0 : index
      %94 = vector.load %arg9[%c1_46, %c0_47, %c0_48] : memref<2x128x1xf32, #tpu.memory_space<vmem>>, vector<1x128x1xf32>
      %95 = vector.shape_cast %94 : vector<1x128x1xf32> to vector<128x1xf32>
      %96 = vector.shape_cast %93 : vector<128x1xf32> to vector<1x128x1xf32>
      tpu.vector_store %arg9[%c1_46, %c0_47, %c0_48], %96 {strides = array<i32>} : memref<2x128x1xf32, #tpu.memory_space<vmem>>, vector<1x128x1xf32>,
      %97 = arith.truncf %87 : vector<128x128xf32> to vector<128x128xbf16>
      %cst_49 = arith.constant dense<0.000000e+00> : vector<128x64xf32>
      %98 = tpu.matmul %97, %72, %cst_49 {dimension_numbers = #tpu.dot_dimension_numbers<[1], [0], [0], [1], [0, 0, 1, 1], [], []>} : vector<128x128xbf16>, vector<128x64xbf16>, vector<128x64xf32> -> vector<128x64xf32>
      %c0_50 = arith.constant 0 : index
      %c64 = arith.constant 64 : index
      %99 = vector.load %arg10[%c0_50, %c64] : memref<128x128xf32, #tpu.memory_space<vmem>>, vector<128x64xf32>
      %100 = vector.broadcast %84 : vector<128x1xf32> to vector<128x64xf32>
      %101 = arith.mulf %100, %99 : vector<128x64xf32>
      %102 = arith.addf %101, %98 : vector<128x64xf32>
      %c0_51 = arith.constant 0 : index
      %c64_52 = arith.constant 64 : index
      %103 = vector.load %arg10[%c0_51, %c64_52] : memref<128x128xf32, #tpu.memory_space<vmem>>, vector<128x64xf32>
      tpu.vector_store %arg10[%c0_51, %c64_52], %102 {strides = array<i32>} : memref<128x128xf32, #tpu.memory_space<vmem>>, vector<128x64xf32>,
      %c1_53 = arith.constant 1 : index
      %c0_54 = arith.constant 0 : index
      %c0_55 = arith.constant 0 : index
      %104 = vector.load %arg8[%c1_53, %c0_54, %c0_55] : memref<2x128x1xf32, #tpu.memory_space<vmem>>, vector<1x128x1xf32>
      %105 = vector.shape_cast %104 : vector<1x128x1xf32> to vector<128x1xf32>
      %106 = vector.shape_cast %82 : vector<128x1xf32> to vector<1x128x1xf32>
      tpu.vector_store %arg8[%c1_53, %c0_54, %c0_55], %106 {strides = array<i32>} : memref<2x128x1xf32, #tpu.memory_space<vmem>>, vector<1x128x1xf32>,
    } else {
    }
    %c0_i32_3 = arith.constant 0 : i32
    %9 = arith.cmpi eq, %arg3, %c0_i32_3 : i32
    %10 = arith.extui %9 : i1 to i32
    %c0_i32_4 = arith.constant 0 : i32
    %11 = arith.cmpi ne, %10, %c0_i32_4 : i32
    scf.if %11 {
      %c0 = arith.constant 0 : index
      %c0_5 = arith.constant 0 : index
      %c0_6 = arith.constant 0 : index
      %12 = vector.load %arg9[%c0, %c0_5, %c0_6] : memref<2x128x1xf32, #tpu.memory_space<vmem>>, vector<1x128x1xf32>
      %13 = vector.shape_cast %12 : vector<1x128x1xf32> to vector<128x1xf32>
      %14 = tpu.reciprocal %13 {approx = true} : vector<128x1xf32> -> vector<128x1xf32>
      %c0_7 = arith.constant 0 : index
      %c0_8 = arith.constant 0 : index
      %15 = vector.load %arg10[%c0_7, %c0_8] : memref<128x128xf32, #tpu.memory_space<vmem>>, vector<128x64xf32>
      %16 = vector.broadcast %14 : vector<128x1xf32> to vector<128x64xf32>
      %17 = arith.mulf %15, %16 : vector<128x64xf32>
      %c1 = arith.constant 1 : index
      %c0_9 = arith.constant 0 : index
      %c0_10 = arith.constant 0 : index
      %18 = vector.load %arg9[%c1, %c0_9, %c0_10] : memref<2x128x1xf32, #tpu.memory_space<vmem>>, vector<1x128x1xf32>
      %19 = vector.shape_cast %18 : vector<1x128x1xf32> to vector<128x1xf32>
      %20 = tpu.reciprocal %19 {approx = true} : vector<128x1xf32> -> vector<128x1xf32>
      %c0_11 = arith.constant 0 : index
      %c64 = arith.constant 64 : index
      %21 = vector.load %arg10[%c0_11, %c64] : memref<128x128xf32, #tpu.memory_space<vmem>>, vector<128x64xf32>
      %22 = vector.broadcast %20 : vector<128x1xf32> to vector<128x64xf32>
      %23 = arith.mulf %21, %22 : vector<128x64xf32>
      %24 = tpu.concatenate %17, %23 in 1 : vector<128x64xf32>, vector<128x64xf32> -> vector<128x128xf32>
      %c0_12 = arith.constant 0 : index
      %c0_13 = arith.constant 0 : index
      %c0_14 = arith.constant 0 : index
      %25 = vector.load %arg7[%c0_12, %c0_13, %c0_14] : memref<1x128x128xf32, #tpu.memory_space<vmem>>, vector<1x128x128xf32>
      %26 = vector.shape_cast %25 : vector<1x128x128xf32> to vector<128x128xf32>
      %27 = vector.shape_cast %24 : vector<128x128xf32> to vector<1x128x128xf32>
      tpu.vector_store %arg7[%c0_12, %c0_13, %c0_14], %27 {strides = array<i32>} : memref<1x128x128xf32, #tpu.memory_space<vmem>>, vector<1x128x128xf32>,
    } else {
    }
    return
  }
  func.func @transform_0(%arg0: i32, %arg1: i32, %arg2: i32, %arg3: i32) -> (i32, i32, i32) {
    %c0_i32 = arith.constant 0 : i32
    return %arg0, %arg2, %arg1 : i32, i32, i32
  }
  func.func @transform_1(%arg0: i32, %arg1: i32, %arg2: i32, %arg3: i32) -> (i32, i32, i32) {
    %c2_i32 = arith.constant 2 : i32
    %0 = arith.addi %c2_i32, %arg1 : i32
    %c0_i32 = arith.constant 0 : i32
    return %arg0, %arg3, %0 : i32, i32, i32
  }
  func.func @transform_2(%arg0: i32, %arg1: i32, %arg2: i32, %arg3: i32) -> (i32, i32, i32) {
    %c4_i32 = arith.constant 4 : i32
    %0 = arith.addi %c4_i32, %arg1 : i32
    %c0_i32 = arith.constant 0 : i32
    return %arg0, %arg3, %0 : i32, i32, i32
  }
  func.func @transform_3(%arg0: i32, %arg1: i32, %arg2: i32, %arg3: i32) -> (i32, i32, i32) {
    %c0_i32 = arith.constant 0 : i32
    return %arg0, %arg2, %arg1 : i32, i32, i32
  }
}

module attributes {stable_mosaic.version = 11 : i64} {
  func.func @_linear_kernel(%arg0: i32, %arg1: i32, %arg2: i32, %arg3: memref<256x256xf32, #tpu.memory_space<vmem>>, %arg4: memref<256x256xf32, #tpu.memory_space<vmem>>, %arg5: memref<1x256xf32, #tpu.memory_space<vmem>>, %arg6: memref<256x256xf32, #tpu.memory_space<vmem>>, %arg7: memref<256x256xf32, #tpu.memory_space<vmem>>) attributes {dimension_semantics = [#tpu.dimension_semantics<parallel>, #tpu.dimension_semantics<parallel>, #tpu.dimension_semantics<arbitrary>], iteration_bounds = array<i64: 1, 1, 1>, scalar_prefetch = 0 : i64, scratch_operands = 1 : i64, tpu.core_type = #tpu.core_type<tc>, window_params = [{transform_indices = @transform_0, window_bounds = array<i64: 256, 256>}, {transform_indices = @transform_1, window_bounds = array<i64: 256, 256>}, {transform_indices = @transform_2, window_bounds = array<i64: 1, 256>}, {transform_indices = @transform_3, window_bounds = array<i64: 256, 256>}]} {
    %c0_i32 = arith.constant 0 : i32
    %0 = arith.cmpi eq, %arg2, %c0_i32 : i32
    %1 = arith.extui %0 : i1 to i32
    %c0_i32_0 = arith.constant 0 : i32
    %2 = arith.cmpi ne, %1, %c0_i32_0 : i32
    scf.if %2 {
      %cst_10 = arith.constant 0.000000e+00 : f32
      %14 = vector.broadcast %cst_10 : f32 to vector<256x256xf32>
      %c0_11 = arith.constant 0 : index
      %c0_12 = arith.constant 0 : index
      %15 = vector.load %arg7[%c0_11, %c0_12] : memref<256x256xf32, #tpu.memory_space<vmem>>, vector<256x256xf32>
      tpu.vector_store %arg7[%c0_11, %c0_12], %14 {strides = array<i32>} : memref<256x256xf32, #tpu.memory_space<vmem>>, vector<256x256xf32>,
    } else {
    }
    %c0 = arith.constant 0 : index
    %c0_1 = arith.constant 0 : index
    %3 = vector.load %arg7[%c0, %c0_1] : memref<256x256xf32, #tpu.memory_space<vmem>>, vector<256x256xf32>
    %c0_2 = arith.constant 0 : index
    %c0_3 = arith.constant 0 : index
    %4 = vector.load %arg3[%c0_2, %c0_3] : memref<256x256xf32, #tpu.memory_space<vmem>>, vector<256x256xf32>
    %5 = arith.truncf %4 : vector<256x256xf32> to vector<256x256xbf16>
    %c0_4 = arith.constant 0 : index
    %c0_5 = arith.constant 0 : index
    %6 = vector.load %arg4[%c0_4, %c0_5] : memref<256x256xf32, #tpu.memory_space<vmem>>, vector<256x256xf32>
    %7 = arith.truncf %6 : vector<256x256xf32> to vector<256x256xbf16>
    %cst = arith.constant dense<0.000000e+00> : vector<256x256xf32>
    %8 = tpu.matmul %5, %7, %cst {dimension_numbers = #tpu.dot_dimension_numbers<[1], [0], [0], [1], [0, 0, 1, 1], [], []>} : vector<256x256xbf16>, vector<256x256xbf16>, vector<256x256xf32> -> vector<256x256xf32>
    %9 = arith.addf %3, %8 : vector<256x256xf32>
    %c0_6 = arith.constant 0 : index
    %c0_7 = arith.constant 0 : index
    %10 = vector.load %arg7[%c0_6, %c0_7] : memref<256x256xf32, #tpu.memory_space<vmem>>, vector<256x256xf32>
    tpu.vector_store %arg7[%c0_6, %c0_7], %9 {strides = array<i32>} : memref<256x256xf32, #tpu.memory_space<vmem>>, vector<256x256xf32>,
    %c0_i32_8 = arith.constant 0 : i32
    %11 = arith.cmpi eq, %arg2, %c0_i32_8 : i32
    %12 = arith.extui %11 : i1 to i32
    %c0_i32_9 = arith.constant 0 : i32
    %13 = arith.cmpi ne, %12, %c0_i32_9 : i32
    scf.if %13 {
      %c0_10 = arith.constant 0 : index
      %c0_11 = arith.constant 0 : index
      %14 = vector.load %arg7[%c0_10, %c0_11] : memref<256x256xf32, #tpu.memory_space<vmem>>, vector<256x256xf32>
      %c0_12 = arith.constant 0 : index
      %c0_13 = arith.constant 0 : index
      %15 = vector.load %arg5[%c0_12, %c0_13] : memref<1x256xf32, #tpu.memory_space<vmem>>, vector<1x256xf32>
      %16 = vector.broadcast %15 : vector<1x256xf32> to vector<256x256xf32>
      %17 = arith.addf %14, %16 : vector<256x256xf32>
      %c0_14 = arith.constant 0 : index
      %c0_15 = arith.constant 0 : index
      %18 = vector.load %arg6[%c0_14, %c0_15] : memref<256x256xf32, #tpu.memory_space<vmem>>, vector<256x256xf32>
      tpu.vector_store %arg6[%c0_14, %c0_15], %17 {strides = array<i32>} : memref<256x256xf32, #tpu.memory_space<vmem>>, vector<256x256xf32>,
    } else {
    }
    return
  }
  func.func @transform_0(%arg0: i32, %arg1: i32, %arg2: i32) -> (i32, i32) {
    %c0_i32 = arith.constant 0 : i32
    return %arg0, %arg2 : i32, i32
  }
  func.func @transform_1(%arg0: i32, %arg1: i32, %arg2: i32) -> (i32, i32) {
    %c0_i32 = arith.constant 0 : i32
    return %arg2, %arg1 : i32, i32
  }
  func.func @transform_2(%arg0: i32, %arg1: i32, %arg2: i32) -> (i32, i32) {
    %c0_i32 = arith.constant 0 : i32
    %c0_i32_0 = arith.constant 0 : i32
    return %c0_i32, %arg1 : i32, i32
  }
  func.func @transform_3(%arg0: i32, %arg1: i32, %arg2: i32) -> (i32, i32) {
    %c0_i32 = arith.constant 0 : i32
    return %arg0, %arg1 : i32, i32
  }
}

module attributes {stable_mosaic.version = 11 : i64} {
  func.func @_linear_kernel(%arg0: i32, %arg1: i32, %arg2: i32, %arg3: memref<256x256xf32, #tpu.memory_space<vmem>>, %arg4: memref<256x384xf32, #tpu.memory_space<vmem>>, %arg5: memref<1x384xf32, #tpu.memory_space<vmem>>, %arg6: memref<256x384xf32, #tpu.memory_space<vmem>>, %arg7: memref<256x384xf32, #tpu.memory_space<vmem>>) attributes {dimension_semantics = [#tpu.dimension_semantics<parallel>, #tpu.dimension_semantics<parallel>, #tpu.dimension_semantics<arbitrary>], iteration_bounds = array<i64: 1, 2, 1>, scalar_prefetch = 0 : i64, scratch_operands = 1 : i64, tpu.core_type = #tpu.core_type<tc>, window_params = [{transform_indices = @transform_0, window_bounds = array<i64: 256, 256>}, {transform_indices = @transform_1, window_bounds = array<i64: 256, 384>}, {transform_indices = @transform_2, window_bounds = array<i64: 1, 384>}, {transform_indices = @transform_3, window_bounds = array<i64: 256, 384>}]} {
    %c0_i32 = arith.constant 0 : i32
    %0 = arith.cmpi eq, %arg2, %c0_i32 : i32
    %1 = arith.extui %0 : i1 to i32
    %c0_i32_0 = arith.constant 0 : i32
    %2 = arith.cmpi ne, %1, %c0_i32_0 : i32
    scf.if %2 {
      %cst_10 = arith.constant 0.000000e+00 : f32
      %14 = vector.broadcast %cst_10 : f32 to vector<256x384xf32>
      %c0_11 = arith.constant 0 : index
      %c0_12 = arith.constant 0 : index
      %15 = vector.load %arg7[%c0_11, %c0_12] : memref<256x384xf32, #tpu.memory_space<vmem>>, vector<256x384xf32>
      tpu.vector_store %arg7[%c0_11, %c0_12], %14 {strides = array<i32>} : memref<256x384xf32, #tpu.memory_space<vmem>>, vector<256x384xf32>,
    } else {
    }
    %c0 = arith.constant 0 : index
    %c0_1 = arith.constant 0 : index
    %3 = vector.load %arg7[%c0, %c0_1] : memref<256x384xf32, #tpu.memory_space<vmem>>, vector<256x384xf32>
    %c0_2 = arith.constant 0 : index
    %c0_3 = arith.constant 0 : index
    %4 = vector.load %arg3[%c0_2, %c0_3] : memref<256x256xf32, #tpu.memory_space<vmem>>, vector<256x256xf32>
    %5 = arith.truncf %4 : vector<256x256xf32> to vector<256x256xbf16>
    %c0_4 = arith.constant 0 : index
    %c0_5 = arith.constant 0 : index
    %6 = vector.load %arg4[%c0_4, %c0_5] : memref<256x384xf32, #tpu.memory_space<vmem>>, vector<256x384xf32>
    %7 = arith.truncf %6 : vector<256x384xf32> to vector<256x384xbf16>
    %cst = arith.constant dense<0.000000e+00> : vector<256x384xf32>
    %8 = tpu.matmul %5, %7, %cst {dimension_numbers = #tpu.dot_dimension_numbers<[1], [0], [0], [1], [0, 0, 1, 1], [], []>} : vector<256x256xbf16>, vector<256x384xbf16>, vector<256x384xf32> -> vector<256x384xf32>
    %9 = arith.addf %3, %8 : vector<256x384xf32>
    %c0_6 = arith.constant 0 : index
    %c0_7 = arith.constant 0 : index
    %10 = vector.load %arg7[%c0_6, %c0_7] : memref<256x384xf32, #tpu.memory_space<vmem>>, vector<256x384xf32>
    tpu.vector_store %arg7[%c0_6, %c0_7], %9 {strides = array<i32>} : memref<256x384xf32, #tpu.memory_space<vmem>>, vector<256x384xf32>,
    %c0_i32_8 = arith.constant 0 : i32
    %11 = arith.cmpi eq, %arg2, %c0_i32_8 : i32
    %12 = arith.extui %11 : i1 to i32
    %c0_i32_9 = arith.constant 0 : i32
    %13 = arith.cmpi ne, %12, %c0_i32_9 : i32
    scf.if %13 {
      %c0_10 = arith.constant 0 : index
      %c0_11 = arith.constant 0 : index
      %14 = vector.load %arg7[%c0_10, %c0_11] : memref<256x384xf32, #tpu.memory_space<vmem>>, vector<256x384xf32>
      %c0_12 = arith.constant 0 : index
      %c0_13 = arith.constant 0 : index
      %15 = vector.load %arg5[%c0_12, %c0_13] : memref<1x384xf32, #tpu.memory_space<vmem>>, vector<1x384xf32>
      %16 = vector.broadcast %15 : vector<1x384xf32> to vector<256x384xf32>
      %17 = arith.addf %14, %16 : vector<256x384xf32>
      %c0_14 = arith.constant 0 : index
      %c0_15 = arith.constant 0 : index
      %18 = vector.load %arg6[%c0_14, %c0_15] : memref<256x384xf32, #tpu.memory_space<vmem>>, vector<256x384xf32>
      tpu.vector_store %arg6[%c0_14, %c0_15], %17 {strides = array<i32>} : memref<256x384xf32, #tpu.memory_space<vmem>>, vector<256x384xf32>,
    } else {
    }
    return
  }
  func.func @transform_0(%arg0: i32, %arg1: i32, %arg2: i32) -> (i32, i32) {
    %c0_i32 = arith.constant 0 : i32
    return %arg0, %arg2 : i32, i32
  }
  func.func @transform_1(%arg0: i32, %arg1: i32, %arg2: i32) -> (i32, i32) {
    %c0_i32 = arith.constant 0 : i32
    return %arg2, %arg1 : i32, i32
  }
  func.func @transform_2(%arg0: i32, %arg1: i32, %arg2: i32) -> (i32, i32) {
    %c0_i32 = arith.constant 0 : i32
    %c0_i32_0 = arith.constant 0 : i32
    return %c0_i32, %arg1 : i32, i32
  }
  func.func @transform_3(%arg0: i32, %arg1: i32, %arg2: i32) -> (i32, i32) {
    %c0_i32 = arith.constant 0 : i32
    return %arg0, %arg1 : i32, i32
  }
}

</mosaic_0001>

<bundles_post_ra>
// kernel: causal_self_attention.5
= control target key start
LH: loop header
LB: loop body
LE: loop exit
PB: predicated region body
PF: predicated region fallthrough
CT: control target
= control target key end

     0   :  { %s1421_s0 = inlined_call_operand.vmem [shape: f32[256,256], index: 0, kind: input, shape index: {}]   ;;  %s1422_s1 = inlined_call_operand.vmem [shape: f32[256,256], index: 1, kind: input, shape index: {}]   ;;  %s1423_s2 = inlined_call_operand.vmem [shape: f32[1,256], index: 2, kind: input, shape index: {}]   ;;  %s1424_s3 = inlined_call_operand.hbm [shape: f32[256,256], index: 3, kind: output, shape index: {}]  }
   0x1   :  { %v272_v0 = vld [vmem:[%s1422_s1 + $0xe8] sm:$0xff]  ;;  %v274_v1 = vld [vmem:[%s1422_s1 + $0xf8] sm:$0xff]  ;;  %v271_v2 = vld [vmem:[%s1422_s1 + $0xe0] sm:$0xff] }
   0x2   :  { %v322_v3 = vpack.c.bf16 %v274_v1, %v272_v0  ;;  %v273_v4 = vld [vmem:[%s1422_s1 + $0xf0] sm:$0xff]  ;;  %v268_v5 = vld [vmem:[%s1422_s1 + $0xc8] sm:$0xff]  ;;  %v270_v6 = vld [vmem:[%s1422_s1 + $0xd8] sm:$0xff] }
   0x3   :  { %v321_v7 = vpack.c.bf16 %v273_v4, %v271_v2  ;;  %v320_v8 = vpack.c.bf16 %v270_v6, %v268_v5  ;;  %v267_v9 = vld [vmem:[%s1422_s1 + $0xc0] sm:$0xff]  ;;  %v269_v10 = vld [vmem:[%s1422_s1 + $0xd0] sm:$0xff]  ;;  %v264_v11 = vld [vmem:[%s1422_s1 + $0xa8] sm:$0xff] }
   0x4   :  { %339 = vmatprep.subr.bf16.mxu0 %v322_v3  ;;  %883 = vmatprep.subr.bf16.mxu1 %v322_v3  ;;  %v266_v12 = vld [vmem:[%s1422_s1 + $0xb8] sm:$0xff]  ;;  %v319_v13 = vpack.c.bf16 %v269_v10, %v267_v9  ;;  %v263_v15 = vld [vmem:[%s1422_s1 + $0xa0] sm:$0xff]  ;;  %v265_v16 = vld [vmem:[%s1422_s1 + $0xb0] sm:$0xff] }
   0x5   :  { %340 = vmatpush1.bf16.msra.mxu0 %v321_v7  ;;  %899 = vmatpush1.bf16.msra.mxu1 %v321_v7  ;;  %v318_v14 = vpack.c.bf16 %v266_v12, %v264_v11  ;;  %v260_v17 = vld [vmem:[%s1422_s1 + $0x88] sm:$0xff]  ;;  %v262_v18 = vld [vmem:[%s1422_s1 + $0x98] sm:$0xff]  ;;  %v317_v19 = vpack.c.bf16 %v265_v16, %v263_v15  ;;  %v259_v21 = vld [vmem:[%s1422_s1 + $0x80] sm:$0xff] }
   0x6   :  { %341 = vmatprep.subr.bf16.mxu0 %v320_v8  ;;  %884 = vmatprep.subr.bf16.mxu1 %v320_v8  ;;  %v316_v20 = vpack.c.bf16 %v262_v18, %v260_v17  ;;  %v261_v22 = vld [vmem:[%s1422_s1 + $0x90] sm:$0xff]  ;;  %v256_v23 = vld [vmem:[%s1422_s1 + $0x68] sm:$0xff]  ;;  %v258_v24 = vld [vmem:[%s1422_s1 + $0x78] sm:$0xff] }
   0x7   :  { %v315_v25 = vpack.c.bf16 %v261_v22, %v259_v21  ;;  %v314_v26 = vpack.c.bf16 %v258_v24, %v256_v23  ;;  %v255_v27 = vld [vmem:[%s1422_s1 + $0x60] sm:$0xff]  ;;  %v257_v28 = vld [vmem:[%s1422_s1 + $0x70] sm:$0xff]  ;;  %v252_v29 = vld [vmem:[%s1422_s1 + $0x48] sm:$0xff] }
   0x8   :  { %v254_v30 = vld [vmem:[%s1422_s1 + $0x58] sm:$0xff]  ;;  %v313_v31 = vpack.c.bf16 %v257_v28, %v255_v27  ;;  %v251_v33 = vld [vmem:[%s1422_s1 + $0x40] sm:$0xff]  ;;  %v253_v34 = vld [vmem:[%s1422_s1 + $0x50] sm:$0xff] }
   0x9   :  { %342 = vmatpush1.bf16.msra.mxu0 %v319_v13  ;;  %900 = vmatpush1.bf16.msra.mxu1 %v319_v13  ;;  %v312_v32 = vpack.c.bf16 %v254_v30, %v252_v29  ;;  %v248_v35 = vld [vmem:[%s1422_s1 + $0x28] sm:$0xff]  ;;  %v250_v36 = vld [vmem:[%s1422_s1 + $0x38] sm:$0xff]  ;;  %v311_v37 = vpack.c.bf16 %v253_v34, %v251_v33  ;;  %v247_v38 = vld [vmem:[%s1422_s1 + $0x20] sm:$0xff] }
   0xa   :  { %343 = vmatprep.subr.bf16.mxu0 %v318_v14  ;;  %885 = vmatprep.subr.bf16.mxu1 %v318_v14  ;;  %v249_v39 = vld [vmem:[%s1422_s1 + $0x30] sm:$0xff]  ;;  %v310_v40 = vpack.c.bf16 %v250_v36, %v248_v35  ;;  %v244_v41 = vld [vmem:[%s1422_s1 + $0x8] sm:$0xff]  ;;  %v150_v43 = vld [vmem:[%s1421_s0 + $0x18] sm:$0xff] }
   0xb   :  { %v148_v42 = vld [vmem:[%s1421_s0 + $0x8] sm:$0xff]  ;;  %v246_v44 = vld [vmem:[%s1422_s1 + $0x18] sm:$0xff]  ;;  %v309_v49 = vpack.c.bf16 %v249_v39, %v247_v38  ;;  %v243_v51 = vld [vmem:[%s1422_s1] sm:$0xff] }
   0xc   :  { %v212_v45 = vpack.c.bf16 %v150_v43, %v148_v42  ;;  %v180_v46 = vld [vmem:[%s1421_s0 + $0x108] sm:$0xff]  ;;  %v182_v47 = vld [vmem:[%s1421_s0 + $0x118] sm:$0xff]  ;;  %v308_v50 = vpack.c.bf16 %v246_v44, %v244_v41  ;;  %v245_v52 = vld [vmem:[%s1422_s1 + $0x10] sm:$0xff] }
   0xd   :  { %344 = vmatpush1.bf16.msra.mxu0 %v317_v19  ;;  %901 = vmatpush1.bf16.msra.mxu1 %v317_v19  ;;  %v228_v48 = vpack.c.bf16 %v182_v47, %v180_v46  ;;  %v304_v53 = vld [vmem:[%s1422_s1 + $0x1e8] sm:$0xff]  ;;  %v306_v54 = vld [vmem:[%s1422_s1 + $0x1f8] sm:$0xff]  ;;  %v307_v55 = vpack.c.bf16 %v245_v52, %v243_v51  ;;  %v303_v57 = vld [vmem:[%s1422_s1 + $0x1e0] sm:$0xff] }
   0xe   :  { %345 = vmatprep.subr.bf16.mxu0 %v316_v20  ;;  %886 = vmatprep.subr.bf16.mxu1 %v316_v20  ;;  %v338_v56 = vpack.c.bf16 %v306_v54, %v304_v53  ;;  %v305_v58 = vld [vmem:[%s1422_s1 + $0x1f0] sm:$0xff]  ;;  %v300_v59 = vld [vmem:[%s1422_s1 + $0x1c8] sm:$0xff]  ;;  %v302_v60 = vld [vmem:[%s1422_s1 + $0x1d8] sm:$0xff] }
   0xf   :  { %371 = vmatprep.mubr.bf16.mxu0 %v212_v45  ;;  %451 = vmatprep.mubr.bf16.mxu1 %v228_v48  ;;  %v337_v61 = vpack.c.bf16 %v305_v58, %v303_v57  ;;  %v336_v62 = vpack.c.bf16 %v302_v60, %v300_v59  ;;  %v299_v63 = vld [vmem:[%s1422_s1 + $0x1c0] sm:$0xff]  ;;  %v301_v0 = vld [vmem:[%s1422_s1 + $0x1d0] sm:$0xff]  ;;  %v296_v1 = vld [vmem:[%s1422_s1 + $0x1a8] sm:$0xff] }
  0x10   :  { %v298_v2 = vld [vmem:[%s1422_s1 + $0x1b8] sm:$0xff]  ;;  %v335_v3 = vpack.c.bf16 %v301_v0, %v299_v63  ;;  %v295_v5 = vld [vmem:[%s1422_s1 + $0x1a0] sm:$0xff]  ;;  %v297_v6 = vld [vmem:[%s1422_s1 + $0x1b0] sm:$0xff] }
  0x11   :  { %346 = vmatpush1.bf16.msra.mxu0 %v315_v25  ;;  %902 = vmatpush1.bf16.msra.mxu1 %v315_v25  ;;  %v334_v4 = vpack.c.bf16 %v298_v2, %v296_v1  ;;  %v292_v7 = vld [vmem:[%s1422_s1 + $0x188] sm:$0xff]  ;;  %v294_v8 = vld [vmem:[%s1422_s1 + $0x198] sm:$0xff]  ;;  %v333_v9 = vpack.c.bf16 %v297_v6, %v295_v5  ;;  %v291_v11 = vld [vmem:[%s1422_s1 + $0x180] sm:$0xff] }
  0x12   :  { %347 = vmatprep.subr.bf16.mxu0 %v314_v26  ;;  %887 = vmatprep.subr.bf16.mxu1 %v314_v26  ;;  %v332_v10 = vpack.c.bf16 %v294_v8, %v292_v7  ;;  %v293_v12 = vld [vmem:[%s1422_s1 + $0x190] sm:$0xff]  ;;  %v288_v13 = vld [vmem:[%s1422_s1 + $0x168] sm:$0xff]  ;;  %v290_v14 = vld [vmem:[%s1422_s1 + $0x178] sm:$0xff] }
  0x15   :  { %348 = vmatpush1.bf16.msra.mxu0 %v313_v31  ;;  %903 = vmatpush1.bf16.msra.mxu1 %v313_v31 }
  0x16   :  { %349 = vmatprep.subr.bf16.mxu0 %v312_v32  ;;  %888 = vmatprep.subr.bf16.mxu1 %v312_v32 }
  0x19   :  { %350 = vmatpush1.bf16.msra.mxu0 %v311_v37  ;;  %904 = vmatpush1.bf16.msra.mxu1 %v311_v37 }
  0x1a   :  { %351 = vmatprep.subr.bf16.mxu0 %v310_v40  ;;  %889 = vmatprep.subr.bf16.mxu1 %v310_v40 }
  0x1d   :  { %352 = vmatpush1.bf16.msra.mxu0 %v309_v49  ;;  %905 = vmatpush1.bf16.msra.mxu1 %v309_v49 }
  0x1e   :  { %353 = vmatprep.subr.bf16.mxu0 %v308_v50  ;;  %890 = vmatprep.subr.bf16.mxu1 %v308_v50 }
  0x21   :  { %354 = vmatpush1.bf16.msra.mxu0 %v307_v55  ;;  %906 = vmatpush1.bf16.msra.mxu1 %v307_v55 }
  0x22   :  { %355 = vmatprep.subr.bf16.mxu0 %v338_v56  ;;  %891 = vmatprep.subr.bf16.mxu1 %v338_v56 }
  0x25   :  { %356 = vmatpush2.bf16.msra.mxu0 %v337_v61  ;;  %907 = vmatpush2.bf16.msra.mxu1 %v337_v61 }
  0x26   :  { %357 = vmatprep.subr.bf16.mxu0 %v336_v62  ;;  %892 = vmatprep.subr.bf16.mxu1 %v336_v62 }
  0x29   :  { %358 = vmatpush2.bf16.msra.mxu0 %v335_v3  ;;  %908 = vmatpush2.bf16.msra.mxu1 %v335_v3 }
  0x2a   :  { %359 = vmatprep.subr.bf16.mxu0 %v334_v4  ;;  %893 = vmatprep.subr.bf16.mxu1 %v334_v4 }
  0x2b   :  { %8 = vsyncpa [#allocation4], 0  ;;  %v331_v15 = vpack.c.bf16 %v293_v12, %v291_v11  ;;  %v330_v16 = vpack.c.bf16 %v290_v14, %v288_v13  ;;  %v287_v17 = vld [vmem:[%s1422_s1 + $0x160] sm:$0xff]  ;;  %v289_v18 = vld [vmem:[%s1422_s1 + $0x170] sm:$0xff] }
  0x2c   :  { %v284_v19 = vld [vmem:[%s1422_s1 + $0x148] sm:$0xff]  ;;  %v286_v20 = vld [vmem:[%s1422_s1 + $0x158] sm:$0xff]  ;;  %v329_v21 = vpack.c.bf16 %v289_v18, %v287_v17  ;;  %v283_v23 = vld [vmem:[%s1422_s1 + $0x140] sm:$0xff] }
  0x2d   :  { %360 = vmatpush2.bf16.msra.mxu0 %v333_v9  ;;  %909 = vmatpush2.bf16.msra.mxu1 %v333_v9  ;;  %v328_v22 = vpack.c.bf16 %v286_v20, %v284_v19  ;;  %v285_v24 = vld [vmem:[%s1422_s1 + $0x150] sm:$0xff]  ;;  %v280_v25 = vld [vmem:[%s1422_s1 + $0x128] sm:$0xff]  ;;  %v282_v26 = vld [vmem:[%s1422_s1 + $0x138] sm:$0xff] }
  0x2e   :  { %361 = vmatprep.subr.bf16.mxu0 %v332_v10  ;;  %894 = vmatprep.subr.bf16.mxu1 %v332_v10  ;;  %v327_v27 = vpack.c.bf16 %v285_v24, %v283_v23  ;;  %v326_v28 = vpack.c.bf16 %v282_v26, %v280_v25  ;;  %v279_v29 = vld [vmem:[%s1422_s1 + $0x120] sm:$0xff]  ;;  %v281_v30 = vld [vmem:[%s1422_s1 + $0x130] sm:$0xff]  ;;  %v276_v31 = vld [vmem:[%s1422_s1 + $0x108] sm:$0xff] }
  0x2f   :  { %v278_v32 = vld [vmem:[%s1422_s1 + $0x118] sm:$0xff]  ;;  %v325_v33 = vpack.c.bf16 %v281_v30, %v279_v29  ;;  %v275_v35 = vld [vmem:[%s1422_s1 + $0x100] sm:$0xff]  ;;  %v277_v36 = vld [vmem:[%s1422_s1 + $0x110] sm:$0xff] }
  0x30   :  { %v324_v34 = vpack.c.bf16 %v278_v32, %v276_v31  ;;  %v147_v37 = vld [vmem:[%s1421_s0] sm:$0xff]  ;;  %v149_v38 = vld [vmem:[%s1421_s0 + $0x10] sm:$0xff]  ;;  %v323_v39 = vpack.c.bf16 %v277_v36, %v275_v35  ;;  %v152_v42 = vld [vmem:[%s1421_s0 + $0x28] sm:$0xff] }
  0x31   :  { %362 = vmatpush2.bf16.msra.mxu0 %v331_v15  ;;  %910 = vmatpush2.bf16.msra.mxu1 %v331_v15  ;;  %v179_v40 = vld [vmem:[%s1421_s0 + $0x100] sm:$0xff]  ;;  %v181_v41 = vld [vmem:[%s1421_s0 + $0x110] sm:$0xff]  ;;  %v154_v43 = vld [vmem:[%s1421_s0 + $0x38] sm:$0xff]  ;;  %v211_v46 = vpack.c.bf16 %v149_v38, %v147_v37 }
  0x32   :  { %363 = vmatprep.subr.bf16.mxu0 %v330_v16  ;;  %895 = vmatprep.subr.bf16.mxu1 %v330_v16  ;;  %v184_v44 = vld [vmem:[%s1421_s0 + $0x128] sm:$0xff]  ;;  %v186_v45 = vld [vmem:[%s1421_s0 + $0x138] sm:$0xff]  ;;  %v227_v47 = vpack.c.bf16 %v181_v41, %v179_v40  ;;  %v214_v48 = vpack.c.bf16 %v154_v43, %v152_v42  ;;  %v151_v50 = vld [vmem:[%s1421_s0 + $0x20] sm:$0xff] }
  0x33   :  { %v230_v49 = vpack.c.bf16 %v186_v45, %v184_v44  ;;  %v153_v51 = vld [vmem:[%s1421_s0 + $0x30] sm:$0xff]  ;;  %v183_v52 = vld [vmem:[%s1421_s0 + $0x120] sm:$0xff]  ;;  %v156_v54 = vld [vmem:[%s1421_s0 + $0x48] sm:$0xff] }
  0x34   :  { %v185_v53 = vld [vmem:[%s1421_s0 + $0x130] sm:$0xff]  ;;  %v158_v55 = vld [vmem:[%s1421_s0 + $0x58] sm:$0xff]  ;;  %v188_v56 = vld [vmem:[%s1421_s0 + $0x148] sm:$0xff]  ;;  %v213_v58 = vpack.c.bf16 %v153_v51, %v151_v50 }
  0x35   :  { %364 = vmatpush2.bf16.msra.mxu0 %v329_v21  ;;  %911 = vmatpush2.bf16.msra.mxu1 %v329_v21  ;;  %v190_v57 = vld [vmem:[%s1421_s0 + $0x158] sm:$0xff]  ;;  %v229_v59 = vpack.c.bf16 %v185_v53, %v183_v52  ;;  %v216_v60 = vpack.c.bf16 %v158_v55, %v156_v54  ;;  %v155_v62 = vld [vmem:[%s1421_s0 + $0x40] sm:$0xff]  ;;  %v157_v63 = vld [vmem:[%s1421_s0 + $0x50] sm:$0xff] }
  0x36   :  { %365 = vmatprep.subr.bf16.mxu0 %v328_v22  ;;  %896 = vmatprep.subr.bf16.mxu1 %v328_v22  ;;  %v232_v61 = vpack.c.bf16 %v190_v57, %v188_v56  ;;  %v187_v0 = vld [vmem:[%s1421_s0 + $0x140] sm:$0xff]  ;;  %v189_v1 = vld [vmem:[%s1421_s0 + $0x150] sm:$0xff]  ;;  %v160_v2 = vld [vmem:[%s1421_s0 + $0x68] sm:$0xff]  ;;  %v215_v6 = vpack.c.bf16 %v157_v63, %v155_v62 }
  0x37   :  { %v162_v3 = vld [vmem:[%s1421_s0 + $0x78] sm:$0xff]  ;;  %v192_v4 = vld [vmem:[%s1421_s0 + $0x168] sm:$0xff]  ;;  %v231_v7 = vpack.c.bf16 %v189_v1, %v187_v0  ;;  %v159_v10 = vld [vmem:[%s1421_s0 + $0x60] sm:$0xff]  ;;  %v729_v0 = vlaneseq }
  0x38   :  { %v194_v5 = vld [vmem:[%s1421_s0 + $0x178] sm:$0xff]  ;;  %v218_v8 = vpack.c.bf16 %v162_v3, %v160_v2  ;;  %v161_v11 = vld [vmem:[%s1421_s0 + $0x70] sm:$0xff]  ;;  %v191_v12 = vld [vmem:[%s1421_s0 + $0x160] sm:$0xff] }
  0x39   :  { %366 = vmatpush2.bf16.msra.mxu0 %v327_v27  ;;  %912 = vmatpush2.bf16.msra.mxu1 %v327_v27  ;;  %v234_v9 = vpack.c.bf16 %v194_v5, %v192_v4  ;;  %v193_v13 = vld [vmem:[%s1421_s0 + $0x170] sm:$0xff]  ;;  %v164_v14 = vld [vmem:[%s1421_s0 + $0x88] sm:$0xff]  ;;  %v166_v15 = vld [vmem:[%s1421_s0 + $0x98] sm:$0xff]  ;;  %v217_v18 = vpack.c.bf16 %v161_v11, %v159_v10  ;;  %v730_v1 = vshrl.u32 %v729_v0, 7 }
  0x3a   :  { %367 = vmatprep.subr.bf16.mxu0 %v326_v28  ;;  %897 = vmatprep.subr.bf16.mxu1 %v326_v28  ;;  %v196_v16 = vld [vmem:[%s1421_s0 + $0x188] sm:$0xff]  ;;  %v198_v17 = vld [vmem:[%s1421_s0 + $0x198] sm:$0xff]  ;;  %v233_v19 = vpack.c.bf16 %v193_v13, %v191_v12  ;;  %v220_v20 = vpack.c.bf16 %v166_v15, %v164_v14  ;;  %v163_v22 = vld [vmem:[%s1421_s0 + $0x80] sm:$0xff] }
  0x3b   :  { %v236_v21 = vpack.c.bf16 %v198_v17, %v196_v16  ;;  %v165_v23 = vld [vmem:[%s1421_s0 + $0x90] sm:$0xff]  ;;  %v195_v24 = vld [vmem:[%s1421_s0 + $0x180] sm:$0xff]  ;;  %v168_v26 = vld [vmem:[%s1421_s0 + $0xa8] sm:$0xff]  ;;  %v731_v2 = vsub.s32 0, %v730_v1  ;;  %v735_v4 = vsub.s32 1, %v730_v1 }
  0x3c   :  { %v197_v25 = vld [vmem:[%s1421_s0 + $0x190] sm:$0xff]  ;;  %v170_v27 = vld [vmem:[%s1421_s0 + $0xb8] sm:$0xff]  ;;  %v200_v28 = vld [vmem:[%s1421_s0 + $0x1a8] sm:$0xff]  ;;  %v219_v30 = vpack.c.bf16 %v165_v23, %v163_v22 }
  0x3d   :  { %368 = vmatpush2.bf16.msra.mxu0 %v325_v33  ;;  %913 = vmatpush2.bf16.msra.mxu1 %v325_v33  ;;  %v202_v29 = vld [vmem:[%s1421_s0 + $0x1b8] sm:$0xff]  ;;  %v235_v31 = vpack.c.bf16 %v197_v25, %v195_v24  ;;  %v222_v32 = vpack.c.bf16 %v170_v27, %v168_v26  ;;  %v169_v35 = vld [vmem:[%s1421_s0 + $0xb0] sm:$0xff]  ;;  %v199_v36 = vld [vmem:[%s1421_s0 + $0x1a0] sm:$0xff] }
  0x3e   :  { %369 = vmatprep.subr.bf16.mxu0 %v324_v34  ;;  %898 = vmatprep.subr.bf16.mxu1 %v324_v34  ;;  %v238_v33 = vpack.c.bf16 %v202_v29, %v200_v28  ;;  %v167_v34 = vld [vmem:[%s1421_s0 + $0xa0] sm:$0xff]  ;;  %v201_v37 = vld [vmem:[%s1421_s0 + $0x1b0] sm:$0xff]  ;;  %v172_v38 = vld [vmem:[%s1421_s0 + $0xc8] sm:$0xff] }
  0x3f   :  { %v204_v40 = vld [vmem:[%s1421_s0 + $0x1c8] sm:$0xff]  ;;  %v206_v41 = vld [vmem:[%s1421_s0 + $0x1d8] sm:$0xff]  ;;  %v221_v42 = vpack.c.bf16 %v169_v35, %v167_v34  ;;  %v237_v43 = vpack.c.bf16 %v201_v37, %v199_v36  ;;  %v727_v3 = vld [vmem:[%s1423_s2] sm:$0x3] }
  0x40   :  { %v240_v45 = vpack.c.bf16 %v206_v41, %v204_v40  ;;  %v176_v50 = vld [vmem:[%s1421_s0 + $0xe8] sm:$0xff]  ;;  %v178_v51 = vld [vmem:[%s1421_s0 + $0xf8] sm:$0xff]  ;;  %v1350_v5 = vrot.slane %v727_v3, %v731_v2 }
  0x41   :  { %370 = vmatpush2.bf16.msra.mxu0 %v323_v39  ;;  %914 = vmatpush2.bf16.msra.mxu1 %v323_v39  ;;  %v174_v39 = vld [vmem:[%s1421_s0 + $0xd8] sm:$0xff]  ;;  %v208_v52 = vld [vmem:[%s1421_s0 + $0x1e8] sm:$0xff]  ;;  %v226_v56 = vpack.c.bf16 %v178_v51, %v176_v50 }
  0x42   :  { %v224_v44 = vpack.c.bf16 %v174_v39, %v172_v38  ;;  %v210_v53 = vld [vmem:[%s1421_s0 + $0x1f8] sm:$0xff] }
  0x43   :  { %v242_v57 = vpack.c.bf16 %v210_v53, %v208_v52 }
  0x44   :  { %372 = vmatmul.mubr.bf16.vlgmr.msra.gmra.mxu0 %v211_v46  ;;  %452 = vmatmul.mubr.bf16.vlgmr.msra.gmra.mxu1 %v227_v47  ;;  %v171_v46 = vld [vmem:[%s1421_s0 + $0xc0] sm:$0xff]  ;;  %v173_v47 = vld [vmem:[%s1421_s0 + $0xd0] sm:$0xff] }
  0x45   :  { %381 = vmatprep.mubr.bf16.mxu0 %v214_v48  ;;  %461 = vmatprep.mubr.bf16.mxu1 %v230_v49  ;;  %v203_v48 = vld [vmem:[%s1421_s0 + $0x1c0] sm:$0xff]  ;;  %v205_v49 = vld [vmem:[%s1421_s0 + $0x1d0] sm:$0xff]  ;;  %v223_v54 = vpack.c.bf16 %v173_v47, %v171_v46 }
  0x46   :  { %v239_v55 = vpack.c.bf16 %v205_v49, %v203_v48 }
  0x4c   :  { %382 = vmatmul.mubr.bf16.gmra.mxu0 %v213_v58  ;;  %462 = vmatmul.mubr.bf16.gmra.mxu1 %v229_v59  ;;  %v175_v58 = vld [vmem:[%s1421_s0 + $0xe0] sm:$0xff]  ;;  %v177_v59 = vld [vmem:[%s1421_s0 + $0xf0] sm:$0xff] }
  0x4d   :  { %391 = vmatprep.mubr.bf16.mxu0 %v216_v60  ;;  %471 = vmatprep.mubr.bf16.mxu1 %v232_v61  ;;  %v207_v60 = vld [vmem:[%s1421_s0 + $0x1e0] sm:$0xff]  ;;  %v209_v61 = vld [vmem:[%s1421_s0 + $0x1f0] sm:$0xff]  ;;  %v225_v62 = vpack.c.bf16 %v177_v59, %v175_v58  ;;  %s940_s0 = smov [#allocation3]  }
  0x4e   :  { %v241_v63 = vpack.c.bf16 %v209_v61, %v207_v60  ;;  %s872_s2 = sshll.u32 %s940_s0, 4  ;;  %s873_s2 = int_to_ptr.vmem [resolvable:$true] %s872_s2 }
  0x4f   :  { %s918_s22 = scalar_lea.vmem %s873_s2, 8192  ;;  %p923_p1 = scmp.lt.s32.totalorder %s873_s2, %s873_s2 }
  0x50   :  { %p919_p0 = scmp.ne.s32.totalorder %s873_s2, %s918_s22  ;;  %p924_p2 = scmp.lt.s32.totalorder %s918_s22, %s918_s22 }
  0x52   :  { %p925_p3 = por %p924_p2, %p923_p1 }
  0x54   :  { %392 = vmatmul.mubr.bf16.gmra.mxu0 %v215_v6  ;;  %472 = vmatmul.mubr.bf16.gmra.mxu1 %v231_v7  ;;  %v1352_v6 = vrot.slane %v727_v3, %v735_v4  ;;  %p926_p4 = pnand %p925_p3, %p919_p0 }
  0x55   :  { %401 = vmatprep.mubr.bf16.mxu0 %v218_v8  ;;  %481 = vmatprep.mubr.bf16.mxu1 %v234_v9 }
  0x5c   :  { %402 = vmatmul.mubr.bf16.gmra.mxu0 %v217_v18  ;;  %482 = vmatmul.mubr.bf16.gmra.mxu1 %v233_v19 }
  0x5d   :  { %411 = vmatprep.mubr.bf16.mxu0 %v220_v20  ;;  %491 = vmatprep.mubr.bf16.mxu1 %v236_v21 }
  0x64   :  { %412 = vmatmul.mubr.bf16.gmra.mxu0 %v219_v30  ;;  %492 = vmatmul.mubr.bf16.gmra.mxu1 %v235_v31 }
  0x65   :  { %421 = vmatprep.mubr.bf16.mxu0 %v222_v32  ;;  %501 = vmatprep.mubr.bf16.mxu1 %v238_v33 }
  0x6c   :  { %422 = vmatmul.mubr.bf16.gmra.mxu0 %v221_v42  ;;  %502 = vmatmul.mubr.bf16.gmra.mxu1 %v237_v43 }
  0x6d   :  { %431 = vmatprep.mubr.bf16.mxu0 %v224_v44  ;;  %511 = vmatprep.mubr.bf16.mxu1 %v240_v45 }
  0x74   :  { %432 = vmatmul.mubr.bf16.gmra.mxu0 %v223_v54  ;;  %512 = vmatmul.mubr.bf16.gmra.mxu1 %v239_v55 }
  0x75   :  { %441 = vmatprep.mubr.bf16.mxu0 %v226_v56  ;;  %521 = vmatprep.mubr.bf16.mxu1 %v242_v57 }
  0x7c   :  { %442 = vmatmul.mubr.bf16.gmra.mxu0 %v225_v62  ;;  %522 = vmatmul.mubr.bf16.gmra.mxu1 %v241_v63 }
 0x104   :  { %v373_v7 = vpop.f32.mrf.mxu0  ;;  %v453_v8 = vpop.f32.mrf.mxu1 }
 0x105   :  { %v739_v9 = vadd.f32 %v1350_v5, %v373_v7  ;;  %v771_v10 = vadd.f32 %v1350_v5, %v453_v8 }
 0x106   :  { %v375_v11 = vpop.f32.mrf.mxu0  ;;  %v455_v12 = vpop.f32.mrf.mxu1 }
 0x107   :  { %803 = vst [vmem:[#allocation3] sm:$0xff] %v739_v9  ;;  %835 = vst [vmem:[#allocation3 + $0x100] sm:$0xff] %v771_v10  ;;  %v740_v13 = vadd.f32 %v1352_v6, %v375_v11  ;;  %v772_v14 = vadd.f32 %v1352_v6, %v455_v12 }
 0x108   :  { %v377_v15 = vpop.f32.mrf.mxu0  ;;  %v457_v16 = vpop.f32.mrf.mxu1 }
 0x109   :  { %804 = vst [vmem:[#allocation3 + $0x8] sm:$0xff] %v740_v13  ;;  %836 = vst [vmem:[#allocation3 + $0x108] sm:$0xff] %v772_v14  ;;  %v741_v17 = vadd.f32 %v1350_v5, %v377_v15  ;;  %v773_v18 = vadd.f32 %v1350_v5, %v457_v16 }
 0x10a   :  { %v379_v19 = vpop.f32.mrf.mxu0  ;;  %v459_v20 = vpop.f32.mrf.mxu1 }
 0x10b   :  { %805 = vst [vmem:[#allocation3 + $0x10] sm:$0xff] %v741_v17  ;;  %837 = vst [vmem:[#allocation3 + $0x110] sm:$0xff] %v773_v18  ;;  %v742_v21 = vadd.f32 %v1352_v6, %v379_v19  ;;  %v774_v22 = vadd.f32 %v1352_v6, %v459_v20 }
 0x10c   :  { %v383_v23 = vpop.f32.mrf.mxu0  ;;  %v463_v24 = vpop.f32.mrf.mxu1 }
 0x10d   :  { %806 = vst [vmem:[#allocation3 + $0x18] sm:$0xff] %v742_v21  ;;  %838 = vst [vmem:[#allocation3 + $0x118] sm:$0xff] %v774_v22  ;;  %v743_v25 = vadd.f32 %v1350_v5, %v383_v23  ;;  %v775_v26 = vadd.f32 %v1350_v5, %v463_v24 }
 0x10e   :  { %v385_v27 = vpop.f32.mrf.mxu0  ;;  %v465_v28 = vpop.f32.mrf.mxu1 }
 0x10f   :  { %807 = vst [vmem:[#allocation3 + $0x20] sm:$0xff] %v743_v25  ;;  %839 = vst [vmem:[#allocation3 + $0x120] sm:$0xff] %v775_v26  ;;  %v744_v29 = vadd.f32 %v1352_v6, %v385_v27  ;;  %v776_v30 = vadd.f32 %v1352_v6, %v465_v28 }
 0x110   :  { %v387_v31 = vpop.f32.mrf.mxu0  ;;  %v467_v32 = vpop.f32.mrf.mxu1 }
 0x111   :  { %808 = vst [vmem:[#allocation3 + $0x28] sm:$0xff] %v744_v29  ;;  %840 = vst [vmem:[#allocation3 + $0x128] sm:$0xff] %v776_v30  ;;  %v745_v33 = vadd.f32 %v1350_v5, %v387_v31  ;;  %v777_v34 = vadd.f32 %v1350_v5, %v467_v32 }
 0x112   :  { %v389_v35 = vpop.f32.mrf.mxu0  ;;  %v469_v36 = vpop.f32.mrf.mxu1 }
 0x113   :  { %809 = vst [vmem:[#allocation3 + $0x30] sm:$0xff] %v745_v33  ;;  %841 = vst [vmem:[#allocation3 + $0x130] sm:$0xff] %v777_v34  ;;  %v746_v37 = vadd.f32 %v1352_v6, %v389_v35  ;;  %v778_v38 = vadd.f32 %v1352_v6, %v469_v36 }
 0x114   :  { %v393_v39 = vpop.f32.mrf.mxu0  ;;  %v473_v40 = vpop.f32.mrf.mxu1 }
 0x115   :  { %810 = vst [vmem:[#allocation3 + $0x38] sm:$0xff] %v746_v37  ;;  %842 = vst [vmem:[#allocation3 + $0x138] sm:$0xff] %v778_v38  ;;  %v747_v41 = vadd.f32 %v1350_v5, %v393_v39  ;;  %v779_v42 = vadd.f32 %v1350_v5, %v473_v40 }
 0x116   :  { %v395_v43 = vpop.f32.mrf.mxu0  ;;  %v475_v44 = vpop.f32.mrf.mxu1 }
 0x117   :  { %811 = vst [vmem:[#allocation3 + $0x40] sm:$0xff] %v747_v41  ;;  %843 = vst [vmem:[#allocation3 + $0x140] sm:$0xff] %v779_v42  ;;  %v748_v45 = vadd.f32 %v1352_v6, %v395_v43  ;;  %v780_v46 = vadd.f32 %v1352_v6, %v475_v44 }
 0x118   :  { %v397_v47 = vpop.f32.mrf.mxu0  ;;  %v477_v48 = vpop.f32.mrf.mxu1 }
 0x119   :  { %812 = vst [vmem:[#allocation3 + $0x48] sm:$0xff] %v748_v45  ;;  %844 = vst [vmem:[#allocation3 + $0x148] sm:$0xff] %v780_v46  ;;  %v749_v49 = vadd.f32 %v1350_v5, %v397_v47  ;;  %v781_v50 = vadd.f32 %v1350_v5, %v477_v48 }
 0x11a   :  { %v399_v51 = vpop.f32.mrf.mxu0  ;;  %v479_v52 = vpop.f32.mrf.mxu1 }
 0x11b   :  { %813 = vst [vmem:[#allocation3 + $0x50] sm:$0xff] %v749_v49  ;;  %845 = vst [vmem:[#allocation3 + $0x150] sm:$0xff] %v781_v50  ;;  %v750_v53 = vadd.f32 %v1352_v6, %v399_v51  ;;  %v782_v54 = vadd.f32 %v1352_v6, %v479_v52 }
 0x11c   :  { %v403_v55 = vpop.f32.mrf.mxu0  ;;  %v483_v56 = vpop.f32.mrf.mxu1 }
 0x11d   :  { %814 = vst [vmem:[#allocation3 + $0x58] sm:$0xff] %v750_v53  ;;  %846 = vst [vmem:[#allocation3 + $0x158] sm:$0xff] %v782_v54  ;;  %v751_v57 = vadd.f32 %v1350_v5, %v403_v55  ;;  %v783_v58 = vadd.f32 %v1350_v5, %v483_v56 }
 0x11e   :  { %v405_v59 = vpop.f32.mrf.mxu0  ;;  %v485_v60 = vpop.f32.mrf.mxu1 }
 0x11f   :  { %815 = vst [vmem:[#allocation3 + $0x60] sm:$0xff] %v751_v57  ;;  %847 = vst [vmem:[#allocation3 + $0x160] sm:$0xff] %v783_v58  ;;  %v752_v61 = vadd.f32 %v1352_v6, %v405_v59  ;;  %v784_v62 = vadd.f32 %v1352_v6, %v485_v60 }
 0x120   :  { %v407_v63 = vpop.f32.mrf.mxu0  ;;  %v487_v0 = vpop.f32.mrf.mxu1 }
 0x121   :  { %816 = vst [vmem:[#allocation3 + $0x68] sm:$0xff] %v752_v61  ;;  %848 = vst [vmem:[#allocation3 + $0x168] sm:$0xff] %v784_v62  ;;  %v753_v1 = vadd.f32 %v1350_v5, %v407_v63  ;;  %v785_v2 = vadd.f32 %v1350_v5, %v487_v0 }
 0x122   :  { %v409_v3 = vpop.f32.mrf.mxu0  ;;  %v489_v4 = vpop.f32.mrf.mxu1 }
 0x123   :  { %817 = vst [vmem:[#allocation3 + $0x70] sm:$0xff] %v753_v1  ;;  %849 = vst [vmem:[#allocation3 + $0x170] sm:$0xff] %v785_v2  ;;  %v754_v7 = vadd.f32 %v1352_v6, %v409_v3  ;;  %v786_v8 = vadd.f32 %v1352_v6, %v489_v4 }
 0x124   :  { %v413_v9 = vpop.f32.mrf.mxu0  ;;  %v493_v10 = vpop.f32.mrf.mxu1 }
 0x125   :  { %818 = vst [vmem:[#allocation3 + $0x78] sm:$0xff] %v754_v7  ;;  %850 = vst [vmem:[#allocation3 + $0x178] sm:$0xff] %v786_v8  ;;  %v755_v11 = vadd.f32 %v1350_v5, %v413_v9  ;;  %v787_v12 = vadd.f32 %v1350_v5, %v493_v10 }
 0x126   :  { %v415_v13 = vpop.f32.mrf.mxu0  ;;  %v495_v14 = vpop.f32.mrf.mxu1 }
 0x127   :  { %819 = vst [vmem:[#allocation3 + $0x80] sm:$0xff] %v755_v11  ;;  %851 = vst [vmem:[#allocation3 + $0x180] sm:$0xff] %v787_v12  ;;  %v756_v15 = vadd.f32 %v1352_v6, %v415_v13  ;;  %v788_v16 = vadd.f32 %v1352_v6, %v495_v14 }
 0x128   :  { %v417_v17 = vpop.f32.mrf.mxu0  ;;  %v497_v18 = vpop.f32.mrf.mxu1 }
 0x129   :  { %820 = vst [vmem:[#allocation3 + $0x88] sm:$0xff] %v756_v15  ;;  %852 = vst [vmem:[#allocation3 + $0x188] sm:$0xff] %v788_v16  ;;  %v757_v19 = vadd.f32 %v1350_v5, %v417_v17  ;;  %v789_v20 = vadd.f32 %v1350_v5, %v497_v18 }
 0x12a   :  { %v419_v21 = vpop.f32.mrf.mxu0  ;;  %v499_v22 = vpop.f32.mrf.mxu1 }
 0x12b   :  { %821 = vst [vmem:[#allocation3 + $0x90] sm:$0xff] %v757_v19  ;;  %853 = vst [vmem:[#allocation3 + $0x190] sm:$0xff] %v789_v20  ;;  %v758_v23 = vadd.f32 %v1352_v6, %v419_v21  ;;  %v790_v24 = vadd.f32 %v1352_v6, %v499_v22 }
 0x12c   :  { %v423_v25 = vpop.f32.mrf.mxu0  ;;  %v503_v26 = vpop.f32.mrf.mxu1 }
 0x12d   :  { %822 = vst [vmem:[#allocation3 + $0x98] sm:$0xff] %v758_v23  ;;  %854 = vst [vmem:[#allocation3 + $0x198] sm:$0xff] %v790_v24  ;;  %v759_v27 = vadd.f32 %v1350_v5, %v423_v25  ;;  %v791_v28 = vadd.f32 %v1350_v5, %v503_v26 }
 0x12e   :  { %v425_v29 = vpop.f32.mrf.mxu0  ;;  %v505_v30 = vpop.f32.mrf.mxu1 }
 0x12f   :  { %823 = vst [vmem:[#allocation3 + $0xa0] sm:$0xff] %v759_v27  ;;  %855 = vst [vmem:[#allocation3 + $0x1a0] sm:$0xff] %v791_v28  ;;  %v760_v31 = vadd.f32 %v1352_v6, %v425_v29  ;;  %v792_v32 = vadd.f32 %v1352_v6, %v505_v30 }
 0x130   :  { %v427_v33 = vpop.f32.mrf.mxu0  ;;  %v507_v34 = vpop.f32.mrf.mxu1 }
 0x131   :  { %824 = vst [vmem:[#allocation3 + $0xa8] sm:$0xff] %v760_v31  ;;  %856 = vst [vmem:[#allocation3 + $0x1a8] sm:$0xff] %v792_v32  ;;  %v761_v35 = vadd.f32 %v1350_v5, %v427_v33  ;;  %v793_v36 = vadd.f32 %v1350_v5, %v507_v34 }
 0x132   :  { %v429_v37 = vpop.f32.mrf.mxu0  ;;  %v509_v38 = vpop.f32.mrf.mxu1 }
 0x133   :  { %825 = vst [vmem:[#allocation3 + $0xb0] sm:$0xff] %v761_v35  ;;  %857 = vst [vmem:[#allocation3 + $0x1b0] sm:$0xff] %v793_v36  ;;  %v762_v39 = vadd.f32 %v1352_v6, %v429_v37  ;;  %v794_v40 = vadd.f32 %v1352_v6, %v509_v38 }
 0x134   :  { %v433_v41 = vpop.f32.mrf.mxu0  ;;  %v513_v42 = vpop.f32.mrf.mxu1 }
 0x135   :  { %826 = vst [vmem:[#allocation3 + $0xb8] sm:$0xff] %v762_v39  ;;  %858 = vst [vmem:[#allocation3 + $0x1b8] sm:$0xff] %v794_v40  ;;  %v763_v43 = vadd.f32 %v1350_v5, %v433_v41  ;;  %v795_v44 = vadd.f32 %v1350_v5, %v513_v42 }
 0x136   :  { %v435_v45 = vpop.f32.mrf.mxu0  ;;  %v515_v46 = vpop.f32.mrf.mxu1 }
 0x137   :  { %827 = vst [vmem:[#allocation3 + $0xc0] sm:$0xff] %v763_v43  ;;  %859 = vst [vmem:[#allocation3 + $0x1c0] sm:$0xff] %v795_v44  ;;  %v764_v47 = vadd.f32 %v1352_v6, %v435_v45  ;;  %v796_v48 = vadd.f32 %v1352_v6, %v515_v46 }
 0x138   :  { %v437_v49 = vpop.f32.mrf.mxu0  ;;  %v517_v50 = vpop.f32.mrf.mxu1 }
 0x139   :  { %828 = vst [vmem:[#allocation3 + $0xc8] sm:$0xff] %v764_v47  ;;  %860 = vst [vmem:[#allocation3 + $0x1c8] sm:$0xff] %v796_v48  ;;  %v765_v51 = vadd.f32 %v1350_v5, %v437_v49  ;;  %v797_v52 = vadd.f32 %v1350_v5, %v517_v50 }
 0x13a   :  { %v439_v53 = vpop.f32.mrf.mxu0  ;;  %v519_v54 = vpop.f32.mrf.mxu1 }
 0x13b   :  { %829 = vst [vmem:[#allocation3 + $0xd0] sm:$0xff] %v765_v51  ;;  %861 = vst [vmem:[#allocation3 + $0x1d0] sm:$0xff] %v797_v52  ;;  %v766_v55 = vadd.f32 %v1352_v6, %v439_v53  ;;  %v798_v56 = vadd.f32 %v1352_v6, %v519_v54 }
 0x13c   :  { %v443_v57 = vpop.f32.mrf.mxu0  ;;  %v523_v58 = vpop.f32.mrf.mxu1 }
 0x13d   :  { %830 = vst [vmem:[#allocation3 + $0xd8] sm:$0xff] %v766_v55  ;;  %862 = vst [vmem:[#allocation3 + $0x1d8] sm:$0xff] %v798_v56  ;;  %v767_v59 = vadd.f32 %v1350_v5, %v443_v57  ;;  %v799_v60 = vadd.f32 %v1350_v5, %v523_v58 }
 0x13e   :  { %v445_v61 = vpop.f32.mrf.mxu0  ;;  %v525_v62 = vpop.f32.mrf.mxu1 }
 0x13f   :  { %831 = vst [vmem:[#allocation3 + $0xe0] sm:$0xff] %v767_v59  ;;  %863 = vst [vmem:[#allocation3 + $0x1e0] sm:$0xff] %v799_v60  ;;  %v768_v63 = vadd.f32 %v1352_v6, %v445_v61  ;;  %v800_v0 = vadd.f32 %v1352_v6, %v525_v62 }
 0x140   :  { %v447_v1 = vpop.f32.mrf.mxu0  ;;  %v527_v2 = vpop.f32.mrf.mxu1 }
 0x141   :  { %832 = vst [vmem:[#allocation3 + $0xe8] sm:$0xff] %v768_v63  ;;  %864 = vst [vmem:[#allocation3 + $0x1e8] sm:$0xff] %v800_v0  ;;  %v769_v3 = vadd.f32 %v1350_v5, %v447_v1  ;;  %v801_v4 = vadd.f32 %v1350_v5, %v527_v2 }
 0x142   :  { %v449_v7 = vpop.f32.mrf.mxu0  ;;  %v529_v8 = vpop.f32.mrf.mxu1 }
 0x143   :  { %833 = vst [vmem:[#allocation3 + $0xf0] sm:$0xff] %v769_v3  ;;  %865 = vst [vmem:[#allocation3 + $0x1f0] sm:$0xff] %v801_v4  ;;  %v770_v9 = vadd.f32 %v1352_v6, %v449_v7  ;;  %v802_v10 = vadd.f32 %v1352_v6, %v529_v8 }
 0x145   :  { %834 = vst [vmem:[#allocation3 + $0xf8] sm:$0xff] %v770_v9  ;;  %866 = vst [vmem:[#allocation3 + $0x1f8] sm:$0xff] %v802_v10 }
 0x146   :  { %929 = shalt.err (!%p926_p4)
}
 0x147   :  { %s941_s23 = smov 256   ;;  %s942_s24 = smov 16  }
 0x148   :  { %878 = dma.vmem_to_hbm [thread:$0]  %s873_s2, 8192, %s1424_s3, [#allocation4], %s941_s23, %s941_s23, %s942_s24  }
 0x149   :  { %938 = dma.done.wait [#allocation4], 8192  }
 0x14a   :  { %939 = vsyncadd [#allocation4], 4294959104 }
 0x14b   :  { %882 = vsyncpa [#allocation4], 1 }

// kernel: causal_self_attention.4
= control target key start
LH: loop header
LB: loop body
LE: loop exit
PB: predicated region body
PF: predicated region fallthrough
CT: control target
= control target key end

     0   :  { %s5363_s0 = inlined_call_operand.vmem [shape: f32[2,128,768], index: 0, kind: input, shape index: {}, may-alias: {0,1,2}]   ;;  %s5364_s1 = inlined_call_operand.vmem [shape: f32[2,128,768], index: 1, kind: input, shape index: {}, may-alias: {0,1,2}]   ;;  %s5365_s2 = inlined_call_operand.vmem [shape: f32[2,128,768], index: 2, kind: input, shape index: {}, may-alias: {0,1,2}]   ;;  %s5366_s3 = inlined_call_operand.vmem [shape: f32[2,128,256], index: 3, kind: output, shape index: {}]  }
   0x1   :  { %5396 = sst [smem:[#allocation35_spill]] %s5366_s3 }
   0x2   :  { %s3704_s12 = smov 0   ;;  %s3706_s13 = smov 0  }
   0x3   :  { %s3708_s14 = smov 0   ;;  %s3710_s15 = smov 0  }
   0x4   :  { %s3712_s16 = smov 0   ;;  %s3714_s17 = smov 0  }
   0x5   :  { %s3716_s18 = smov 0   ;;  %s3718_s19 = smov 0  }
   0x6   :  { %s3720_s20 = smov 0   ;;  %s3722_s21 = smov 0  }
   0x7   :  { %s3724_s22 = smov 0  }
   0x8 LB: > { %s35_s24 = sadd.s32 1, %s3670_s20  ;;  %s39_s25 = sadd.s32 1, %s3674_s21  ;;  %s3678_s22 = sphi %s3724_s22, %s13_s22   ;;  %s3674_s21 = sphi %s3722_s21, %s5481_s21   ;;  %s3670_s20 = sphi %s3720_s20, %s5480_s20   ;;  %s3666_s19 = sphi %s3718_s19, %s5479_s19   ;;  %s3662_s18 = sphi %s3716_s18, %s5478_s18   ;;  %s3658_s17 = sphi %s3714_s17, %s5477_s17   ;;  %s3654_s16 = sphi %s3712_s16, %s5476_s16   ;;  %s3650_s15 = sphi %s3710_s15, %s5475_s15   ;;  %s3646_s14 = sphi %s3708_s14, %s5474_s14   ;;  %s3642_s13 = sphi %s3706_s13, %s5473_s13   ;;  %s3638_s12 = sphi %s3704_s12, %s5472_s12  }
   0x9   : > { %p37_p0 = scmp.ge.s32.totalorder %s35_s24, 2  ;;  %s50_s26 = sadd.s32 1, %s3658_s17 }
   0xa   : > { %p57_p1 = scmp.ne.s32.totalorder %s3658_s17, %s3654_s16  ;;  %p58_p2 = scmp.eq.s32.totalorder %s3678_s22, 0 }
   0xb   : > { %s5483_s24 = smov (%p37_p0, %s35_s24), 0  ;;  %s5485_s25 = smov (!%p37_p0, %s39_s25), %s3674_s21 }
   0xc   : > { %s46_s27 = ssub.s32 %s3670_s20, %s5483_s24  ;;  %p41_p3 = scmp.ge.s32.totalorder %s5485_s25, 2 }
   0xd   : > { %s73_s28 = sadd.s32 2, %s3670_s20  ;;  %p3777_p4 = por %p58_p2, %p57_p1 }
   0xe   : > { %s74_s30 = sadd.s32 2, %s5483_s24  ;;  %s5487_s25 = smov (%p41_p3, %s5485_s25), 0 }
   0xf   : > { %5398 = sst [smem:[#allocation9_spill]] %s5487_s25  ;;  %s78_s4 = ssub.s32 %s73_s28, %s74_s30 }
  0x10   : > { %s82_s5 = sadd.s32 1, %s3650_s15  ;;  %s43_s6 = ssub.s32 %s3674_s21, %s5487_s25 }
  0x11   : > { %p89_p5 = scmp.ne.s32.totalorder %s3650_s15, %s3646_s14  ;;  %s47_s7 = sor.u32 %s46_s27, %s43_s6 }
  0x12   : > { %s79_s8 = sor.u32 %s78_s4, %s43_s6  ;;  %p48_p6 = scmp.eq.s32.totalorder %s47_s7, 0 }
  0x13   : > { %p80_p7 = scmp.eq.s32.totalorder %s79_s8, 0  ;;  %p3791_p8 = por %p89_p5, %p58_p2 }
  0x14   : > { %s105_s10 = sadd.s32 4, %s3670_s20  ;;  %s106_s30 = sadd.s32 4, %s5483_s24 }
  0x15   : > { %s3797_s11 = scalar_select %p48_p6, %s3658_s17, %s50_s26  }
  0x16   : > { %s3800_s28 = scalar_select %p80_p7, %s3650_s15, %s82_s5  }
  0x17   : > { %s114_s23 = sadd.s32 1, %s3642_s13  ;;  %s110_s25 = ssub.s32 %s105_s10, %s106_s30 }
  0x18   : > { %p121_p9 = scmp.ne.s32.totalorder %s3642_s13, %s3638_s12  ;;  %s111_s27 = sor.u32 %s110_s25, %s43_s6 }
  0x19   : > { %s5400_s3 = sadd.s32 4294967295, %s3678_s22   ;;  %p112_p11 = scmp.eq.s32.totalorder %s111_s27, 0 }
  0x1a   : > { %p155_p10 = scmp.eq.s32.totalorder %s5400_s3, 3  ;;  %p3810_p12 = por %p121_p9, %p58_p2 }
  0x1b   : > { %s3822_s26 = scalar_select %p112_p11, %s3642_s13, %s114_s23  }
  0x1c   : > { %p3817_p13 = por %p155_p10, %p57_p1  ;;  %p3031_p0 = scmp.ge.s32.totalorder %s3678_s22, 4 }
  0x1e   : > { %177 = sbr.rel (%p3031_p0) target bundleno = 80 (0x50), region = 16 }
  0x23   : > { %180 = sbr.rel (!%p3777_p4) target bundleno = 50 (0x32), region = 20  ;;  %s182_s3 = sand.u32 (%p3777_p4), 1, %s3658_s17  }
  0x24   : > { %s3304_s25 = smul.u32 (%p3777_p4), 96, %s3674_s21  ;;  %s3032_s5 = sshll.u32 (%p3777_p4), %s182_s3, 7 }
  0x25   : > { %s184_s23 = scalar_lea.vmem (%p3777_p4), [#allocation5], %s3032_s5 }
  0x26   : > { %s189_s6 = sadd.s32 (%p3777_p4), %s3670_s20, %s3304_s25 }
  0x27   : > { %s3033_s8 = sshll.u32 (%p3777_p4), %s189_s6, 3 }
  0x28   : > { %s3833_s27 = scalar_lea.vmem %s5363_s0, %s3033_s8 }
  0x29   : > { %v250_v0 = vld [vmem:[%s3833_s27] sm:$0xff]  ;;  %v252_v1 = vld [vmem:[%s3833_s27 + $0x30] sm:$0xff] }
  0x2a   : > { %v254_v2 = vld [vmem:[%s3833_s27 + $0x60] sm:$0xff]  ;;  %251 = vst [vmem:[%s184_s23] sm:$0xff] %v250_v0  ;;  %253 = vst [vmem:[%s184_s23 + $0x8] sm:$0xff] %v252_v1  ;;  %v256_v3 = vld [vmem:[%s3833_s27 + $0x90] sm:$0xff] }
  0x2b   : > { %255 = vst [vmem:[%s184_s23 + $0x10] sm:$0xff] %v254_v2  ;;  %v258_v4 = vld [vmem:[%s3833_s27 + $0xc0] sm:$0xff]  ;;  %v260_v5 = vld [vmem:[%s3833_s27 + $0xf0] sm:$0xff]  ;;  %257 = vst [vmem:[%s184_s23 + $0x18] sm:$0xff] %v256_v3 }
  0x2c   : > { %259 = vst [vmem:[%s184_s23 + $0x20] sm:$0xff] %v258_v4  ;;  %261 = vst [vmem:[%s184_s23 + $0x28] sm:$0xff] %v260_v5  ;;  %v262_v6 = vld [vmem:[%s3833_s27 + $0x120] sm:$0xff]  ;;  %v264_v7 = vld [vmem:[%s3833_s27 + $0x150] sm:$0xff] }
  0x2d   : > { %v266_v8 = vld [vmem:[%s3833_s27 + $0x180] sm:$0xff]  ;;  %263 = vst [vmem:[%s184_s23 + $0x30] sm:$0xff] %v262_v6  ;;  %265 = vst [vmem:[%s184_s23 + $0x38] sm:$0xff] %v264_v7  ;;  %v268_v9 = vld [vmem:[%s3833_s27 + $0x1b0] sm:$0xff] }
  0x2e   : > { %267 = vst [vmem:[%s184_s23 + $0x40] sm:$0xff] %v266_v8  ;;  %v270_v10 = vld [vmem:[%s3833_s27 + $0x1e0] sm:$0xff]  ;;  %v272_v11 = vld [vmem:[%s3833_s27 + $0x210] sm:$0xff]  ;;  %269 = vst [vmem:[%s184_s23 + $0x48] sm:$0xff] %v268_v9 }
  0x2f   : > { %271 = vst [vmem:[%s184_s23 + $0x50] sm:$0xff] %v270_v10  ;;  %273 = vst [vmem:[%s184_s23 + $0x58] sm:$0xff] %v272_v11  ;;  %v274_v12 = vld [vmem:[%s3833_s27 + $0x240] sm:$0xff]  ;;  %v276_v13 = vld [vmem:[%s3833_s27 + $0x270] sm:$0xff] }
  0x30   : > { %v278_v14 = vld [vmem:[%s3833_s27 + $0x2a0] sm:$0xff]  ;;  %275 = vst [vmem:[%s184_s23 + $0x60] sm:$0xff] %v274_v12  ;;  %277 = vst [vmem:[%s184_s23 + $0x68] sm:$0xff] %v276_v13  ;;  %v280_v15 = vld [vmem:[%s3833_s27 + $0x2d0] sm:$0xff] }
  0x31   : > { %279 = vst [vmem:[%s184_s23 + $0x70] sm:$0xff] %v278_v14  ;;  %281 = vst [vmem:[%s184_s23 + $0x78] sm:$0xff] %v280_v15 }
  0x32 PF: > { %287 = sbr.rel (!%p3791_p8) target bundleno = 65 (0x41), region = 58  ;;  %s289_s29 = sand.u32 (%p3791_p8), 1, %s3650_s15  }
  0x33   : > { %s2924_s3 = smul.u32 (%p3791_p8), 96, %s3674_s21  ;;  %s3034_s25 = sshll.u32 (%p3791_p8), %s289_s29, 7 }
  0x34   : > { %s291_s9 = scalar_lea.vmem (%p3791_p8), [#allocation6], %s3034_s25 }
  0x35   : > { %s2925_s5 = sadd.s32 (%p3791_p8), %s3670_s20, %s2924_s3 }
  0x36   : > { %s3035_s6 = sshll.u32 (%p3791_p8), %s2925_s5, 3 }
  0x37   : > { %s3859_s30 = scalar_lea.vmem %s5364_s1, %s3035_s6 }
  0x38   : > { %v3036_v16 = vld [vmem:[%s3859_s30 + $0x10] sm:$0xff]  ;;  %v3037_v17 = vld [vmem:[%s3859_s30 + $0x40] sm:$0xff] }
  0x39   : > { %v3038_v18 = vld [vmem:[%s3859_s30 + $0x70] sm:$0xff]  ;;  %359 = vst [vmem:[%s291_s9] sm:$0xff] %v3036_v16  ;;  %361 = vst [vmem:[%s291_s9 + $0x8] sm:$0xff] %v3037_v17  ;;  %v3039_v19 = vld [vmem:[%s3859_s30 + $0xa0] sm:$0xff] }
  0x3a   : > { %363 = vst [vmem:[%s291_s9 + $0x10] sm:$0xff] %v3038_v18  ;;  %v3040_v20 = vld [vmem:[%s3859_s30 + $0xd0] sm:$0xff]  ;;  %v3041_v21 = vld [vmem:[%s3859_s30 + $0x100] sm:$0xff]  ;;  %365 = vst [vmem:[%s291_s9 + $0x18] sm:$0xff] %v3039_v19 }
  0x3b   : > { %367 = vst [vmem:[%s291_s9 + $0x20] sm:$0xff] %v3040_v20  ;;  %369 = vst [vmem:[%s291_s9 + $0x28] sm:$0xff] %v3041_v21  ;;  %v3042_v22 = vld [vmem:[%s3859_s30 + $0x130] sm:$0xff]  ;;  %v3043_v23 = vld [vmem:[%s3859_s30 + $0x160] sm:$0xff] }
  0x3c   : > { %v3044_v24 = vld [vmem:[%s3859_s30 + $0x190] sm:$0xff]  ;;  %371 = vst [vmem:[%s291_s9 + $0x30] sm:$0xff] %v3042_v22  ;;  %373 = vst [vmem:[%s291_s9 + $0x38] sm:$0xff] %v3043_v23  ;;  %v3045_v25 = vld [vmem:[%s3859_s30 + $0x1c0] sm:$0xff] }
  0x3d   : > { %375 = vst [vmem:[%s291_s9 + $0x40] sm:$0xff] %v3044_v24  ;;  %v3046_v26 = vld [vmem:[%s3859_s30 + $0x1f0] sm:$0xff]  ;;  %v3047_v27 = vld [vmem:[%s3859_s30 + $0x220] sm:$0xff]  ;;  %377 = vst [vmem:[%s291_s9 + $0x48] sm:$0xff] %v3045_v25 }
  0x3e   : > { %379 = vst [vmem:[%s291_s9 + $0x50] sm:$0xff] %v3046_v26  ;;  %381 = vst [vmem:[%s291_s9 + $0x58] sm:$0xff] %v3047_v27  ;;  %v3048_v28 = vld [vmem:[%s3859_s30 + $0x250] sm:$0xff]  ;;  %v3049_v29 = vld [vmem:[%s3859_s30 + $0x280] sm:$0xff] }
  0x3f   : > { %v3050_v30 = vld [vmem:[%s3859_s30 + $0x2b0] sm:$0xff]  ;;  %383 = vst [vmem:[%s291_s9 + $0x60] sm:$0xff] %v3048_v28  ;;  %385 = vst [vmem:[%s291_s9 + $0x68] sm:$0xff] %v3049_v29  ;;  %v3051_v31 = vld [vmem:[%s3859_s30 + $0x2e0] sm:$0xff] }
  0x40   : > { %387 = vst [vmem:[%s291_s9 + $0x70] sm:$0xff] %v3050_v30  ;;  %389 = vst [vmem:[%s291_s9 + $0x78] sm:$0xff] %v3051_v31 }
  0x41 PF: > { %395 = sbr.rel (!%p3810_p12) target bundleno = 80 (0x50), region = 96  ;;  %s397_s27 = sand.u32 (%p3810_p12), 1, %s3642_s13  }
  0x42   : > { %s2933_s23 = smul.u32 (%p3810_p12), 96, %s3674_s21  ;;  %s3052_s29 = sshll.u32 (%p3810_p12), %s397_s27, 7 }
  0x43   : > { %s399_s4 = scalar_lea.vmem (%p3810_p12), [#allocation7], %s3052_s29 }
  0x44   : > { %s2934_s3 = sadd.s32 (%p3810_p12), %s3670_s20, %s2933_s23 }
  0x45   : > { %s3053_s25 = sshll.u32 (%p3810_p12), %s2934_s3, 3 }
  0x46   : > { %s3885_s8 = scalar_lea.vmem %s5365_s2, %s3053_s25 }
  0x47   : > { %v3054_v32 = vld [vmem:[%s3885_s8 + $0x20] sm:$0xff]  ;;  %v3055_v33 = vld [vmem:[%s3885_s8 + $0x50] sm:$0xff] }
  0x48   : > { %v3056_v34 = vld [vmem:[%s3885_s8 + $0x80] sm:$0xff]  ;;  %467 = vst [vmem:[%s399_s4] sm:$0xff] %v3054_v32  ;;  %469 = vst [vmem:[%s399_s4 + $0x8] sm:$0xff] %v3055_v33  ;;  %v3057_v35 = vld [vmem:[%s3885_s8 + $0xb0] sm:$0xff] }
  0x49   : > { %471 = vst [vmem:[%s399_s4 + $0x10] sm:$0xff] %v3056_v34  ;;  %v3058_v36 = vld [vmem:[%s3885_s8 + $0xe0] sm:$0xff]  ;;  %v3059_v37 = vld [vmem:[%s3885_s8 + $0x110] sm:$0xff]  ;;  %473 = vst [vmem:[%s399_s4 + $0x18] sm:$0xff] %v3057_v35 }
  0x4a   : > { %475 = vst [vmem:[%s399_s4 + $0x20] sm:$0xff] %v3058_v36  ;;  %477 = vst [vmem:[%s399_s4 + $0x28] sm:$0xff] %v3059_v37  ;;  %v3060_v38 = vld [vmem:[%s3885_s8 + $0x140] sm:$0xff]  ;;  %v3061_v39 = vld [vmem:[%s3885_s8 + $0x170] sm:$0xff] }
  0x4b   : > { %v3062_v40 = vld [vmem:[%s3885_s8 + $0x1a0] sm:$0xff]  ;;  %479 = vst [vmem:[%s399_s4 + $0x30] sm:$0xff] %v3060_v38  ;;  %481 = vst [vmem:[%s399_s4 + $0x38] sm:$0xff] %v3061_v39  ;;  %v3063_v41 = vld [vmem:[%s3885_s8 + $0x1d0] sm:$0xff] }
  0x4c   : > { %483 = vst [vmem:[%s399_s4 + $0x40] sm:$0xff] %v3062_v40  ;;  %v3064_v42 = vld [vmem:[%s3885_s8 + $0x200] sm:$0xff]  ;;  %v3065_v43 = vld [vmem:[%s3885_s8 + $0x230] sm:$0xff]  ;;  %485 = vst [vmem:[%s399_s4 + $0x48] sm:$0xff] %v3063_v41 }
  0x4d   : > { %487 = vst [vmem:[%s399_s4 + $0x50] sm:$0xff] %v3064_v42  ;;  %489 = vst [vmem:[%s399_s4 + $0x58] sm:$0xff] %v3065_v43  ;;  %v3066_v44 = vld [vmem:[%s3885_s8 + $0x260] sm:$0xff]  ;;  %v3067_v45 = vld [vmem:[%s3885_s8 + $0x290] sm:$0xff] }
  0x4e   : > { %v3068_v46 = vld [vmem:[%s3885_s8 + $0x2c0] sm:$0xff]  ;;  %491 = vst [vmem:[%s399_s4 + $0x60] sm:$0xff] %v3066_v44  ;;  %493 = vst [vmem:[%s399_s4 + $0x68] sm:$0xff] %v3067_v45  ;;  %v3069_v47 = vld [vmem:[%s3885_s8 + $0x2f0] sm:$0xff] }
  0x4f   : > { %495 = vst [vmem:[%s399_s4 + $0x70] sm:$0xff] %v3068_v46  ;;  %497 = vst [vmem:[%s399_s4 + $0x78] sm:$0xff] %v3069_v47 }
  0x50 PF: > { %p3070_p1 = scmp.ge.s32.totalorder %s3678_s22, 1  ;;  %p502_p2 = scmp.lt.s32.totalorder %s3678_s22, 5 }
  0x52   : > { %p503_p3 = pnand %p3070_p1, %p502_p2 }
  0x54   : > { %506 = sbr.rel (%p503_p3) target bundleno = 1627 (0x65b), region = 134 }
  0x59   : > { %s516_s10 = sand.u32 1, %s3646_s14   ;;  %s509_s30 = sand.u32 1, %s3654_s16   ;;  %vm779_vm0 = vcmask 523264   ;;  %vm564_vm1 = vcmask 7168   ;;  %v3680_v40 = vmov -2.3819763e+38   ;;  %v701_v41 = vlaneseq }
  0x5a   : > { %s3072_s9 = sshll.u32 %s516_s10, 7  ;;  %s3907_s27 = sshll.u32 %s509_s30, 7  ;;  %567 = vst.msk [vmem:[#allocation2 + $0x10] sm:$0xff] %vm564_vm1, %v3680_v40  ;;  %565 = vst.msk [vmem:[#allocation2] sm:$0xff] %vm564_vm1, %v3680_v40 }
  0x5b   : > { %s3909_s23 = scalar_lea.vmem [#allocation6], %s3072_s9  ;;  %s3926_s14 = scalar_lea.vmem [#allocation5], %s3907_s27  ;;  %566 = vst.msk [vmem:[#allocation2 + $0x8] sm:$0xff] %vm564_vm1, %v3680_v40  ;;  %568 = vst.msk [vmem:[#allocation2 + $0x18] sm:$0xff] %vm564_vm1, %v3680_v40  ;;  %v4058_v42 = vshrl.u32 %v701_v41, 7  ;;  %v4063_v44 = vand.u32 127, %v701_v41 }
  0x5c   : > { %v682_v48 = vld [vmem:[%s3909_s23 + $0x70] sm:$0xff]  ;;  %v683_v49 = vld [vmem:[%s3909_s23 + $0x78] sm:$0xff]  ;;  %v680_v50 = vld [vmem:[%s3909_s23 + $0x60] sm:$0xff]  ;;  %569 = vst.msk [vmem:[#allocation2 + $0x20] sm:$0xff] %vm564_vm1, %v3680_v40  ;;  %s523_s16 = sand.u32 1, %s3638_s12   ;;  %s3683_s12 = smov 64  }
  0x5d   : > { %v3914_v51 = vpack.c.bf16 %v683_v49, %v682_v48  ;;  %v681_v52 = vld [vmem:[%s3909_s23 + $0x68] sm:$0xff]  ;;  %v652_v55 = vld [vmem:[%s3926_s14] sm:$0xff]  ;;  %v678_v57 = vld [vmem:[%s3909_s23 + $0x50] sm:$0xff]  ;;  %570 = vst.msk [vmem:[#allocation2 + $0x28] sm:$0xff] %vm564_vm1, %v3680_v40  ;;  %v4061_v43 = vadd.s32 16, %v4058_v42  ;;  %v4068_v46 = vadd.s32 24, %v4058_v42  ;;  %vm739_vm3 = vcmp.le.s32.totalorder %v4063_v44, %v4058_v42 }
  0x5e   : > { %v3917_v53 = vpack.c.bf16 %v681_v52, %v680_v50  ;;  %v653_v56 = vld [vmem:[%s3926_s14 + $0x8] sm:$0xff]  ;;  %v679_v58 = vld [vmem:[%s3909_s23 + $0x58] sm:$0xff]  ;;  %v676_v62 = vld [vmem:[%s3909_s23 + $0x40] sm:$0xff]  ;;  %571 = vst.msk [vmem:[#allocation2 + $0x30] sm:$0xff] %vm564_vm1, %v3680_v40  ;;  %v4073_v49 = vadd.s32 8, %v4058_v42  ;;  %s3073_s29 = sshll.u32 %s523_s16, 7 }
  0x5f   : > { %3288 = vmatprep.subr.msk.bf16.mxu0 %vm779_vm0, %v3914_v51  ;;  %v826_v54 = vsel %vm779_vm0, %v3914_v51, 0  ;;  %v3932_v59 = vpack.c.bf16 %v653_v56, %v652_v55  ;;  %v3938_v61 = vpack.c.bf16 %v679_v58, %v678_v57  ;;  %v677_v63 = vld [vmem:[%s3909_s23 + $0x48] sm:$0xff]  ;;  %v674_v2 = vld [vmem:[%s3909_s23 + $0x30] sm:$0xff]  ;;  %v675_v3 = vld [vmem:[%s3909_s23 + $0x38] sm:$0xff]  ;;  %572 = vst.msk [vmem:[#allocation2 + $0x38] sm:$0xff] %vm564_vm1, %v3680_v40  ;;  %vm741_vm2 = vcmp.le.s32.totalorder %v4063_v44, %v4061_v43  ;;  %s4268_s3 = scalar_lea.vmem [#allocation7], %s3073_s29 }
  0x60   : > { %3161 = vmatpush3.bf16.xpose.msra.mxu0 %v826_v54  ;;  %v823_v60 = vsel %vm779_vm0, %v3917_v53, 0  ;;  %v3946_v1 = vpack.c.bf16 %v677_v63, %v676_v62  ;;  %v3954_v5 = vpack.c.bf16 %v675_v3, %v674_v2  ;;  %v672_v6 = vld [vmem:[%s3909_s23 + $0x20] sm:$0xff]  ;;  %v673_v7 = vld [vmem:[%s3909_s23 + $0x28] sm:$0xff]  ;;  %v670_v10 = vld [vmem:[%s3909_s23 + $0x10] sm:$0xff]  ;;  %573 = vst.msk [vmem:[#allocation2 + $0x40] sm:$0xff] %vm564_vm1, %v3680_v40  ;;  %vm742_vm4 = vcmp.le.s32.totalorder %v4063_v44, %v4068_v46  ;;  %s5227_s25 = scalar_lea.vmem [#allocation8], %s3907_s27 }
  0x61   : > { %3289 = vmatprep.subr.msk.bf16.mxu0 %vm779_vm0, %v3917_v53  ;;  %3176 = vmatprep.mubr.msk.bf16.mxu0 %vm779_vm0, %v3932_v59  ;;  %v820_v0 = vsel %vm779_vm0, %v3938_v61, 0  ;;  %v3962_v9 = vpack.c.bf16 %v673_v7, %v672_v6  ;;  %v671_v11 = vld [vmem:[%s3909_s23 + $0x18] sm:$0xff]  ;;  %v668_v14 = vld [vmem:[%s3909_s23] sm:$0xff]  ;;  %v669_v15 = vld [vmem:[%s3909_s23 + $0x8] sm:$0xff]  ;;  %574 = vst.msk [vmem:[#allocation2 + $0x48] sm:$0xff] %vm564_vm1, %v3680_v40  ;;  %v4084_v55 = vadd.s32 48, %v4058_v42  ;;  %vm740_vm5 = vcmp.le.s32.totalorder %v4063_v44, %v4073_v49 }
  0x62   : > { %v817_v4 = vsel %vm779_vm0, %v3946_v1, 0  ;;  %v814_v8 = vsel %vm779_vm0, %v3954_v5, 0  ;;  %v3970_v13 = vpack.c.bf16 %v671_v11, %v670_v10  ;;  %v3978_v17 = vpack.c.bf16 %v669_v15, %v668_v14  ;;  %v654_v19 = vld [vmem:[%s3926_s14 + $0x10] sm:$0xff]  ;;  %v655_v20 = vld [vmem:[%s3926_s14 + $0x18] sm:$0xff]  ;;  %v656_v21 = vld [vmem:[%s3926_s14 + $0x20] sm:$0xff]  ;;  %575 = vst.msk [vmem:[#allocation2 + $0x50] sm:$0xff] %vm564_vm1, %v3680_v40 }
  0x63   : > { %v811_v12 = vsel %vm779_vm0, %v3962_v9, 0  ;;  %v657_v22 = vld [vmem:[%s3926_s14 + $0x28] sm:$0xff]  ;;  %v3988_v23 = vpack.c.bf16 %v655_v20, %v654_v19  ;;  %v658_v25 = vld [vmem:[%s3926_s14 + $0x30] sm:$0xff]  ;;  %v659_v26 = vld [vmem:[%s3926_s14 + $0x38] sm:$0xff]  ;;  %576 = vst.msk [vmem:[#allocation2 + $0x58] sm:$0xff] %vm564_vm1, %v3680_v40  ;;  %vm745_vm6 = vcmp.le.s32.totalorder %v4063_v44, %v4084_v55  ;;  %v4106_v2 = vadd.s32 32, %v4058_v42 }
  0x64   : > { %v808_v16 = vsel %vm779_vm0, %v3970_v13, 0  ;;  %v805_v18 = vsel %vm779_vm0, %v3978_v17, 0  ;;  %v3990_v24 = vpack.c.bf16 %v657_v22, %v656_v21  ;;  %v660_v27 = vld [vmem:[%s3926_s14 + $0x40] sm:$0xff]  ;;  %v661_v28 = vld [vmem:[%s3926_s14 + $0x48] sm:$0xff]  ;;  %v4000_v29 = vpack.c.bf16 %v659_v26, %v658_v25  ;;  %v662_v31 = vld [vmem:[%s3926_s14 + $0x50] sm:$0xff]  ;;  %577 = vst.msk [vmem:[#allocation2 + $0x60] sm:$0xff] %vm564_vm1, %v3680_v40 }
  0x65   : > { %v4002_v30 = vpack.c.bf16 %v661_v28, %v660_v27  ;;  %v663_v32 = vld [vmem:[%s3926_s14 + $0x58] sm:$0xff]  ;;  %v664_v33 = vld [vmem:[%s3926_s14 + $0x60] sm:$0xff]  ;;  %v665_v34 = vld [vmem:[%s3926_s14 + $0x68] sm:$0xff]  ;;  %578 = vst.msk [vmem:[#allocation2 + $0x68] sm:$0xff] %vm564_vm1, %v3680_v40  ;;  %v4115_v7 = vadd.s32 40, %v4058_v42  ;;  %vm743_vm8 = vcmp.le.s32.totalorder %v4063_v44, %v4106_v2  ;;  %v3681_v20 = vmov 0  }
  0x66   : > { %v4012_v35 = vpack.c.bf16 %v663_v32, %v662_v31  ;;  %v4014_v36 = vpack.c.bf16 %v665_v34, %v664_v33  ;;  %v666_v37 = vld [vmem:[%s3926_s14 + $0x70] sm:$0xff]  ;;  %v667_v38 = vld [vmem:[%s3926_s14 + $0x78] sm:$0xff]  ;;  %579 = vst.msk [vmem:[#allocation2 + $0x70] sm:$0xff] %vm564_vm1, %v3680_v40  ;;  %580 = vst.msk [vmem:[#allocation2 + $0x78] sm:$0xff] %vm564_vm1, %v3680_v40  ;;  %3398 = vset.pattern.permute.xlu1 %v3681_v20  ;;  %3397 = vset.pattern.permute.xlu0 %v3681_v20  ;;  %v4146_v22 = vadd.s32 88, %v4058_v42  ;;  %s3092_s5 = sshll.u32 (%p3817_p13), %s3666_s19, 5 }
  0x67   : > { %v4022_v39 = vpack.c.bf16 %v667_v38, %v666_v37  ;;  %581 = vst.msk [vmem:[#allocation2 + $0x80] sm:$0xff] %vm564_vm1, %v3680_v40  ;;  %582 = vst.msk [vmem:[#allocation2 + $0x88] sm:$0xff] %vm564_vm1, %v3680_v40  ;;  %vm744_vm9 = vcmp.le.s32.totalorder %v4063_v44, %v4115_v7  ;;  %v4149_v25 = vadd.s32 64, %v4058_v42  ;;  %v4158_v31 = vadd.s32 72, %v4058_v42  ;;  %s2804_s7 = sadd.s32 (%p3817_p13), %s3662_s18, %s3092_s5  ;;  %s5470_s10 = sld [smem:[#allocation35_spill]] (%p3817_p13) }
  0x68   : > { %3163 = vmatpush3.bf16.xpose.msra.mxu0 %v823_v60  ;;  %583 = vst.msk [vmem:[#allocation2 + $0x90] sm:$0xff] %vm564_vm1, %v3680_v40  ;;  %584 = vst.msk [vmem:[#allocation2 + $0x98] sm:$0xff] %vm564_vm1, %v3680_v40  ;;  %vm750_vm11 = vcmp.le.s32.totalorder %v4063_v44, %v4146_v22  ;;  %v4171_v37 = vadd.s32 112, %v4058_v42  ;;  %s3093_s6 = sshll.u32 (%p3817_p13), %s2804_s7, 3 }
  0x69   : > { %3290 = vmatprep.subr.msk.bf16.mxu0 %vm779_vm0, %v3938_v61  ;;  %585 = vst.msk [vmem:[#allocation2 + $0xa0] sm:$0xff] %vm564_vm1, %v3680_v40  ;;  %586 = vst.msk [vmem:[#allocation2 + $0xa8] sm:$0xff] %vm564_vm1, %v3680_v40  ;;  %vm747_vm12 = vcmp.le.s32.totalorder %v4063_v44, %v4149_v25  ;;  %vm5369_vm13 = vcmp.le.s32.totalorder %v4063_v44, %v4158_v31 }
  0x6a   : > { %587 = vst.msk [vmem:[#allocation2 + $0xb0] sm:$0xff] %vm564_vm1, %v3680_v40  ;;  %588 = vst.msk [vmem:[#allocation2 + $0xb8] sm:$0xff] %vm564_vm1, %v3680_v40  ;;  %vm5368_vm14 = vcmp.le.s32.totalorder %v4063_v44, %v4171_v37 }
  0x6b   : > { %589 = vst.msk [vmem:[#allocation2 + $0xc0] sm:$0xff] %vm564_vm1, %v3680_v40  ;;  %590 = vst.msk [vmem:[#allocation2 + $0xc8] sm:$0xff] %vm564_vm1, %v3680_v40 }
  0x6c   : > { %591 = vst.msk [vmem:[#allocation2 + $0xd0] sm:$0xff] %vm564_vm1, %v3680_v40  ;;  %592 = vst.msk [vmem:[#allocation2 + $0xd8] sm:$0xff] %vm564_vm1, %v3680_v40 }
  0x6d   : > { %593 = vst.msk [vmem:[#allocation2 + $0xe0] sm:$0xff] %vm564_vm1, %v3680_v40  ;;  %594 = vst.msk [vmem:[#allocation2 + $0xe8] sm:$0xff] %vm564_vm1, %v3680_v40  ;;  %s2806_s30 = scalar_lea.vmem (%p3817_p13), %s5470_s10, %s3093_s6 }
  0x6e   : > { %595 = vst.msk [vmem:[#allocation2 + $0xf0] sm:$0xff] %vm564_vm1, %v3680_v40  ;;  %596 = vst.msk [vmem:[#allocation2 + $0xf8] sm:$0xff] %vm564_vm1, %v3680_v40 }
  0x6f   : > { %5403 = vst [vmem:[#allocation10_spill] sm:$0xff] %v4058_v42  ;;  %5404 = vst [vmem:[#allocation11_spill] sm:$0xff] %v4061_v43 }
  0x70   : > { %3165 = vmatpush3.bf16.xpose.msra.mxu0 %v820_v0  ;;  %5405 = vst [vmem:[#allocation12_spill] sm:$0xff] %v4063_v44  ;;  %5406 = vst [vmem:[#allocation13_spill] sm:$0xff] %v4068_v46  ;;  %v4103_v0 = vadd.s32 56, %v4058_v42  ;;  %v4425_v46 = vld [vmem:[#allocation2 + $0x60] sm:$0xff] }
  0x71   : > { %3291 = vmatprep.subr.msk.bf16.mxu0 %vm779_vm0, %v3946_v1  ;;  %5407 = vst [vmem:[#allocation14_spill] sm:$0xff] %v4073_v49  ;;  %5408 = vst [vmem:[#allocation15_spill] sm:$0xff] %v4084_v55 }
  0x72   : > { %5409 = vst [vmem:[#allocation16_spill] sm:$0xff] %v4103_v0  ;;  %5410 = vst [vmem:[#allocation17_spill] sm:$0xff] %v4106_v2  ;;  %vm746_vm7 = vcmp.le.s32.totalorder %v4063_v44, %v4103_v0  ;;  %v4419_v2 = vld [vmem:[#allocation2 + $0x78] sm:$0xff] }
  0x73   : > { %5411 = vst [vmem:[#allocation18_spill] sm:$0xff] %v4115_v7  ;;  %5413 = vst [vmem:[#allocation20_spill] sm:$0xff] %v4146_v22 }
  0x74   : > { %5414 = vst [vmem:[#allocation21_spill] sm:$0xff] %v4149_v25  ;;  %5415 = vst [vmem:[#allocation22_spill] sm:$0xff] %v4158_v31  ;;  %v4383_v25 = vld [vmem:[#allocation2 + $0x58] sm:$0xff] }
  0x75   : > { %5416 = vst [vmem:[#allocation23_spill] sm:$0xff] %v4171_v37  ;;  %v4374_v37 = vld [vmem:[#allocation2 + $0x50] sm:$0xff] }
  0x78   : > { %3167 = vmatpush3.bf16.xpose.msra.mxu0 %v817_v4 }
  0x79   : > { %3292 = vmatprep.subr.msk.bf16.mxu0 %vm779_vm0, %v3954_v5 }
  0x80   : > { %3169 = vmatpush3.bf16.xpose.msra.mxu0 %v814_v8 }
  0x81   : > { %3293 = vmatprep.subr.msk.bf16.mxu0 %vm779_vm0, %v3962_v9 }
  0x88   : > { %3171 = vmatpush3.bf16.xpose.msra.mxu0 %v811_v12  ;;  %v4127_v12 = vadd.s32 80, %v4058_v42 }
  0x89   : > { %3294 = vmatprep.subr.msk.bf16.mxu0 %vm779_vm0, %v3970_v13 }
  0x8a   : > { %5412 = vst [vmem:[#allocation19_spill] sm:$0xff] %v4127_v12  ;;  %vm749_vm10 = vcmp.le.s32.totalorder %v4063_v44, %v4127_v12  ;;  %v4390_v12 = vld [vmem:[#allocation2 + $0x40] sm:$0xff] }
  0x90   : > { %3173 = vmatpush3.bf16.xpose.msra.mxu0 %v808_v16 }
  0x91   : > { %3295 = vmatprep.subr.msk.bf16.mxu0 %vm779_vm0, %v3978_v17 }
  0x98   : > { %3175 = vmatpush3.bf16.xpose.msra.mxu0 %v805_v18 }
  0x9f   : > { %3177 = vmatmul.mubr.msk.bf16.vlgmr.msra.gmra.mxu0 %vm779_vm0, %v3988_v23 }
  0xa0   : > { %3180 = vmatprep.mubr.msk.bf16.mxu0 %vm779_vm0, %v3990_v24 }
  0xa7   : > { %3181 = vmatmul.mubr.msk.bf16.gmra.mxu0 %vm779_vm0, %v4000_v29 }
  0xa8   : > { %3184 = vmatprep.mubr.msk.bf16.mxu0 %vm779_vm0, %v4002_v30 }
  0xaf   : > { %3185 = vmatmul.mubr.msk.bf16.gmra.mxu0 %vm779_vm0, %v4012_v35 }
  0xb0   : > { %3188 = vmatprep.mubr.msk.bf16.mxu0 %vm779_vm0, %v4014_v36 }
  0xb7   : > { %3189 = vmatmul.mubr.msk.bf16.gmra.mxu0 %vm779_vm0, %v4022_v39 }
 0x15f   : > { %v3178_v45 = vpop.f32.mrf.mxu0 }
 0x160   : > { %v927_v47 = vmul.f32 0.125, %v3178_v45 }
 0x161   : > { %v862_v48 = vpop.f32.mrf.mxu0 }
 0x162   : > { %v925_v50 = vmul.f32 0.125, %v862_v48  ;;  %v4078_v52 = vsel %vm741_vm2, %v927_v47, -2.3819763e+38 }
 0x163   : > { %977 = vmax.xlane.f32.xlu1 %v4078_v52  ;;  %v3179_v54 = vpop.f32.mrf.mxu0 }
 0x164   : > { %v928_v56 = vmul.f32 0.125, %v3179_v54  ;;  %v4089_v57 = vsel %vm739_vm3, %v925_v50, -2.3819763e+38  ;;  %v4188_v50 = vadd.s32 120, %v4058_v42  ;;  %v4193_v54 = vadd.s32 96, %v4058_v42 }
 0x165   : > { %973 = vmax.xlane.f32.xlu0 %v4089_v57  ;;  %v865_v58 = vpop.f32.mrf.mxu0 }
 0x166   : > { %v926_v60 = vmul.f32 0.125, %v865_v58  ;;  %v4097_v62 = vsel %vm742_vm4, %v928_v56, -2.3819763e+38  ;;  %5417 = vst [vmem:[#allocation24_spill] sm:$0xff] %v4188_v50  ;;  %5418 = vst [vmem:[#allocation25_spill] sm:$0xff] %v4193_v54  ;;  %vm754_vm15 = vcmp.le.s32.totalorder %v4063_v44, %v4188_v50 }
 0x167   : > { %979 = vmax.xlane.f32.xlu1 %v4097_v62  ;;  %v3182_v63 = vpop.f32.mrf.mxu0 }
 0x168   : > { %v931_v3 = vmul.f32 0.125, %v3182_v63  ;;  %v4111_v4 = vsel %vm740_vm5, %v926_v60, -2.3819763e+38  ;;  %v4202_v63 = vadd.s32 104, %v4058_v42 }
 0x169   : > { %975 = vmax.xlane.f32.xlu0 %v4111_v4  ;;  %v878_v6 = vpop.f32.mrf.mxu0 }
 0x16a   : > { %v929_v8 = vmul.f32 0.125, %v878_v6  ;;  %v4120_v10 = vsel %vm745_vm6, %v931_v3, -2.3819763e+38  ;;  %5419 = vst [vmem:[#allocation26_spill] sm:$0xff] %v4202_v63 }
 0x16b   : > { %v3183_v11 = vpop.f32.mrf.mxu0 }
 0x16c   : > { %v932_v14 = vmul.f32 0.125, %v3183_v11  ;;  %v4140_v19 = vsel %vm743_vm8, %v929_v8, -2.3819763e+38  ;;  %v3682_v8 = vmov 0.0  }
 0x16d   : > { %985 = vmax.xlane.f32.xlu0 %v4120_v10  ;;  %v881_v15 = vpop.f32.mrf.mxu0  ;;  %629 = vst [vmem:[#allocation4] sm:$0xff] %v3682_v8  ;;  %597 = vst.msk [vmem:[#allocation3] sm:$0xff] %vm564_vm1, %v3682_v8 }
 0x16e   : > { %v930_v16 = vmul.f32 0.125, %v881_v15  ;;  %v4135_v18 = vsel %vm746_vm7, %v932_v14, -2.3819763e+38  ;;  %598 = vst.msk [vmem:[#allocation3 + $0x8] sm:$0xff] %vm564_vm1, %v3682_v8  ;;  %599 = vst.msk [vmem:[#allocation3 + $0x10] sm:$0xff] %vm564_vm1, %v3682_v8 }
 0x16f   : > { %987 = vmax.xlane.f32.xlu1 %v4135_v18  ;;  %v3186_v21 = vpop.f32.mrf.mxu0  ;;  %600 = vst.msk [vmem:[#allocation3 + $0x18] sm:$0xff] %vm564_vm1, %v3682_v8  ;;  %601 = vst.msk [vmem:[#allocation3 + $0x20] sm:$0xff] %vm564_vm1, %v3682_v8 }
 0x170   : > { %v935_v26 = vmul.f32 0.125, %v3186_v21  ;;  %v4154_v27 = vsel %vm744_vm9, %v930_v16, -2.3819763e+38  ;;  %602 = vst.msk [vmem:[#allocation3 + $0x28] sm:$0xff] %vm564_vm1, %v3682_v8  ;;  %603 = vst.msk [vmem:[#allocation3 + $0x30] sm:$0xff] %vm564_vm1, %v3682_v8 }
 0x171   : > { %981 = vmax.xlane.f32.xlu0 %v4140_v19  ;;  %v894_v28 = vpop.f32.mrf.mxu0  ;;  %604 = vst.msk [vmem:[#allocation3 + $0x38] sm:$0xff] %vm564_vm1, %v3682_v8  ;;  %605 = vst.msk [vmem:[#allocation3 + $0x40] sm:$0xff] %vm564_vm1, %v3682_v8 }
 0x172   : > { %v933_v32 = vmul.f32 0.125, %v894_v28  ;;  %v4163_v33 = vsel %vm749_vm10, %v935_v26, -2.3819763e+38  ;;  %606 = vst.msk [vmem:[#allocation3 + $0x48] sm:$0xff] %vm564_vm1, %v3682_v8  ;;  %607 = vst.msk [vmem:[#allocation3 + $0x50] sm:$0xff] %vm564_vm1, %v3682_v8  ;;  %v698_v28 = vld [vmem:[%s4268_s3 + $0x70] sm:$0xff] }
 0x173   : > { %983 = vmax.xlane.f32.xlu1 %v4154_v27  ;;  %v3187_v34 = vpop.f32.mrf.mxu0  ;;  %608 = vst.msk [vmem:[#allocation3 + $0x58] sm:$0xff] %vm564_vm1, %v3682_v8  ;;  %609 = vst.msk [vmem:[#allocation3 + $0x60] sm:$0xff] %vm564_vm1, %v3682_v8 }
 0x174   : > { %v936_v38 = vmul.f32 0.125, %v3187_v34  ;;  %v4184_v47 = vsel %vm747_vm12, %v933_v32, -2.3819763e+38  ;;  %610 = vst.msk [vmem:[#allocation3 + $0x68] sm:$0xff] %vm564_vm1, %v3682_v8  ;;  %611 = vst.msk [vmem:[#allocation3 + $0x70] sm:$0xff] %vm564_vm1, %v3682_v8  ;;  %v699_v32 = vld [vmem:[%s4268_s3 + $0x78] sm:$0xff] }
 0x175   : > { %993 = vmax.xlane.f32.xlu0 %v4163_v33  ;;  %v897_v40 = vpop.f32.mrf.mxu0  ;;  %612 = vst.msk [vmem:[#allocation3 + $0x78] sm:$0xff] %vm564_vm1, %v3682_v8  ;;  %613 = vst.msk [vmem:[#allocation3 + $0x80] sm:$0xff] %vm564_vm1, %v3682_v8  ;;  %v696_v34 = vld [vmem:[%s4268_s3 + $0x60] sm:$0xff] }
 0x176   : > { %v934_v41 = vmul.f32 0.125, %v897_v40  ;;  %v4179_v45 = vsel %vm750_vm11, %v936_v38, -2.3819763e+38  ;;  %614 = vst.msk [vmem:[#allocation3 + $0x88] sm:$0xff] %vm564_vm1, %v3682_v8  ;;  %615 = vst.msk [vmem:[#allocation3 + $0x90] sm:$0xff] %vm564_vm1, %v3682_v8  ;;  %v4273_v38 = vpack.c.bf16 %v699_v32, %v698_v28  ;;  %v697_v40 = vld [vmem:[%s4268_s3 + $0x68] sm:$0xff] }
 0x177   : > { %995 = vmax.xlane.f32.xlu1 %v4179_v45  ;;  %v3190_v48 = vpop.f32.mrf.mxu0  ;;  %616 = vst.msk [vmem:[#allocation3 + $0x98] sm:$0xff] %vm564_vm1, %v3682_v8  ;;  %617 = vst.msk [vmem:[#allocation3 + $0xa0] sm:$0xff] %vm564_vm1, %v3682_v8  ;;  %v4298_v28 = vld [vmem:[#allocation2 + $0x10] sm:$0xff] }
 0x178   : > { %v939_v56 = vmul.f32 0.125, %v3190_v48  ;;  %v4198_v58 = vsel %vm5369_vm13, %v934_v41, -2.3819763e+38  ;;  %618 = vst.msk [vmem:[#allocation3 + $0xa8] sm:$0xff] %vm564_vm1, %v3682_v8  ;;  %619 = vst.msk [vmem:[#allocation3 + $0xb0] sm:$0xff] %vm564_vm1, %v3682_v8  ;;  %vm752_vm13 = vcmp.le.s32.totalorder %v4063_v44, %v4202_v63  ;;  %v4276_v41 = vpack.c.bf16 %v697_v40, %v696_v34  ;;  %v694_v48 = vld [vmem:[%s4268_s3 + $0x50] sm:$0xff]  ;;  %3192 = vmatprep.subr.bf16.mxu1 %v4273_v38 }
 0x179   : > { %989 = vmax.xlane.f32.xlu0 %v4184_v47  ;;  %v910_v60 = vpop.f32.mrf.mxu0  ;;  %620 = vst.msk [vmem:[#allocation3 + $0xb8] sm:$0xff] %vm564_vm1, %v3682_v8  ;;  %621 = vst.msk [vmem:[#allocation3 + $0xc0] sm:$0xff] %vm564_vm1, %v3682_v8  ;;  %3193 = vmatpush3.bf16.msra.mxu1 %v4273_v38  ;;  %v4301_v34 = vld [vmem:[#allocation2] sm:$0xff]  ;;  %v687_v63 = vld [vmem:[%s4268_s3 + $0x18] sm:$0xff] }
 0x17a   : > { %v937_v3 = vmul.f32 0.125, %v910_v60  ;;  %v4207_v6 = vsel %vm5368_vm14, %v939_v56, -2.3819763e+38  ;;  %622 = vst.msk [vmem:[#allocation3 + $0xc8] sm:$0xff] %vm564_vm1, %v3682_v8  ;;  %623 = vst.msk [vmem:[#allocation3 + $0xd0] sm:$0xff] %vm564_vm1, %v3682_v8  ;;  %vm751_vm14 = vcmp.le.s32.totalorder %v4063_v44, %v4193_v54  ;;  %v695_v56 = vld [vmem:[%s4268_s3 + $0x58] sm:$0xff]  ;;  %3194 = vmatprep.subr.bf16.mxu1 %v4276_v41 }
 0x17b   : > { %624 = vst.msk [vmem:[#allocation3 + $0xd8] sm:$0xff] %vm564_vm1, %v3682_v8  ;;  %625 = vst.msk [vmem:[#allocation3 + $0xe0] sm:$0xff] %vm564_vm1, %v3682_v8  ;;  %991 = vmax.xlane.f32.xlu1 %v4198_v58  ;;  %v3191_v11 = vpop.f32.mrf.mxu0  ;;  %v4283_v60 = vpack.c.bf16 %v695_v56, %v694_v48  ;;  %v688_v40 = vld [vmem:[%s4268_s3 + $0x20] sm:$0xff]  ;;  %v689_v48 = vld [vmem:[%s4268_s3 + $0x28] sm:$0xff] }
 0x17c   : > { %626 = vst.msk [vmem:[#allocation3 + $0xe8] sm:$0xff] %vm564_vm1, %v3682_v8  ;;  %627 = vst.msk [vmem:[#allocation3 + $0xf0] sm:$0xff] %vm564_vm1, %v3682_v8  ;;  %v940_v14 = vmul.f32 0.125, %v3191_v11  ;;  %v4257_v21 = vsel %vm751_vm14, %v937_v3, -2.3819763e+38  ;;  %v692_v3 = vld [vmem:[%s4268_s3 + $0x40] sm:$0xff] }
 0x17d   : > { %628 = vst.msk [vmem:[#allocation3 + $0xf8] sm:$0xff] %vm564_vm1, %v3682_v8  ;;  %630 = vst [vmem:[#allocation4 + $0x8] sm:$0xff] %v3682_v8  ;;  %v913_v15 = vpop.f32.mrf.mxu0  ;;  %1001 = vmax.xlane.f32.xlu0 %v4207_v6  ;;  %3195 = vmatpush3.bf16.msra.mxu1 %v4276_v41  ;;  %v4357_v54 = vld [vmem:[#allocation2 + $0x20] sm:$0xff] }
 0x17e   : > { %631 = vst [vmem:[#allocation4 + $0x10] sm:$0xff] %v3682_v8  ;;  %632 = vst [vmem:[#allocation4 + $0x18] sm:$0xff] %v3682_v8  ;;  %v4252_v16 = vsel %vm754_vm15, %v940_v14, -2.3819763e+38  ;;  %v938_v20 = vmul.f32 0.125, %v913_v15  ;;  %3196 = vmatprep.subr.bf16.mxu1 %v4283_v60  ;;  %v690_v14 = vld [vmem:[%s4268_s3 + $0x30] sm:$0xff] }
 0x17f   : > { %633 = vst [vmem:[#allocation4 + $0x20] sm:$0xff] %v3682_v8  ;;  %634 = vst [vmem:[#allocation4 + $0x28] sm:$0xff] %v3682_v8  ;;  %1003 = vmax.xlane.f32.xlu1 %v4252_v16  ;;  %v691_v15 = vld [vmem:[%s4268_s3 + $0x38] sm:$0xff] }
 0x180   : > { %635 = vst [vmem:[#allocation4 + $0x30] sm:$0xff] %v3682_v8  ;;  %636 = vst [vmem:[#allocation4 + $0x38] sm:$0xff] %v3682_v8  ;;  %v4263_v26 = vsel %vm752_vm13, %v938_v20, -2.3819763e+38  ;;  %v4296_v20 = vpack.c.bf16 %v691_v15, %v690_v14  ;;  %v4311_v14 = vld [vmem:[#allocation2 + $0x18] sm:$0xff] }
 0x181   : > { %637 = vst [vmem:[#allocation4 + $0x40] sm:$0xff] %v3682_v8  ;;  %638 = vst [vmem:[#allocation4 + $0x48] sm:$0xff] %v3682_v8  ;;  %997 = vmax.xlane.f32.xlu0 %v4257_v21  ;;  %3197 = vmatpush3.bf16.msra.mxu1 %v4283_v60 }
 0x182   : > { %639 = vst [vmem:[#allocation4 + $0x50] sm:$0xff] %v3682_v8  ;;  %640 = vst [vmem:[#allocation4 + $0x58] sm:$0xff] %v3682_v8 }
 0x183   : > { %641 = vst [vmem:[#allocation4 + $0x60] sm:$0xff] %v3682_v8  ;;  %642 = vst [vmem:[#allocation4 + $0x68] sm:$0xff] %v3682_v8  ;;  %999 = vmax.xlane.f32.xlu1 %v4263_v26 }
 0x184   : > { %643 = vst [vmem:[#allocation4 + $0x70] sm:$0xff] %v3682_v8  ;;  %644 = vst [vmem:[#allocation4 + $0x78] sm:$0xff] %v3682_v8  ;;  %v693_v8 = vld [vmem:[%s4268_s3 + $0x48] sm:$0xff] }
 0x185   : > { %5420 = vst [vmem:[#allocation27_spill] sm:$0xff] %v4273_v38  ;;  %5421 = vst [vmem:[#allocation28_spill] sm:$0xff] %v4276_v41  ;;  %v4289_v11 = vpack.c.bf16 %v693_v8, %v692_v3  ;;  %v4309_v3 = vpack.c.bf16 %v689_v48, %v688_v40  ;;  %v4322_v40 = vld [vmem:[#allocation2 + $0x8] sm:$0xff]  ;;  %v686_v48 = vld [vmem:[%s4268_s3 + $0x10] sm:$0xff] }
 0x186   : > { %5422 = vst [vmem:[#allocation29_spill] sm:$0xff] %v4283_v60  ;;  %5424 = vst [vmem:[#allocation31_spill] sm:$0xff] %v4296_v20  ;;  %v684_v60 = vld [vmem:[%s4268_s3] sm:$0xff]  ;;  %v4351_v41 = vld [vmem:[#allocation2 + $0x38] sm:$0xff] }
 0x187   : > { %5423 = vst [vmem:[#allocation30_spill] sm:$0xff] %v4289_v11  ;;  %3198 = vmatprep.subr.bf16.mxu1 %v4289_v11  ;;  %5425 = vst [vmem:[#allocation32_spill] sm:$0xff] %v4309_v3 }
 0x188   : > { %3199 = vmatpush3.bf16.msra.mxu1 %v4289_v11 }
 0x189   : > { %3200 = vmatprep.subr.bf16.mxu1 %v4296_v20 }
 0x18c   : > { %3201 = vmatpush3.bf16.msra.mxu1 %v4296_v20 }
 0x18d   : > { %3202 = vmatprep.subr.bf16.mxu1 %v4309_v3 }
 0x190   : > { %3203 = vmatpush3.bf16.msra.mxu1 %v4309_v3  ;;  %v4341_v3 = vld [vmem:[#allocation2 + $0x30] sm:$0xff] }
 0x1ec   : > { %v978_v32 = vpop.xlane.xlu1 %977 }
 0x1ed   : > { %v4307_v56 = vmax.f32 %v4298_v28, %v978_v32 }
 0x1ee   : > { %v974_v8 = vpop.xlane.xlu0 %973 }
 0x1ef   : > { %1545 = vst.msk [vmem:[#allocation2 + $0x10] sm:$0xff] %vm564_vm1, %v4307_v56  ;;  %v4318_v11 = vmax.f32 %v4301_v34, %v974_v8  ;;  %1081 = vperm.xlu1 %3398, %v4307_v56   ;;  %v4333_v8 = vpack.c.bf16 %v687_v63, %v686_v48 }
 0x1f0   : > { %v980_v32 = vpop.xlane.xlu1 %979 }
 0x1f1   : > { %1543 = vst.msk [vmem:[#allocation2] sm:$0xff] %vm564_vm1, %v4318_v11  ;;  %v4330_v15 = vmax.f32 %v4311_v14, %v980_v32  ;;  %1071 = vperm.xlu0 %3397, %v4318_v11   ;;  %5426 = vst [vmem:[#allocation33_spill] sm:$0xff] %v4333_v8  ;;  %3204 = vmatprep.subr.bf16.mxu1 %v4333_v8  ;;  %v685_v32 = vld [vmem:[%s4268_s3 + $0x8] sm:$0xff] }
 0x1f2   : > { %v976_v50 = vpop.xlane.xlu0 %975  ;;  %3205 = vmatpush3.bf16.msra.mxu1 %v4333_v8  ;;  %v4349_v63 = vpack.c.bf16 %v685_v32, %v684_v60  ;;  %v4366_v32 = vld [vmem:[#allocation2 + $0x28] sm:$0xff] }
 0x1f3   : > { %1546 = vst.msk [vmem:[#allocation2 + $0x18] sm:$0xff] %vm564_vm1, %v4330_v15  ;;  %v4338_v20 = vmax.f32 %v4322_v40, %v976_v50  ;;  %v1024_v43 = vsub.f32 %v4311_v14, %v4330_v15 }
 0x1f4   : > { %5427 = vst [vmem:[#allocation34_spill] sm:$0xff] %v4349_v63  ;;  %3206 = vmatprep.subr.bf16.mxu1 %v4349_v63 }
 0x1f5   : > { %1544 = vst.msk [vmem:[#allocation2 + $0x8] sm:$0xff] %vm564_vm1, %v4338_v20  ;;  %1076 = vperm.xlu1 %3398, %v4338_v20  }
 0x1f6   : > { %v986_v48 = vpop.xlane.xlu0 %985  ;;  %3207 = vmatpush3.bf16.msra.mxu1 %v4349_v63 }
 0x1f7   : > { %v4354_v50 = vmax.f32 %v4341_v3, %v986_v48 }
 0x1f8   : > { %v988_v38 = vpop.xlane.xlu1 %987 }
 0x1f9   : > { %1549 = vst.msk [vmem:[#allocation2 + $0x30] sm:$0xff] %vm564_vm1, %v4354_v50  ;;  %v4363_v8 = vmax.f32 %v4351_v41, %v988_v38  ;;  %1086 = vperm.xlu1 %3398, %v4330_v15  }
 0x1fa   : > { %v982_v60 = vpop.xlane.xlu0 %981 }
 0x1fb   : > { %1550 = vst.msk [vmem:[#allocation2 + $0x38] sm:$0xff] %vm564_vm1, %v4363_v8  ;;  %v4371_v48 = vmax.f32 %v4357_v54, %v982_v60  ;;  %1106 = vperm.xlu0 %3397, %v4363_v8  }
 0x1fc   : > { %v984_v63 = vpop.xlane.xlu1 %983 }
 0x1fd   : > { %1547 = vst.msk [vmem:[#allocation2 + $0x20] sm:$0xff] %vm564_vm1, %v4371_v48  ;;  %v4379_v38 = vmax.f32 %v4366_v32, %v984_v63  ;;  %1605 = vrot.lane.b32.xlu1 %v3914_v51, %s3683_s12  ;;  %v1025_v14 = vsub.f32 %v4357_v54, %v4371_v48 }
 0x1fe   : > { %v994_v31 = vpop.xlane.xlu0 %993 }
 0x1ff   : > { %1548 = vst.msk [vmem:[#allocation2 + $0x28] sm:$0xff] %vm564_vm1, %v4379_v38  ;;  %v4388_v60 = vmax.f32 %v4374_v37, %v994_v31  ;;  %v4402_v31 = vld [vmem:[#allocation2 + $0x48] sm:$0xff] }
 0x200   : > { %v996_v22 = vpop.xlane.xlu1 %995 }
 0x201   : > { %1553 = vst.msk [vmem:[#allocation2 + $0x50] sm:$0xff] %vm564_vm1, %v4388_v60  ;;  %v4397_v51 = vmax.f32 %v4383_v25, %v996_v22  ;;  %1121 = vperm.xlu0 %3397, %v4388_v60   ;;  %1603 = vrot.lane.b32.xlu1 %v3917_v53, %s3683_s12  ;;  %v4411_v22 = vld [vmem:[#allocation2 + $0x70] sm:$0xff] }
 0x202   : > { %v990_v7 = vpop.xlane.xlu0 %989 }
 0x203   : > { %1554 = vst.msk [vmem:[#allocation2 + $0x58] sm:$0xff] %vm564_vm1, %v4397_v51  ;;  %v4409_v63 = vmax.f32 %v4390_v12, %v990_v7 }
 0x204   : > { %v992_v0 = vpop.xlane.xlu1 %991 }
 0x205   : > { %1551 = vst.msk [vmem:[#allocation2 + $0x40] sm:$0xff] %vm564_vm1, %v4409_v63  ;;  %v1014_v53 = vmax.f32 %v4402_v31, %v992_v0  ;;  %1111 = vperm.xlu0 %3397, %v4409_v63   ;;  %1601 = vrot.lane.b32.xlu1 %v3938_v61, %s3683_s12  ;;  %v4437_v0 = vld [vmem:[#allocation2 + $0x68] sm:$0xff]  ;;  %v1043_v61 = vmul.f32 1.442695, %v1024_v43 }
 0x206   : > { %v1002_v55 = vpop.xlane.xlu0 %1001 }
 0x207   : > { %1552 = vst.msk [vmem:[#allocation2 + $0x48] sm:$0xff] %vm564_vm1, %v1014_v53  ;;  %v4423_v7 = vmax.f32 %v4411_v22, %v1002_v55 }
 0x208   : > { %v1004_v49 = vpop.xlane.xlu1 %1003 }
 0x209   : > { %v4428_v42 = vmax.f32 %v4419_v2, %v1004_v49  ;;  %1101 = vperm.xlu1 %3398, %v4354_v50   ;;  %1599 = vrot.lane.b32.xlu0 %v3946_v1, %s3683_s12  ;;  %1557 = vst.msk [vmem:[#allocation2 + $0x70] sm:$0xff] %vm564_vm1, %v4423_v7 }
 0x20a   : > { %v998_v55 = vpop.xlane.xlu0 %997 }
 0x20b   : > { %1558 = vst.msk [vmem:[#allocation2 + $0x78] sm:$0xff] %vm564_vm1, %v4428_v42  ;;  %v4444_v49 = vmax.f32 %v4425_v46, %v998_v55 }
 0x20c   : > { %v1000_v44 = vpop.xlane.xlu1 %999 }
 0x20d   : > { %v4447_v1 = vmax.f32 %v4437_v0, %v1000_v44  ;;  %1091 = vperm.xlu1 %3398, %v4371_v48   ;;  %1555 = vst.msk [vmem:[#allocation2 + $0x60] sm:$0xff] %vm564_vm1, %v4444_v49  ;;  %v1021_v44 = vsub.f32 %v4301_v34, %v4318_v11  ;;  %v1026_v11 = vsub.f32 %v4366_v32, %v4379_v38 }
 0x20f   : > { %1556 = vst.msk [vmem:[#allocation2 + $0x68] sm:$0xff] %vm564_vm1, %v4447_v1  ;;  %1136 = vperm.xlu0 %3397, %v4447_v1   ;;  %v1037_v55 = vmul.f32 1.442695, %v1021_v44  ;;  %v1047_v43 = vmul.f32 1.442695, %v1026_v11 }
 0x211   : > { %1096 = vperm.xlu1 %3398, %v4379_v38   ;;  %3399 = vpow2.f32 %v1037_v55 }
 0x212   : > { %3401 = vpow2.f32 %v1043_v61 }
 0x213   : > { %1146 = vperm.xlu0 %3397, %v4428_v42  }
 0x215   : > { %1126 = vperm.xlu1 %3398, %v4397_v51  }
 0x217   : > { %1595 = vrot.lane.b32.xlu0 %v3962_v9, %s3683_s12  ;;  %v1028_v9 = vsub.f32 %v4351_v41, %v4363_v8  ;;  %v1030_v41 = vsub.f32 %v4402_v31, %v1014_v53 }
 0x219   : > { %1116 = vperm.xlu1 %3398, %v1014_v53   ;;  %v1055_v34 = vmul.f32 1.442695, %v1030_v41 }
 0x21b   : > { %1591 = vrot.lane.b32.xlu0 %v3978_v17, %s3683_s12  ;;  %v1051_v17 = vmul.f32 1.442695, %v1028_v9 }
 0x21d   : > { %1141 = vperm.xlu1 %3398, %v4423_v7   ;;  %3403 = vpow2.f32 %v1051_v17 }
 0x21e   : > { %3405 = vpow2.f32 %v1047_v43 }
 0x21f   : > { %1569 = vrot.lane.b32.xlu0 %v3988_v23, %s3683_s12  ;;  %v1022_v23 = vsub.f32 %v4322_v40, %v4338_v20 }
 0x221   : > { %1131 = vperm.xlu1 %3398, %v4444_v49  }
 0x223   : > { %1573 = vrot.lane.b32.xlu0 %v4000_v29, %s3683_s12  ;;  %v1039_v29 = vmul.f32 1.442695, %v1022_v23 }
 0x225   : > { %1597 = vrot.lane.b32.xlu1 %v3954_v5, %s3683_s12  ;;  %v4493_v5 = vpop.eup %3399  ;;  %3407 = vpow2.f32 %v1039_v29 }
 0x226   : > { %3409 = vpow2.f32 %v1055_v34 }
 0x227   : > { %1577 = vrot.lane.b32.xlu0 %v4012_v35, %s3683_s12  ;;  %v5428_v35 = vsub.f32 %v4298_v28, %v4307_v56  ;;  %v1029_v56 = vsub.f32 %v4390_v12, %v4409_v63 }
 0x229   : > { %1593 = vrot.lane.b32.xlu1 %v3970_v13, %s3683_s12  ;;  %v1041_v20 = vmul.f32 1.442695, %v5428_v35  ;;  %v4503_v13 = vpop.eup %3401 }
 0x22a   : > { %v4510_v28 = vpop.eup %3403 }
 0x22b   : > { %1581 = vrot.lane.b32.xlu0 %v4022_v39, %s3683_s12  ;;  %3411 = vpow2.f32 %v1041_v20  ;;  %v1045_v39 = vmul.f32 1.442695, %v1025_v14 }
 0x22d   : > { %1567 = vrot.lane.b32.xlu1 %v3932_v59, %s3683_s12  ;;  %v1027_v59 = vsub.f32 %v4341_v3, %v4354_v50  ;;  %3413 = vpow2.f32 %v1045_v39  ;;  %v1053_v3 = vmul.f32 1.442695, %v1029_v56 }
 0x22f   : > { %1417 = vperm.xlu0 %3397, %v4493_v5   ;;  %v1049_v54 = vmul.f32 1.442695, %v1027_v59 }
 0x231   : > { %1571 = vrot.lane.b32.xlu1 %v3990_v24, %s3683_s12  ;;  %v4517_v24 = vpop.eup %3405  ;;  %3415 = vpow2.f32 %v1049_v54 }
 0x232   : > { %v4520_v15 = vpop.eup %3407  ;;  %3417 = vpow2.f32 %v1053_v3 }
 0x233   : > { %1432 = vperm.xlu0 %3397, %v4503_v13  }
 0x235   : > { %1575 = vrot.lane.b32.xlu1 %v4002_v30, %s3683_s12  ;;  %v4523_v30 = vpop.eup %3409 }
 0x237   : > { %1452 = vperm.xlu0 %3397, %v4510_v28  }
 0x238   : > { %v4526_v12 = vpop.eup %3411 }
 0x239   : > { %1579 = vrot.lane.b32.xlu1 %v4014_v36, %s3683_s12 }
 0x23a   : > { %v4529_v36 = vpop.eup %3413 }
 0x23b   : > { %1442 = vperm.xlu0 %3397, %v4517_v24  }
 0x23d   : > { %1422 = vperm.xlu1 %3398, %v4520_v15  }
 0x23e   : > { %v4532_v40 = vpop.eup %3415 }
 0x23f   : > { %1462 = vperm.xlu0 %3397, %v4523_v30   ;;  %v4535_v8 = vpop.eup %3417 }
 0x241   : > { %1427 = vperm.xlu1 %3398, %v4526_v12  }
 0x245   : > { %1437 = vperm.xlu1 %3398, %v4529_v36  }
 0x249   : > { %1447 = vperm.xlu1 %3398, %v4532_v40  }
 0x24d   : > { %1457 = vperm.xlu1 %3398, %v4535_v8  }
 0x26a   : > { %v1082_v50 = vpop.permute.xlu1 %1081 }
 0x26b   : > { %v1151_v32 = vsub.f32 %v4078_v52, %v1082_v50 }
 0x26c   : > { %v1072_v48 = vpop.permute.xlu0 %1071 }
 0x26d   : > { %v1169_v38 = vmul.f32 1.442695, %v1151_v32  ;;  %v1149_v63 = vsub.f32 %v4089_v57, %v1072_v48 }
 0x26f   : > { %3419 = vpow2.f32 %v1169_v38  ;;  %v1165_v31 = vmul.f32 1.442695, %v1149_v63 }
 0x270   : > { %v1077_v53 = vpop.permute.xlu1 %1076 }
 0x271   : > { %3421 = vpow2.f32 %v1165_v31  ;;  %v1150_v61 = vsub.f32 %v4111_v4, %v1077_v53 }
 0x273   : > { %v1167_v44 = vmul.f32 1.442695, %v1150_v61 }
 0x274   : > { %v1087_v55 = vpop.permute.xlu1 %1086 }
 0x275   : > { %3423 = vpow2.f32 %v1167_v44  ;;  %v1152_v9 = vsub.f32 %v4097_v62, %v1087_v55 }
 0x276   : > { %v1107_v17 = vpop.permute.xlu0 %1106 }
 0x277   : > { %v1171_v11 = vmul.f32 1.442695, %v1152_v9  ;;  %v1156_v23 = vsub.f32 %v4135_v18, %v1107_v17 }
 0x278   : > { %v1606_v52 = vpop.permute.xlu1 %1605 }
 0x279   : > { %3425 = vpow2.f32 %v1171_v11  ;;  %v1179_v43 = vmul.f32 1.442695, %v1156_v23  ;;  %3296 = vmatprep.subr.msk.bf16.mxu1 %vm779_vm0, %v1606_v52  ;;  %v1653_v48 = vsel %vm779_vm0, %v1606_v52, 0 }
 0x27b   : > { %3427 = vpow2.f32 %v1179_v43 }
 0x27c   : > { %v3420_v57 = vpop.eup %3419  ;;  %v1604_v41 = vpop.permute.xlu1 %1603 }
 0x27d   : > { %v1122_v29 = vpop.permute.xlu0 %1121  ;;  %1233 = vadd.xlane.f32.xlu0 %v3420_v57  ;;  %v1650_v17 = vsel %vm779_vm0, %v1604_v41, 0 }
 0x27e   : > { %v3422_v4 = vpop.eup %3421  ;;  %v1159_v3 = vsub.f32 %v4163_v33, %v1122_v29 }
 0x27f   : > { %1229 = vadd.xlane.f32.xlu1 %v3422_v4 }
 0x280   : > { %v1602_v34 = vpop.permute.xlu1 %1601 }
 0x281   : > { %v1112_v20 = vpop.permute.xlu0 %1111 }
 0x282   : > { %v3424_v35 = vpop.eup %3423  ;;  %v1157_v31 = vsub.f32 %v4184_v47, %v1112_v20 }
 0x283   : > { %1231 = vadd.xlane.f32.xlu0 %v3424_v35  ;;  %v1294_v62 = vpack.c.bf16 %v3424_v35, %v3422_v4  ;;  %v1647_v4 = vsel %vm779_vm0, %v1602_v34, 0 }
 0x284   : > { %v1102_v14 = vpop.permute.xlu1 %1101 }
 0x285   : > { %v1155_v18 = vsub.f32 %v4120_v10, %v1102_v14  ;;  %3208 = vmatprep.mubr.bf16.mxu1 %v1294_v62  ;;  %v4545_v54 = vpop.permute.xlu0 %1599  ;;  %v1185_v10 = vmul.f32 1.442695, %v1159_v3 }
 0x286   : > { %v3426_v59 = vpop.eup %3425 }
 0x287   : > { %v1177_v39 = vmul.f32 1.442695, %v1155_v18  ;;  %1235 = vadd.xlane.f32.xlu1 %v3426_v59  ;;  %v1295_v56 = vpack.c.bf16 %v3426_v59, %v3420_v57 }
 0x288   : > { %v1092_v50 = vpop.permute.xlu1 %1091  ;;  %v3428_v38 = vpop.eup %3427 }
 0x289   : > { %3429 = vpow2.f32 %v1177_v39  ;;  %v1153_v32 = vsub.f32 %v4140_v19, %v1092_v50  ;;  %3209 = vmatmul.mubr.bf16.vlgmr.msra.gmra.mxu1 %v1295_v56  ;;  %v1181_v19 = vmul.f32 1.442695, %v1157_v31  ;;  %v1644_v39 = vsel %vm779_vm0, %v4545_v54, 0 }
 0x28a   : > { %3225 = vmatpush3.bf16.xpose.msra.mxu1 %v1653_v48  ;;  %v1137_v61 = vpop.permute.xlu0 %1136 }
 0x28b   : > { %v1173_v63 = vmul.f32 1.442695, %v1153_v32  ;;  %3297 = vmatprep.subr.msk.bf16.mxu1 %vm779_vm0, %v1604_v41  ;;  %1243 = vadd.xlane.f32.xlu1 %v3428_v38  ;;  %v1162_v29 = vsub.f32 %v4263_v26, %v1137_v61 }
 0x28c   : > { %v1097_v53 = vpop.permute.xlu1 %1096 }
 0x28d   : > { %3431 = vpow2.f32 %v1173_v63  ;;  %v1154_v33 = vsub.f32 %v4154_v27, %v1097_v53 }
 0x28e   : > { %3433 = vpow2.f32 %v1185_v10  ;;  %v1147_v11 = vpop.permute.xlu0 %1146 }
 0x28f   : > { %v1175_v44 = vmul.f32 1.442695, %v1154_v33  ;;  %v1164_v43 = vsub.f32 %v4252_v16, %v1147_v11 }
 0x290   : > { %v1127_v55 = vpop.permute.xlu1 %1126 }
 0x291   : > { %3435 = vpow2.f32 %v1175_v44  ;;  %v1160_v9 = vsub.f32 %v4179_v45, %v1127_v55  ;;  %v1195_v20 = vmul.f32 1.442695, %v1164_v43 }
 0x292   : > { %3227 = vmatpush3.bf16.xpose.msra.mxu1 %v1650_v17  ;;  %3437 = vpow2.f32 %v1181_v19 }
 0x293   : > { %v1187_v23 = vmul.f32 1.442695, %v1160_v9  ;;  %3298 = vmatprep.subr.msk.bf16.mxu1 %vm779_vm0, %v1602_v34 }
 0x294   : > { %v1117_v47 = vpop.permute.xlu1 %1116 }
 0x295   : > { %3439 = vpow2.f32 %v1187_v23  ;;  %v1158_v52 = vsub.f32 %v4198_v58, %v1117_v47  ;;  %v1191_v58 = vmul.f32 1.442695, %v1162_v29 }
 0x296   : > { %v3430_v27 = vpop.eup %3429 }
 0x297   : > { %v1183_v57 = vmul.f32 1.442695, %v1158_v52  ;;  %1241 = vadd.xlane.f32.xlu0 %v3430_v27  ;;  %v1297_v56 = vpack.c.bf16 %v3428_v38, %v3430_v27 }
 0x298   : > { %v1142_v45 = vpop.permute.xlu1 %1141 }
 0x299   : > { %3441 = vpow2.f32 %v1183_v57  ;;  %v1163_v41 = vsub.f32 %v4207_v6, %v1142_v45 }
 0x29a   : > { %v3432_v35 = vpop.eup %3431  ;;  %3229 = vmatpush3.bf16.xpose.msra.mxu1 %v1647_v4 }
 0x29b   : > { %v1193_v62 = vmul.f32 1.442695, %v1163_v41  ;;  %3299 = vmatprep.subr.msk.bf16.mxu1 %vm779_vm0, %v4545_v54  ;;  %1237 = vadd.xlane.f32.xlu0 %v3432_v35  ;;  %v3434_v14 = vpop.eup %3433  ;;  %v1596_v54 = vpop.permute.xlu0 %1595 }
 0x29c   : > { %v1132_v16 = vpop.permute.xlu1 %1131  ;;  %v1638_v44 = vsel %vm779_vm0, %v1596_v54, 0 }
 0x29d   : > { %3443 = vpow2.f32 %v1193_v62  ;;  %v1161_v26 = vsub.f32 %v4257_v21, %v1132_v16 }
 0x29e   : > { %v3436_v18 = vpop.eup %3435  ;;  %3445 = vpow2.f32 %v1195_v20 }
 0x29f   : > { %v1189_v59 = vmul.f32 1.442695, %v1161_v26  ;;  %1249 = vadd.xlane.f32.xlu0 %v3434_v14  ;;  %1239 = vadd.xlane.f32.xlu1 %v3436_v18  ;;  %v1296_v6 = vpack.c.bf16 %v3436_v18, %v3432_v35  ;;  %3447 = vpow2.f32 %v1191_v58  ;;  %v3438_v34 = vpop.eup %3437  ;;  %v1592_v17 = vpop.permute.xlu0 %1591  ;;  %v1199_v26 = vld [vmem:[#allocation3 + $0x10] sm:$0xff] }
 0x2a0   : > { %v1598_v50 = vpop.permute.xlu1 %1597  ;;  %v1632_v11 = vsel %vm779_vm0, %v1592_v17, 0 }
 0x2a1   : > { %3449 = vpow2.f32 %v1189_v59  ;;  %3212 = vmatprep.mubr.bf16.mxu1 %v1296_v6  ;;  %v1641_v48 = vsel %vm779_vm0, %v1598_v50, 0  ;;  %v1197_v59 = vld [vmem:[#allocation3] sm:$0xff]  ;;  %v1215_v6 = vmul.f32 %v4526_v12, %v1199_v26 }
 0x2a2   : > { %v3440_v3 = vpop.eup %3439  ;;  %3231 = vmatpush3.bf16.xpose.msra.mxu1 %v1644_v39 }
 0x2a3   : > { %3213 = vmatmul.mubr.bf16.gmra.mxu1 %v1297_v56  ;;  %1245 = vadd.xlane.f32.xlu0 %v3438_v34  ;;  %v1299_v63 = vpack.c.bf16 %v3440_v3, %v3434_v14  ;;  %v1570_v23 = vpop.permute.xlu0 %1569  ;;  %v1213_v56 = vmul.f32 %v4493_v5, %v1197_v59  ;;  %v5429_v5 = vsub.f32 %v4374_v37, %v4388_v60 }
 0x2a4   : > { %1251 = vadd.xlane.f32.xlu1 %v3440_v3  ;;  %3300 = vmatprep.subr.msk.bf16.mxu1 %vm779_vm0, %v1598_v50  ;;  %v1594_v53 = vpop.permute.xlu1 %1593  ;;  %v1198_v50 = vld [vmem:[#allocation3 + $0x8] sm:$0xff] }
 0x2a5   : > { %v1635_v9 = vsel %vm779_vm0, %v1594_v53, 0 }
 0x2a6   : > { %v3442_v21 = vpop.eup %3441 }
 0x2a7   : > { %v1298_v32 = vpack.c.bf16 %v3442_v21, %v3438_v34  ;;  %v1574_v52 = vpop.permute.xlu0 %1573 }
 0x2a8   : > { %1247 = vadd.xlane.f32.xlu1 %v3442_v21  ;;  %v1568_v55 = vpop.permute.xlu1 %1567 }
 0x2a9   : > { %3216 = vmatprep.mubr.bf16.mxu1 %v1298_v32  ;;  %v1214_v32 = vmul.f32 %v4520_v15, %v1198_v50 }
 0x2aa   : > { %v3444_v10 = vpop.eup %3443  ;;  %3233 = vmatpush3.bf16.xpose.msra.mxu1 %v1641_v48 }
 0x2ab   : > { %v3446_v31 = vpop.eup %3445  ;;  %3217 = vmatmul.mubr.bf16.gmra.mxu1 %v1299_v63  ;;  %1257 = vadd.xlane.f32.xlu0 %v3444_v10  ;;  %v1578_v43 = vpop.permute.xlu0 %1577  ;;  %v1200_v63 = vld [vmem:[#allocation3 + $0x18] sm:$0xff] }
 0x2ac   : > { %1259 = vadd.xlane.f32.xlu1 %v3446_v31  ;;  %3301 = vmatprep.subr.msk.bf16.mxu1 %vm779_vm0, %v1596_v54  ;;  %v3448_v38 = vpop.eup %3447  ;;  %v1301_v19 = vpack.c.bf16 %v3446_v31, %v3444_v10  ;;  %v1572_v47 = vpop.permute.xlu1 %1571  ;;  %v1216_v12 = vmul.f32 %v4503_v13, %v1200_v63  ;;  %v1204_v54 = vld [vmem:[#allocation3 + $0x38] sm:$0xff] }
 0x2ae   : > { %v3450_v61 = vpop.eup %3449 }
 0x2af   : > { %1253 = vadd.xlane.f32.xlu0 %v3450_v61  ;;  %v1300_v33 = vpack.c.bf16 %v3448_v38, %v3450_v61  ;;  %v1582_v29 = vpop.permute.xlu0 %1581  ;;  %v1220_v61 = vmul.f32 %v4510_v28, %v1204_v54  ;;  %v5432_v28 = vsub.f32 %v4419_v2, %v4428_v42 }
 0x2b0   : > { %1255 = vadd.xlane.f32.xlu1 %v3448_v38  ;;  %v1576_v27 = vpop.permute.xlu1 %1575 }
 0x2b1   : > { %3220 = vmatprep.mubr.bf16.mxu1 %v1300_v33 }
 0x2b2   : > { %3235 = vmatpush3.bf16.xpose.msra.mxu1 %v1638_v44  ;;  %v5430_v44 = vsub.f32 %v4383_v25, %v4397_v51  ;;  %v5433_v25 = vsub.f32 %v4425_v46, %v4444_v49 }
 0x2b3   : > { %3221 = vmatmul.mubr.bf16.gmra.mxu1 %v1301_v19  ;;  %3302 = vmatprep.subr.msk.bf16.mxu1 %vm779_vm0, %v1594_v53  ;;  %v4582_v45 = vpop.permute.xlu0 %1417  ;;  %v1057_v53 = vmul.f32 1.442695, %v5429_v5  ;;  %v1203_v19 = vld [vmem:[#allocation3 + $0x30] sm:$0xff]  ;;  %v1209_v5 = vld [vmem:[#allocation3 + $0x60] sm:$0xff] }
 0x2b4   : > { %3240 = vmatprep.mubr.msk.bf16.mxu1 %vm779_vm0, %v1568_v55  ;;  %v1580_v57 = vpop.permute.xlu1 %1579  ;;  %v1059_v13 = vmul.f32 1.442695, %v5430_v44  ;;  %v5431_v55 = vsub.f32 %v4411_v22, %v4423_v7  ;;  %v1219_v60 = vmul.f32 %v4532_v40, %v1203_v19  ;;  %v1061_v51 = vmul.f32 1.442695, %v5433_v25  ;;  %v1207_v40 = vld [vmem:[#allocation3 + $0x50] sm:$0xff] }
 0x2b5   : > { %3451 = vpow2.f32 %v1057_v53  ;;  %v5434_v7 = vsub.f32 %v4437_v0, %v4447_v1  ;;  %v1208_v1 = vld [vmem:[#allocation3 + $0x58] sm:$0xff] }
 0x2b6   : > { %3453 = vpow2.f32 %v1059_v13  ;;  %v1065_v37 = vmul.f32 1.442695, %v5431_v55 }
 0x2b7   : > { %v4586_v4 = vpop.permute.xlu0 %1432  ;;  %v1063_v42 = vmul.f32 1.442695, %v5434_v7 }
 0x2b8   : > { %v4584_v41 = vpop.permute.xlu1 %1422  ;;  %3455 = vpow2.f32 %v1065_v37 }
 0x2ba   : > { %3237 = vmatpush3.bf16.xpose.msra.mxu1 %v1635_v9  ;;  %v1067_v9 = vmul.f32 1.442695, %v5432_v28  ;;  %v4664_v28 = vld [vmem:[#allocation4] sm:$0xff] }
 0x2bb   : > { %3303 = vmatprep.subr.msk.bf16.mxu1 %vm779_vm0, %v1592_v17  ;;  %v4590_v20 = vpop.permute.xlu0 %1452 }
 0x2bc   : > { %v4588_v35 = vpop.permute.xlu1 %1427  ;;  %3457 = vpow2.f32 %v1067_v9 }
 0x2bd   : > { %3459 = vpow2.f32 %v1061_v51  ;;  %v1497_v9 = vmul.f32 %v4664_v28, %v4588_v35  ;;  %v1498_v51 = vmul.f32 %v4664_v28, %v4586_v4 }
 0x2be   : > { %3461 = vpow2.f32 %v1063_v42  ;;  %v1496_v42 = vmul.f32 %v4664_v28, %v4584_v41  ;;  %v1502_v41 = vmul.f32 %v4664_v28, %v4590_v20 }
 0x2bf   : > { %v4594_v58 = vpop.permute.xlu0 %1442 }
 0x2c0   : > { %v4592_v62 = vpop.permute.xlu1 %1437 }
 0x2c2   : > { %3239 = vmatpush3.bf16.xpose.msra.mxu1 %v1632_v11  ;;  %v1201_v11 = vld [vmem:[#allocation3 + $0x20] sm:$0xff]  ;;  %v4630_v22 = vpop.eup %3451 }
 0x2c3   : > { %v4598_v14 = vpop.permute.xlu0 %1462  ;;  %v1223_v46 = vmul.f32 %v4630_v22, %v1207_v40 }
 0x2c4   : > { %v4596_v16 = vpop.permute.xlu1 %1447 }
 0x2c8   : > { %v4600_v18 = vpop.permute.xlu1 %1457 }
 0x2c9   : > { %3241 = vmatmul.mubr.msk.bf16.vlgmr.msra.gmra.mxu1 %vm779_vm0, %v1570_v23 }
 0x2ca   : > { %3244 = vmatprep.mubr.msk.bf16.mxu1 %vm779_vm0, %v1572_v47  ;;  %v1217_v47 = vmul.f32 %v4529_v36, %v1201_v11  ;;  %v1495_v11 = vmul.f32 %v4664_v28, %v4582_v45  ;;  %v1501_v45 = vmul.f32 %v4664_v28, %v4596_v16 }
 0x2d1   : > { %3245 = vmatmul.mubr.msk.bf16.gmra.mxu1 %vm779_vm0, %v1574_v52  ;;  %v1202_v52 = vld [vmem:[#allocation3 + $0x28] sm:$0xff] }
 0x2d2   : > { %3248 = vmatprep.mubr.msk.bf16.mxu1 %vm779_vm0, %v1576_v27  ;;  %v1218_v49 = vmul.f32 %v4517_v24, %v1202_v52  ;;  %v1499_v52 = vmul.f32 %v4664_v28, %v4592_v62 }
 0x2d9   : > { %3249 = vmatmul.mubr.msk.bf16.gmra.mxu1 %vm779_vm0, %v1578_v43 }
 0x2da   : > { %3252 = vmatprep.mubr.msk.bf16.mxu1 %vm779_vm0, %v1580_v57  ;;  %v1205_v57 = vld [vmem:[#allocation3 + $0x40] sm:$0xff] }
 0x2db   : > { %v1221_v59 = vmul.f32 %v4535_v8, %v1205_v57  ;;  %v1212_v8 = vld [vmem:[#allocation3 + $0x78] sm:$0xff] }
 0x2e1   : > { %3253 = vmatmul.mubr.msk.bf16.gmra.mxu1 %vm779_vm0, %v1582_v29  ;;  %v4638_v29 = vpop.eup %3453 }
 0x2e2   : > { %v4645_v50 = vpop.eup %3455 }
 0x306   : > { %v1234_v34 = vpop.xlane.xlu0 %1233 }
 0x307   : > { %v1263_v39 = vadd.f32 %v1234_v34, %v1215_v6  ;;  %v1224_v34 = vmul.f32 %v4638_v29, %v1208_v1 }
 0x308   : > { %v1230_v3 = vpop.xlane.xlu1 %1229 }
 0x309   : > { %1280 = vst.msk [vmem:[#allocation3 + $0x10] sm:$0xff] %vm564_vm1, %v1263_v39  ;;  %v1261_v21 = vadd.f32 %v1230_v3, %v1213_v56  ;;  %v1206_v56 = vld [vmem:[#allocation3 + $0x48] sm:$0xff] }
 0x30b   : > { %1278 = vst.msk [vmem:[#allocation3] sm:$0xff] %vm564_vm1, %v1261_v21  ;;  %v1222_v21 = vmul.f32 %v4523_v30, %v1206_v56 }
 0x30c   : > { %v1232_v48 = vpop.xlane.xlu0 %1231 }
 0x30d   : > { %v1262_v10 = vadd.f32 %v1232_v48, %v1214_v32  ;;  %v1211_v32 = vld [vmem:[#allocation3 + $0x70] sm:$0xff]  ;;  %v4649_v48 = vpop.eup %3457 }
 0x30f   : > { %1279 = vst.msk [vmem:[#allocation3 + $0x8] sm:$0xff] %vm564_vm1, %v1262_v10 }
 0x310   : > { %v1236_v31 = vpop.xlane.xlu1 %1235 }
 0x311   : > { %v1264_v38 = vadd.f32 %v1236_v31, %v1216_v12  ;;  %v1227_v12 = vmul.f32 %v4645_v50, %v1211_v32  ;;  %v4652_v31 = vpop.eup %3459 }
 0x312   : > { %v4656_v53 = vpop.eup %3461  ;;  %v1225_v44 = vmul.f32 %v4652_v31, %v1209_v5 }
 0x313   : > { %1281 = vst.msk [vmem:[#allocation3 + $0x18] sm:$0xff] %vm564_vm1, %v1264_v38  ;;  %v1228_v38 = vmul.f32 %v4649_v48, %v1212_v8  ;;  %v5435_v8 = vld [vmem:[#allocation12_spill] sm:$0xff] }
 0x314   : > { %v1244_v33 = vpop.xlane.xlu1 %1243 }
 0x315   : > { %v1268_v15 = vadd.f32 %v1244_v33, %v1220_v61  ;;  %v1210_v33 = vld [vmem:[#allocation3 + $0x68] sm:$0xff] }
 0x316   : > { %v1226_v19 = vmul.f32 %v4656_v53, %v1210_v33 }
 0x317   : > { %1285 = vst.msk [vmem:[#allocation3 + $0x38] sm:$0xff] %vm564_vm1, %v1268_v15 }
 0x320   : > { %v1242_v17 = vpop.xlane.xlu0 %1241 }
 0x321   : > { %v1267_v23 = vadd.f32 %v1242_v17, %v1219_v60 }
 0x323   : > { %1284 = vst.msk [vmem:[#allocation3 + $0x30] sm:$0xff] %vm564_vm1, %v1267_v23 }
 0x324   : > { %v1238_v2 = vpop.xlane.xlu0 %1237 }
 0x325   : > { %v1265_v27 = vadd.f32 %v1238_v2, %v1217_v47 }
 0x327   : > { %1282 = vst.msk [vmem:[#allocation3 + $0x20] sm:$0xff] %vm564_vm1, %v1265_v27 }
 0x328   : > { %v1250_v36 = vpop.xlane.xlu0 %1249  ;;  %v1240_v43 = vpop.xlane.xlu1 %1239 }
 0x329   : > { %v1271_v26 = vadd.f32 %v1250_v36, %v1223_v46  ;;  %v1266_v0 = vadd.f32 %v1240_v43, %v1218_v49  ;;  %v1500_v43 = vmul.f32 %v4664_v28, %v4594_v58  ;;  %v1504_v58 = vmul.f32 %v4664_v28, %v4598_v14  ;;  %v4870_v14 = vld [vmem:[#allocation2 + $0xa8] sm:$0xff] }
 0x32b   : > { %1288 = vst.msk [vmem:[#allocation3 + $0x50] sm:$0xff] %vm564_vm1, %v1271_v26  ;;  %1283 = vst.msk [vmem:[#allocation3 + $0x28] sm:$0xff] %vm564_vm1, %v1266_v0  ;;  %v1503_v0 = vmul.f32 %v4664_v28, %v4600_v18 }
 0x32c   : > { %v1246_v6 = vpop.xlane.xlu0 %1245 }
 0x32d   : > { %v1269_v39 = vadd.f32 %v1246_v6, %v1221_v59  ;;  %v1252_v24 = vpop.xlane.xlu1 %1251 }
 0x32e   : > { %v1272_v3 = vadd.f32 %v1252_v24, %v1224_v34 }
 0x32f   : > { %1286 = vst.msk [vmem:[#allocation3 + $0x40] sm:$0xff] %vm564_vm1, %v1269_v39 }
 0x330   : > { %1289 = vst.msk [vmem:[#allocation3 + $0x58] sm:$0xff] %vm564_vm1, %v1272_v3 }
 0x331   : > { %v1248_v63 = vpop.xlane.xlu1 %1247 }
 0x332   : > { %v1270_v10 = vadd.f32 %v1248_v63, %v1222_v21 }
 0x334   : > { %1287 = vst.msk [vmem:[#allocation3 + $0x48] sm:$0xff] %vm564_vm1, %v1270_v10  ;;  %v1258_v54 = vpop.xlane.xlu0 %1257 }
 0x335   : > { %v1275_v61 = vadd.f32 %v1258_v54, %v1227_v12  ;;  %v1260_v30 = vpop.xlane.xlu1 %1259 }
 0x336   : > { %v1276_v15 = vadd.f32 %v1260_v30, %v1228_v38  ;;  %v5453_v38 = vld [vmem:[#allocation28_spill] sm:$0xff] }
 0x337   : > { %1292 = vst.msk [vmem:[#allocation3 + $0x70] sm:$0xff] %vm564_vm1, %v1275_v61 }
 0x338   : > { %1293 = vst.msk [vmem:[#allocation3 + $0x78] sm:$0xff] %vm564_vm1, %v1276_v15  ;;  %v1254_v13 = vpop.xlane.xlu0 %1253 }
 0x339   : > { %v1273_v55 = vadd.f32 %v1254_v13, %v1225_v44  ;;  %v1256_v37 = vpop.xlane.xlu1 %1255 }
 0x33a   : > { %v1274_v60 = vadd.f32 %v1256_v37, %v1226_v19 }
 0x33b   : > { %1290 = vst.msk [vmem:[#allocation3 + $0x60] sm:$0xff] %vm564_vm1, %v1273_v55 }
 0x33c   : > { %1291 = vst.msk [vmem:[#allocation3 + $0x68] sm:$0xff] %vm564_vm1, %v1274_v60 }
 0x349   : > { %v3210_v17 = vpop.f32.mrf.mxu1 }
 0x34a   : > { %v1513_v23 = vadd.f32 %v3210_v17, %v1497_v9 }
 0x34b   : > { %v1336_v25 = vpop.f32.mrf.mxu1 }
 0x34c   : > { %1529 = vst.msk [vmem:[#allocation4 + $0x10] sm:$0xff] %vm779_vm0, %v1513_v23  ;;  %v1511_v47 = vadd.f32 %v1495_v11, %v1336_v25  ;;  %v5459_v11 = vld [vmem:[#allocation32_spill] sm:$0xff] }
 0x34d   : > { %v3211_v7 = vpop.f32.mrf.mxu1 }
 0x34e   : > { %1527 = vst.msk [vmem:[#allocation4] sm:$0xff] %vm779_vm0, %v1511_v47  ;;  %v1514_v2 = vadd.f32 %v3211_v7, %v1498_v51  ;;  %v4819_v47 = vld [vmem:[#allocation2 + $0x80] sm:$0xff] }
 0x34f   : > { %v1339_v35 = vpop.f32.mrf.mxu1 }
 0x350   : > { %1530 = vst.msk [vmem:[#allocation4 + $0x18] sm:$0xff] %vm779_vm0, %v1514_v2  ;;  %v1512_v40 = vadd.f32 %v1496_v42, %v1339_v35 }
 0x352   : > { %1528 = vst.msk [vmem:[#allocation4 + $0x8] sm:$0xff] %vm779_vm0, %v1512_v40 }
 0x363   : > { %v3214_v4 = vpop.f32.mrf.mxu1 }
 0x364   : > { %v1517_v27 = vadd.f32 %v3214_v4, %v1501_v45  ;;  %v4834_v4 = vld [vmem:[#allocation2 + $0x98] sm:$0xff] }
 0x365   : > { %v1352_v46 = vpop.f32.mrf.mxu1 }
 0x366   : > { %1533 = vst.msk [vmem:[#allocation4 + $0x30] sm:$0xff] %vm779_vm0, %v1517_v27  ;;  %v1515_v49 = vadd.f32 %v1499_v52, %v1352_v46 }
 0x367   : > { %v3215_v36 = vpop.f32.mrf.mxu1 }
 0x368   : > { %1531 = vst.msk [vmem:[#allocation4 + $0x20] sm:$0xff] %vm779_vm0, %v1515_v49  ;;  %v1518_v57 = vadd.f32 %v3215_v36, %v1502_v41 }
 0x369   : > { %v1355_v16 = vpop.f32.mrf.mxu1 }
 0x36a   : > { %1534 = vst.msk [vmem:[#allocation4 + $0x38] sm:$0xff] %vm779_vm0, %v1518_v57  ;;  %v1516_v26 = vadd.f32 %v1500_v43, %v1355_v16 }
 0x36b   : > { %v4689_v62 = vpop.f32.mrf.mxu1 }
 0x36c   : > { %1532 = vst.msk [vmem:[#allocation4 + $0x28] sm:$0xff] %vm779_vm0, %v1516_v26 }
 0x36d   : > { %v1368_v20 = vpop.f32.mrf.mxu1 }
 0x36e   : > { %v1519_v1 = vadd.f32 %v1503_v0, %v1368_v20 }
 0x36f   : > { %v4694_v59 = vpop.f32.mrf.mxu1 }
 0x370   : > { %1535 = vst.msk [vmem:[#allocation4 + $0x40] sm:$0xff] %vm779_vm0, %v1519_v1 }
 0x371   : > { %v1371_v6 = vpop.f32.mrf.mxu1 }
 0x372   : > { %v1520_v34 = vadd.f32 %v1504_v58, %v1371_v6 }
 0x373   : > { %v4700_v39 = vpop.f32.mrf.mxu1 }
 0x374   : > { %1536 = vst.msk [vmem:[#allocation4 + $0x48] sm:$0xff] %vm779_vm0, %v1520_v34  ;;  %v5447_v34 = vld [vmem:[#allocation22_spill] sm:$0xff] }
 0x375   : > { %v4702_v24 = vpop.f32.mrf.mxu1 }
 0x377   : > { %v4704_v18 = vpop.f32.mrf.mxu1 }
 0x379   : > { %v4706_v56 = vpop.f32.mrf.mxu1 }
 0x389   : > { %v3242_v3 = vpop.f32.mrf.mxu1 }
 0x38a   : > { %v1754_v21 = vmul.f32 0.125, %v3242_v3 }
 0x38b   : > { %v1689_v32 = vpop.f32.mrf.mxu1 }
 0x38c   : > { %v1752_v63 = vmul.f32 0.125, %v1689_v32  ;;  %v4711_v10 = vsel %vm741_vm2, %v1754_v21, -2.3819763e+38  ;;  %vm5448_vm2 = vcmp.le.s32.totalorder %v5435_v8, %v5447_v34  ;;  %v5449_v21 = vld [vmem:[#allocation23_spill] sm:$0xff] }
 0x38d   : > { %1805 = vmax.xlane.f32.xlu0 %v4711_v10  ;;  %v3243_v12 = vpop.f32.mrf.mxu1 }
 0x38e   : > { %v1755_v54 = vmul.f32 0.125, %v3243_v12  ;;  %v4717_v5 = vsel %vm739_vm3, %v1752_v63, -2.3819763e+38  ;;  %vm5450_vm3 = vcmp.le.s32.totalorder %v5435_v8, %v5449_v21 }
 0x38f   : > { %1801 = vmax.xlane.f32.xlu1 %v4717_v5  ;;  %v1692_v61 = vpop.f32.mrf.mxu1 }
 0x390   : > { %v1753_v30 = vmul.f32 0.125, %v1692_v61  ;;  %v4723_v13 = vsel %vm742_vm4, %v1755_v54, -2.3819763e+38  ;;  %v5452_v54 = vld [vmem:[#allocation27_spill] sm:$0xff]  ;;  %v5454_v61 = vld [vmem:[#allocation29_spill] sm:$0xff] }
 0x391   : > { %v3246_v33 = vpop.f32.mrf.mxu1 }
 0x392   : > { %v1758_v15 = vmul.f32 0.125, %v3246_v33  ;;  %v4728_v55 = vsel %vm740_vm5, %v1753_v30, -2.3819763e+38  ;;  %v5455_v30 = vld [vmem:[#allocation31_spill] sm:$0xff] }
 0x393   : > { %1807 = vmax.xlane.f32.xlu1 %v4723_v13  ;;  %1803 = vmax.xlane.f32.xlu0 %v4728_v55  ;;  %v1705_v37 = vpop.f32.mrf.mxu1 }
 0x394   : > { %v1756_v9 = vmul.f32 0.125, %v1705_v37  ;;  %v4735_v23 = vsel %vm745_vm6, %v1758_v15, -2.3819763e+38 }
 0x395   : > { %v3247_v60 = vpop.f32.mrf.mxu1 }
 0x396   : > { %v1759_v17 = vmul.f32 0.125, %v3247_v60  ;;  %v4747_v40 = vsel %vm743_vm8, %v1756_v9, -2.3819763e+38  ;;  %v4895_v9 = vld [vmem:[#allocation2 + $0xc0] sm:$0xff] }
 0x397   : > { %1813 = vmax.xlane.f32.xlu0 %v4735_v23  ;;  %v1708_v25 = vpop.f32.mrf.mxu1 }
 0x398   : > { %v1757_v51 = vmul.f32 0.125, %v1708_v25  ;;  %v4741_v7 = vsel %vm746_vm7, %v1759_v17, -2.3819763e+38  ;;  %v5458_v17 = vld [vmem:[#allocation30_spill] sm:$0xff]  ;;  %v4817_v25 = vld [vmem:[#allocation2 + $0x90] sm:$0xff] }
 0x399   : > { %1815 = vmax.xlane.f32.xlu1 %v4741_v7  ;;  %v3250_v42 = vpop.f32.mrf.mxu1 }
 0x39a   : > { %v1762_v2 = vmul.f32 0.125, %v3250_v42  ;;  %v4753_v52 = vsel %vm744_vm9, %v1757_v51, -2.3819763e+38 }
 0x39b   : > { %1809 = vmax.xlane.f32.xlu0 %v4747_v40  ;;  %v1721_v45 = vpop.f32.mrf.mxu1 }
 0x39c   : > { %v1760_v46 = vmul.f32 0.125, %v1721_v45  ;;  %v4759_v36 = vsel %vm749_vm10, %v1762_v2, -2.3819763e+38  ;;  %v4832_v45 = vld [vmem:[#allocation2 + $0x88] sm:$0xff] }
 0x39d   : > { %1811 = vmax.xlane.f32.xlu1 %v4753_v52  ;;  %v3251_v27 = vpop.f32.mrf.mxu1 }
 0x39e   : > { %v1763_v41 = vmul.f32 0.125, %v3251_v27  ;;  %v4771_v1 = vsel %vm747_vm12, %v1760_v46, -2.3819763e+38 }
 0x39f   : > { %1821 = vmax.xlane.f32.xlu0 %v4759_v36  ;;  %v1724_v43 = vpop.f32.mrf.mxu1 }
 0x3a0   : > { %v1761_v57 = vmul.f32 0.125, %v1724_v43  ;;  %v4765_v26 = vsel %vm750_vm11, %v1763_v41, -2.3819763e+38  ;;  %v4845_v43 = vld [vmem:[#allocation2 + $0xb0] sm:$0xff] }
 0x3a1   : > { %1823 = vmax.xlane.f32.xlu1 %v4765_v26  ;;  %v3254_v0 = vpop.f32.mrf.mxu1 }
 0x3a2   : > { %v1766_v58 = vmul.f32 0.125, %v3254_v0  ;;  %v4777_v3 = vsel %vm5448_vm2, %v1761_v57, -2.3819763e+38  ;;  %v4854_v0 = vld [vmem:[#allocation2 + $0xb8] sm:$0xff] }
 0x3a3   : > { %1817 = vmax.xlane.f32.xlu0 %v4771_v1  ;;  %v1737_v6 = vpop.f32.mrf.mxu1 }
 0x3a4   : > { %v4782_v32 = vsel %vm5450_vm3, %v1766_v58, -2.3819763e+38  ;;  %v1764_v63 = vmul.f32 0.125, %v1737_v6  ;;  %v4859_v6 = vld [vmem:[#allocation2 + $0xa0] sm:$0xff] }
 0x3a5   : > { %1819 = vmax.xlane.f32.xlu1 %v4777_v3  ;;  %v3255_v33 = vpop.f32.mrf.mxu1 }
 0x3a6   : > { %v4789_v12 = vsel %vm751_vm14, %v1764_v63, -2.3819763e+38  ;;  %v1767_v15 = vmul.f32 0.125, %v3255_v33 }
 0x3a7   : > { %1829 = vmax.xlane.f32.xlu0 %v4782_v32  ;;  %v1740_v44 = vpop.f32.mrf.mxu1 }
 0x3a8   : > { %v1765_v19 = vmul.f32 0.125, %v1740_v44  ;;  %v4804_v60 = vsel %vm754_vm15, %v1767_v15, -2.3819763e+38  ;;  %v4888_v44 = vld [vmem:[#allocation2 + $0xd8] sm:$0xff] }
 0x3ab   : > { %1825 = vmax.xlane.f32.xlu0 %v4789_v12 }
 0x3b6   : > { %2152 = vrot.lane.b32.xlu1 %v5452_v54, %s3683_s12 }
 0x3ba   : > { %2150 = vrot.lane.b32.xlu1 %v5453_v38, %s3683_s12 }
 0x3c1   : > { %1467 = vperm.xlu0 %3397, %v4630_v22   ;;  %v4810_v22 = vsel %vm752_vm13, %v1765_v19, -2.3819763e+38 }
 0x3c5   : > { %2148 = vrot.lane.b32.xlu0 %v5454_v61, %s3683_s12  ;;  %v4877_v61 = vld [vmem:[#allocation2 + $0xd0] sm:$0xff] }
 0x3c9   : > { %2144 = vrot.lane.b32.xlu0 %v5455_v30, %s3683_s12 }
 0x3de   : > { %1831 = vmax.xlane.f32.xlu1 %v4804_v60 }
 0x3e2   : > { %1827 = vmax.xlane.f32.xlu1 %v4810_v22 }
 0x3f3   : > { %2146 = vrot.lane.b32.xlu1 %v5458_v17, %s3683_s12 }
 0x3f7   : > { %2142 = vrot.lane.b32.xlu1 %v5459_v11, %s3683_s12 }
 0x416   : > { %v1806_v51 = vpop.xlane.xlu0 %1805 }
 0x417   : > { %v4822_v42 = vmax.f32 %v4817_v25, %v1806_v51 }
 0x418   : > { %v1802_v2 = vpop.xlane.xlu1 %1801 }
 0x419   : > { %2470 = vst.msk [vmem:[#allocation2 + $0x90] sm:$0xff] %vm564_vm1, %v4822_v42  ;;  %v4829_v35 = vmax.f32 %v4819_v47, %v1802_v2  ;;  %1909 = vperm.xlu0 %3397, %v4822_v42   ;;  %v4906_v2 = vld [vmem:[#allocation2 + $0xc8] sm:$0xff] }
 0x41b   : > { %2468 = vst.msk [vmem:[#allocation2 + $0x80] sm:$0xff] %vm564_vm1, %v4829_v35 }
 0x41c   : > { %v1804_v27 = vpop.xlane.xlu0 %1803  ;;  %v1808_v46 = vpop.xlane.xlu1 %1807 }
 0x41d   : > { %v4839_v41 = vmax.f32 %v4832_v45, %v1804_v27  ;;  %v4842_v49 = vmax.f32 %v4834_v4, %v1808_v46  ;;  %1899 = vperm.xlu0 %3397, %v4829_v35  }
 0x41f   : > { %2469 = vst.msk [vmem:[#allocation2 + $0x88] sm:$0xff] %vm564_vm1, %v4839_v41  ;;  %2471 = vst.msk [vmem:[#allocation2 + $0x98] sm:$0xff] %vm564_vm1, %v4842_v49  ;;  %1914 = vperm.xlu1 %3398, %v4842_v49  }
 0x420   : > { %v1814_v16 = vpop.xlane.xlu0 %1813 }
 0x421   : > { %v4857_v20 = vmax.f32 %v4845_v43, %v1814_v16  ;;  %v4913_v16 = vld [vmem:[#allocation2 + $0xf0] sm:$0xff] }
 0x422   : > { %v1816_v58 = vpop.xlane.xlu1 %1815 }
 0x423   : > { %2474 = vst.msk [vmem:[#allocation2 + $0xb0] sm:$0xff] %vm564_vm1, %v4857_v20  ;;  %v4866_v21 = vmax.f32 %v4854_v0, %v1816_v58  ;;  %1929 = vperm.xlu0 %3397, %v4857_v20   ;;  %1904 = vperm.xlu1 %3398, %v4839_v41  }
 0x424   : > { %v1810_v63 = vpop.xlane.xlu0 %1809 }
 0x425   : > { %2475 = vst.msk [vmem:[#allocation2 + $0xb8] sm:$0xff] %vm564_vm1, %v4866_v21  ;;  %v4875_v54 = vmax.f32 %v4859_v6, %v1810_v63 }
 0x426   : > { %v1812_v38 = vpop.xlane.xlu1 %1811 }
 0x427   : > { %2472 = vst.msk [vmem:[#allocation2 + $0xa0] sm:$0xff] %vm564_vm1, %v4875_v54  ;;  %v4884_v33 = vmax.f32 %v4870_v14, %v1812_v38  ;;  %1919 = vperm.xlu0 %3397, %v4875_v54   ;;  %1934 = vperm.xlu1 %3398, %v4866_v21  }
 0x428   : > { %v1822_v15 = vpop.xlane.xlu0 %1821 }
 0x429   : > { %2473 = vst.msk [vmem:[#allocation2 + $0xa8] sm:$0xff] %vm564_vm1, %v4884_v33  ;;  %v4893_v19 = vmax.f32 %v4877_v61, %v1822_v15 }
 0x42a   : > { %v1824_v37 = vpop.xlane.xlu1 %1823 }
 0x42b   : > { %2478 = vst.msk [vmem:[#allocation2 + $0xd0] sm:$0xff] %vm564_vm1, %v4893_v19  ;;  %v4902_v11 = vmax.f32 %v4888_v44, %v1824_v37  ;;  %1949 = vperm.xlu0 %3397, %v4893_v19   ;;  %1924 = vperm.xlu1 %3398, %v4884_v33  }
 0x42c   : > { %v1818_v51 = vpop.xlane.xlu0 %1817 }
 0x42d   : > { %2479 = vst.msk [vmem:[#allocation2 + $0xd8] sm:$0xff] %vm564_vm1, %v4902_v11  ;;  %v4911_v27 = vmax.f32 %v4895_v9, %v1818_v51  ;;  %v4929_v51 = vld [vmem:[#allocation2 + $0xe0] sm:$0xff] }
 0x42e   : > { %v1820_v46 = vpop.xlane.xlu1 %1819 }
 0x42f   : > { %2476 = vst.msk [vmem:[#allocation2 + $0xc0] sm:$0xff] %vm564_vm1, %v4911_v27  ;;  %v4920_v63 = vmax.f32 %v4906_v2, %v1820_v46  ;;  %1939 = vperm.xlu0 %3397, %v4911_v27   ;;  %1954 = vperm.xlu1 %3398, %v4902_v11   ;;  %v5460_v46 = vld [vmem:[#allocation33_spill] sm:$0xff] }
 0x430   : > { %v1830_v38 = vpop.xlane.xlu0 %1829 }
 0x431   : > { %2477 = vst.msk [vmem:[#allocation2 + $0xc8] sm:$0xff] %vm564_vm1, %v4920_v63  ;;  %v4927_v15 = vmax.f32 %v4913_v16, %v1830_v38  ;;  %v1849_v38 = vsub.f32 %v4819_v47, %v4829_v35  ;;  %v1852_v47 = vsub.f32 %v4834_v4, %v4842_v49  ;;  %v2490_v4 = vld [vmem:[#allocation3 + $0x18] sm:$0xff]  ;;  %v2492_v49 = vld [vmem:[#allocation3 + $0x28] sm:$0xff] }
 0x432   : > { %v2153_v37 = vpop.permute.xlu1 %2152 }
 0x433   : > { %2482 = vst.msk [vmem:[#allocation2 + $0xf0] sm:$0xff] %vm564_vm1, %v4927_v15  ;;  %2140 = vrot.lane.b32.xlu0 %v5460_v46, %s3683_s12  ;;  %1944 = vperm.xlu1 %3398, %v4920_v63   ;;  %v5461_v46 = vld [vmem:[#allocation34_spill] sm:$0xff]  ;;  %v1865_v8 = vmul.f32 1.442695, %v1849_v38  ;;  %v2488_v38 = vld [vmem:[#allocation3 + $0x8] sm:$0xff] }
 0x434   : > { %3256 = vmatprep.subr.bf16.mxu0 %v2153_v37  ;;  %v1826_v17 = vpop.xlane.xlu0 %1825 }
 0x435   : > { %v4941_v34 = vmax.f32 %v4929_v51, %v1826_v17  ;;  %3257 = vmatpush3.bf16.msra.mxu0 %v2153_v37  ;;  %3463 = vpow2.f32 %v1865_v8  ;;  %v1871_v17 = vmul.f32 1.442695, %v1852_v47  ;;  %v2500_v47 = vld [vmem:[#allocation3 + $0x68] sm:$0xff] }
 0x436   : > { %v2151_v30 = vpop.permute.xlu1 %2150 }
 0x437   : > { %2480 = vst.msk [vmem:[#allocation2 + $0xe0] sm:$0xff] %vm564_vm1, %v4941_v34  ;;  %1959 = vperm.xlu0 %3397, %v4941_v34   ;;  %3258 = vmatprep.subr.bf16.mxu0 %v2151_v30  ;;  %3465 = vpow2.f32 %v1871_v17  ;;  %v1854_v17 = vsub.f32 %v4870_v14, %v4884_v33  ;;  %v1798_v33 = vld [vmem:[#allocation2 + $0xe8] sm:$0xff] }
 0x438   : > { %2138 = vrot.lane.b32.xlu1 %v5461_v46, %s3683_s12  ;;  %3467 = vrcp.f32 %v2488_v38 }
 0x439   : > { %3259 = vmatpush3.bf16.msra.mxu0 %v2151_v30  ;;  %3469 = vrcp.f32 %v2490_v4  ;;  %v2496_v30 = vld [vmem:[#allocation3 + $0x48] sm:$0xff]  ;;  %v1875_v38 = vmul.f32 1.442695, %v1854_v17  ;;  %v1860_v4 = vsub.f32 %v4888_v44, %v4902_v11  ;;  %v5462_v11 = vsub.f32 %v4832_v45, %v4839_v41 }
 0x43a   : > { %3471 = vrcp.f32 %v2492_v49 }
 0x43b   : > { %1969 = vperm.xlu0 %3397, %v4927_v15  }
 0x43c   : > { %v1468_v35 = vpop.permute.xlu0 %1467 }
 0x43d   : > { %v1505_v37 = vmul.f32 %v4664_v28, %v1468_v35 }
 0x43f   : > { %v1521_v58 = vadd.f32 %v4689_v62, %v1505_v37  ;;  %1472 = vperm.xlu0 %3397, %v4638_v29   ;;  %v2494_v62 = vld [vmem:[#allocation3 + $0x38] sm:$0xff] }
 0x440   : > { %v2149_v57 = vpop.permute.xlu0 %2148  ;;  %3473 = vrcp.f32 %v2494_v62  ;;  %v1887_v62 = vmul.f32 1.442695, %v1860_v4 }
 0x441   : > { %1537 = vst.msk [vmem:[#allocation4 + $0x50] sm:$0xff] %vm779_vm0, %v1521_v58  ;;  %3260 = vmatprep.subr.bf16.mxu0 %v2149_v57  ;;  %3475 = vrcp.f32 %v2496_v30  ;;  %v2498_v58 = vld [vmem:[#allocation3 + $0x58] sm:$0xff] }
 0x442   : > { %3261 = vmatpush3.bf16.msra.mxu0 %v2149_v57  ;;  %v4959_v8 = vpop.eup %3463  ;;  %3477 = vrcp.f32 %v2498_v58 }
 0x443   : > { %1482 = vperm.xlu0 %3397, %v4656_v53   ;;  %3479 = vrcp.f32 %v2500_v47 }
 0x444   : > { %v4962_v29 = vpop.eup %3465  ;;  %v2145_v41 = vpop.permute.xlu0 %2144 }
 0x445   : > { %v3468_v57 = vpop.eup %3467 }
 0x446   : > { %v3470_v53 = vpop.eup %3469 }
 0x447   : > { %1492 = vperm.xlu0 %3397, %v4649_v48   ;;  %v1856_v48 = vsub.f32 %v4854_v0, %v4866_v21  ;;  %v3472_v46 = vpop.eup %3471  ;;  %v1858_v0 = vsub.f32 %v4906_v2, %v4920_v63  ;;  %v1800_v21 = vld [vmem:[#allocation2 + $0xf8] sm:$0xff] }
 0x449   : > { %v1879_v35 = vmul.f32 1.442695, %v1856_v48  ;;  %v1883_v14 = vmul.f32 1.442695, %v1858_v0  ;;  %v5465_v0 = vsub.f32 %v4845_v43, %v4857_v20  ;;  %v2489_v20 = vld [vmem:[#allocation3 + $0x10] sm:$0xff] }
 0x44b   : > { %2277 = vperm.xlu0 %3397, %v4959_v8   ;;  %3481 = vpow2.f32 %v1879_v35 }
 0x44c   : > { %3483 = vpow2.f32 %v1875_v38 }
 0x44d   : > { %v3474_v37 = vpop.eup %3473  ;;  %3485 = vpow2.f32 %v1887_v62 }
 0x44e   : > { %v3476_v49 = vpop.eup %3475  ;;  %3487 = vpow2.f32 %v1883_v14 }
 0x44f   : > { %2292 = vperm.xlu0 %3397, %v4962_v29  }
 0x453   : > { %2542 = vperm.xlu0 %3397, %v3468_v57   ;;  %v3478_v57 = vpop.eup %3477 }
 0x454   : > { %v3480_v58 = vpop.eup %3479 }
 0x457   : > { %2552 = vperm.xlu0 %3397, %v3470_v53  }
 0x458   : > { %v4977_v63 = vpop.eup %3481 }
 0x459   : > { %v4984_v4 = vpop.eup %3483 }
 0x45b   : > { %2562 = vperm.xlu0 %3397, %v3472_v46   ;;  %v1867_v46 = vmul.f32 1.442695, %v5462_v11  ;;  %v2497_v11 = vld [vmem:[#allocation3 + $0x50] sm:$0xff] }
 0x45d   : > { %3489 = vpow2.f32 %v1867_v46 }
 0x45f   : > { %2572 = vperm.xlu0 %3397, %v3474_v37   ;;  %v5463_v37 = vsub.f32 %v4817_v25, %v4822_v42  ;;  %v4990_v42 = vpop.eup %3485 }
 0x461   : > { %v1869_v38 = vmul.f32 1.442695, %v5463_v37 }
 0x463   : > { %2582 = vperm.xlu0 %3397, %v3476_v49   ;;  %v5464_v49 = vsub.f32 %v4859_v6, %v4875_v54  ;;  %v2487_v54 = vld [vmem:[#allocation3] sm:$0xff] }
 0x465   : > { %v1873_v62 = vmul.f32 1.442695, %v5464_v49 }
 0x467   : > { %2592 = vperm.xlu0 %3397, %v3478_v57   ;;  %v1832_v30 = vpop.xlane.xlu1 %1831  ;;  %v4997_v57 = vpop.eup %3487 }
 0x468   : > { %v1848_v53 = vmax.f32 %v1800_v21, %v1832_v30 }
 0x46a   : > { %v1864_v48 = vsub.f32 %v1800_v21, %v1848_v53  ;;  %2483 = vst.msk [vmem:[#allocation2 + $0xf8] sm:$0xff] %vm564_vm1, %v1848_v53  ;;  %v1877_v21 = vmul.f32 1.442695, %v5465_v0  ;;  %v5001_v6 = vpop.eup %3489 }
 0x46b   : > { %2602 = vperm.xlu0 %3397, %v3480_v58   ;;  %v1828_v44 = vpop.xlane.xlu1 %1827 }
 0x46c   : > { %v1846_v47 = vmax.f32 %v1798_v33, %v1828_v44  ;;  %v1895_v2 = vmul.f32 1.442695, %v1864_v48  ;;  %v2495_v48 = vld [vmem:[#allocation3 + $0x40] sm:$0xff] }
 0x46e   : > { %v1862_v35 = vsub.f32 %v1798_v33, %v1846_v47  ;;  %2481 = vst.msk [vmem:[#allocation2 + $0xe8] sm:$0xff] %vm564_vm1, %v1846_v47  ;;  %1964 = vperm.xlu1 %3398, %v1846_v47   ;;  %3491 = vpow2.f32 %v1895_v2  ;;  %v2493_v33 = vld [vmem:[#allocation3 + $0x30] sm:$0xff]  ;;  %v2499_v2 = vld [vmem:[#allocation3 + $0x60] sm:$0xff] }
 0x46f   : > { %2312 = vperm.xlu0 %3397, %v4977_v63   ;;  %v2147_v17 = vpop.permute.xlu1 %2146  ;;  %3493 = vpow2.f32 %v1869_v38 }
 0x470   : > { %3262 = vmatprep.subr.bf16.mxu0 %v2147_v17  ;;  %v1891_v45 = vmul.f32 1.442695, %v1862_v35 }
 0x471   : > { %3263 = vmatpush3.bf16.msra.mxu0 %v2147_v17 }
 0x472   : > { %1974 = vperm.xlu1 %3398, %v1848_v53   ;;  %3264 = vmatprep.subr.bf16.mxu0 %v2145_v41  ;;  %3495 = vpow2.f32 %v1891_v45  ;;  %v2491_v53 = vld [vmem:[#allocation3 + $0x20] sm:$0xff]  ;;  %v2501_v45 = vld [vmem:[#allocation3 + $0x70] sm:$0xff] }
 0x473   : > { %2302 = vperm.xlu0 %3397, %v4984_v4   ;;  %v2143_v25 = vpop.permute.xlu1 %2142  ;;  %3497 = vpow2.f32 %v1873_v62  ;;  %v5466_v62 = vsub.f32 %v4877_v61, %v4893_v19 }
 0x474   : > { %3499 = vpow2.f32 %v1877_v21 }
 0x475   : > { %3265 = vmatpush3.bf16.msra.mxu0 %v2145_v41  ;;  %3501 = vrcp.f32 %v2487_v54 }
 0x476   : > { %1477 = vperm.xlu1 %3398, %v4652_v31   ;;  %3266 = vmatprep.subr.bf16.mxu0 %v2143_v25  ;;  %3503 = vrcp.f32 %v2489_v20 }
 0x477   : > { %2332 = vperm.xlu0 %3397, %v4990_v42   ;;  %3505 = vrcp.f32 %v2491_v53 }
 0x478   : > { %3507 = vrcp.f32 %v2493_v33 }
 0x479   : > { %3267 = vmatpush3.bf16.msra.mxu0 %v2143_v25  ;;  %3509 = vrcp.f32 %v2495_v48  ;;  %v1885_v25 = vmul.f32 1.442695, %v5466_v62 }
 0x47a   : > { %1487 = vperm.xlu1 %3398, %v4645_v50   ;;  %3511 = vrcp.f32 %v2497_v11 }
 0x47b   : > { %2322 = vperm.xlu0 %3397, %v4997_v57   ;;  %v5003_v31 = vpop.eup %3491  ;;  %3513 = vrcp.f32 %v2499_v2  ;;  %v5469_v2 = vsub.f32 %v4929_v51, %v4941_v34 }
 0x47c   : > { %v5007_v43 = vpop.eup %3493 }
 0x47e   : > { %2282 = vperm.xlu1 %3398, %v5001_v6  }
 0x47f   : > { %2352 = vperm.xlu0 %3397, %v5003_v31   ;;  %v5009_v30 = vpop.eup %3495 }
 0x480   : > { %v5013_v50 = vpop.eup %3497 }
 0x481   : > { %v5016_v14 = vpop.eup %3499 }
 0x482   : > { %2287 = vperm.xlu1 %3398, %v5007_v43   ;;  %v3502_v58 = vpop.eup %3501 }
 0x483   : > { %2342 = vperm.xlu0 %3397, %v5009_v30   ;;  %v3504_v44 = vpop.eup %3503 }
 0x484   : > { %v3506_v47 = vpop.eup %3505 }
 0x485   : > { %v3508_v38 = vpop.eup %3507 }
 0x486   : > { %2297 = vperm.xlu1 %3398, %v5013_v50   ;;  %v3510_v0 = vpop.eup %3509 }
 0x487   : > { %v3512_v48 = vpop.eup %3511 }
 0x48a   : > { %2307 = vperm.xlu1 %3398, %v5016_v14  }
 0x48e   : > { %2537 = vperm.xlu1 %3398, %v3502_v58  }
 0x492   : > { %2547 = vperm.xlu1 %3398, %v3504_v44  }
 0x494   : > { %v1910_v46 = vpop.permute.xlu0 %1909 }
 0x495   : > { %v1979_v35 = vsub.f32 %v4711_v10, %v1910_v46  ;;  %v5467_v10 = vsub.f32 %v4895_v9, %v4911_v27  ;;  %v5468_v9 = vsub.f32 %v4913_v16, %v4927_v15 }
 0x496   : > { %2557 = vperm.xlu1 %3398, %v3506_v47  }
 0x497   : > { %v1997_v17 = vmul.f32 1.442695, %v1979_v35  ;;  %v1881_v54 = vmul.f32 1.442695, %v5467_v10  ;;  %v1893_v27 = vmul.f32 1.442695, %v5468_v9 }
 0x498   : > { %v1900_v37 = vpop.permute.xlu0 %1899  ;;  %v1889_v35 = vmul.f32 1.442695, %v5469_v2 }
 0x499   : > { %3515 = vpow2.f32 %v1997_v17  ;;  %v1977_v49 = vsub.f32 %v4717_v5, %v1900_v37 }
 0x49a   : > { %2567 = vperm.xlu1 %3398, %v3508_v38   ;;  %v1915_v41 = vpop.permute.xlu1 %1914  ;;  %3517 = vrcp.f32 %v2501_v45 }
 0x49b   : > { %v1980_v21 = vsub.f32 %v4723_v13, %v1915_v41  ;;  %v1993_v33 = vmul.f32 1.442695, %v1977_v49  ;;  %3519 = vpow2.f32 %v1885_v25 }
 0x49c   : > { %3521 = vpow2.f32 %v1881_v54 }
 0x49d   : > { %v1999_v44 = vmul.f32 1.442695, %v1980_v21  ;;  %3523 = vpow2.f32 %v1993_v33 }
 0x49e   : > { %v1930_v20 = vpop.permute.xlu0 %1929  ;;  %2577 = vperm.xlu1 %3398, %v3510_v0   ;;  %v1905_v53 = vpop.permute.xlu1 %1904 }
 0x49f   : > { %v1978_v58 = vsub.f32 %v4728_v55, %v1905_v53  ;;  %v1983_v5 = vsub.f32 %v4735_v23, %v1930_v20  ;;  %v3514_v55 = vpop.eup %3513 }
 0x4a1   : > { %v1995_v61 = vmul.f32 1.442695, %v1978_v58  ;;  %v2005_v46 = vmul.f32 1.442695, %v1983_v5 }
 0x4a2   : > { %v1920_v19 = vpop.permute.xlu0 %1919  ;;  %2587 = vperm.xlu1 %3398, %v3512_v48   ;;  %v1935_v13 = vpop.permute.xlu1 %1934 }
 0x4a3   : > { %v1981_v11 = vsub.f32 %v4747_v40, %v1920_v19  ;;  %3525 = vpow2.f32 %v1995_v61  ;;  %v1984_v23 = vsub.f32 %v4741_v7, %v1935_v13 }
 0x4a4   : > { %3527 = vpow2.f32 %v1999_v44 }
 0x4a5   : > { %3529 = vpow2.f32 %v1893_v27  ;;  %v2001_v16 = vmul.f32 1.442695, %v1981_v11  ;;  %v2007_v45 = vmul.f32 1.442695, %v1984_v23 }
 0x4a6   : > { %v3516_v47 = vpop.eup %3515  ;;  %v1950_v17 = vpop.permute.xlu0 %1949  ;;  %2597 = vperm.xlu1 %3398, %v3514_v55   ;;  %3531 = vpow2.f32 %v2005_v46 }
 0x4a7   : > { %v1925_v37 = vpop.permute.xlu1 %1924  ;;  %2062 = vadd.xlane.f32.xlu0 %v3516_v47  ;;  %v1987_v40 = vsub.f32 %v4759_v36, %v1950_v17  ;;  %v3518_v38 = vpop.eup %3517  ;;  %3533 = vpow2.f32 %v1889_v35 }
 0x4a8   : > { %v1982_v15 = vsub.f32 %v4753_v52, %v1925_v37  ;;  %3535 = vpow2.f32 %v2001_v16  ;;  %v5041_v62 = vpop.eup %3519 }
 0x4a9   : > { %v2013_v51 = vmul.f32 1.442695, %v1987_v40  ;;  %v5045_v21 = vpop.eup %3521 }
 0x4aa   : > { %v2003_v41 = vmul.f32 1.442695, %v1982_v15  ;;  %v1940_v7 = vpop.permute.xlu0 %1939  ;;  %2607 = vperm.xlu1 %3398, %v3518_v38   ;;  %v5048_v54 = vpop.eup %3523 }
 0x4ab   : > { %v1955_v49 = vpop.permute.xlu1 %1954  ;;  %v1985_v34 = vsub.f32 %v4771_v1, %v1940_v7 }
 0x4ac   : > { %3537 = vpow2.f32 %v2003_v41  ;;  %v1988_v52 = vsub.f32 %v4765_v26, %v1955_v49 }
 0x4ad   : > { %3539 = vpow2.f32 %v2007_v45  ;;  %v2009_v25 = vmul.f32 1.442695, %v1985_v34 }
 0x4ae   : > { %v2141_v0 = vpop.permute.xlu0 %2140  ;;  %2327 = vperm.xlu1 %3398, %v5041_v62   ;;  %3541 = vpow2.f32 %v2013_v51  ;;  %v2015_v20 = vmul.f32 1.442695, %v1988_v52 }
 0x4af   : > { %v1945_v36 = vpop.permute.xlu1 %1944  ;;  %3268 = vmatprep.subr.bf16.mxu0 %v2141_v0  ;;  %3543 = vpow2.f32 %v2009_v25 }
 0x4b0   : > { %v1986_v10 = vsub.f32 %v4777_v3, %v1945_v36  ;;  %3269 = vmatpush3.bf16.msra.mxu0 %v2141_v0  ;;  %v3526_v1 = vpop.eup %3525 }
 0x4b1   : > { %v5050_v33 = vpop.eup %3527  ;;  %2060 = vadd.xlane.f32.xlu0 %v3526_v1  ;;  %v2122_v5 = vpack.c.bf16 %v3526_v1, %v5048_v54 }
 0x4b2   : > { %v2011_v53 = vmul.f32 1.442695, %v1986_v10  ;;  %v1960_v26 = vpop.permute.xlu0 %1959  ;;  %2317 = vperm.xlu1 %3398, %v5045_v21   ;;  %v5054_v3 = vpop.eup %3529  ;;  %v2123_v44 = vpack.c.bf16 %v5050_v33, %v3516_v47 }
 0x4b3   : > { %v2139_v58 = vpop.permute.xlu1 %2138  ;;  %3272 = vmatprep.mubr.bf16.mxu0 %v2122_v5  ;;  %v3532_v48 = vpop.eup %3531  ;;  %v1989_v13 = vsub.f32 %v4789_v12, %v1960_v26 }
 0x4b4   : > { %3545 = vpow2.f32 %v2011_v53  ;;  %3270 = vmatprep.subr.bf16.mxu0 %v2139_v58  ;;  %v5058_v19 = vpop.eup %3533 }
 0x4b5   : > { %3271 = vmatpush3.bf16.msra.mxu0 %v2139_v58  ;;  %3547 = vpow2.f32 %v2015_v20  ;;  %2070 = vadd.xlane.f32.xlu0 %v3532_v48  ;;  %v3536_v27 = vpop.eup %3535  ;;  %v2017_v2 = vmul.f32 1.442695, %v1989_v13 }
 0x4b6   : > { %v1970_v61 = vpop.permute.xlu0 %1969  ;;  %2347 = vperm.xlu1 %3398, %v5054_v3  }
 0x4b7   : > { %v1991_v9 = vsub.f32 %v4782_v32, %v1970_v61 }
 0x4b8   : > { %3273 = vmatmul.mubr.bf16.vlgmr.msra.gmra.mxu0 %v2123_v44 }
 0x4b9   : > { %v3538_v11 = vpop.eup %3537  ;;  %v2021_v46 = vmul.f32 1.442695, %v1991_v9  ;;  %2066 = vadd.xlane.f32.xlu0 %v3536_v27 }
 0x4ba   : > { %v3540_v55 = vpop.eup %3539  ;;  %v1473_v23 = vpop.permute.xlu0 %1472  ;;  %2337 = vperm.xlu1 %3398, %v5058_v19   ;;  %v2124_v47 = vpack.c.bf16 %v3538_v11, %v3536_v27 }
 0x4bb   : > { %3549 = vpow2.f32 %v2021_v46  ;;  %v1506_v35 = vmul.f32 %v4664_v28, %v1473_v23  ;;  %v3542_v17 = vpop.eup %3541  ;;  %v2125_v37 = vpack.c.bf16 %v3540_v55, %v3532_v48 }
 0x4bc   : > { %3276 = vmatprep.mubr.bf16.mxu0 %v2124_v47  ;;  %v3544_v16 = vpop.eup %3543  ;;  %3551 = vpow2.f32 %v2017_v2 }
 0x4bd   : > { %v1522_v12 = vadd.f32 %v4694_v59, %v1506_v35  ;;  %2078 = vadd.xlane.f32.xlu0 %v3542_v17 }
 0x4be   : > { %v1483_v32 = vpop.permute.xlu0 %1482 }
 0x4bf   : > { %1538 = vst.msk [vmem:[#allocation4 + $0x58] sm:$0xff] %vm779_vm0, %v1522_v12  ;;  %v1508_v15 = vmul.f32 %v4664_v28, %v1483_v32 }
 0x4c0   : > { %3277 = vmatmul.mubr.bf16.gmra.mxu0 %v2125_v37 }
 0x4c1   : > { %v3546_v40 = vpop.eup %3545  ;;  %v1524_v38 = vadd.f32 %v1508_v15, %v4706_v56  ;;  %2074 = vadd.xlane.f32.xlu0 %v3544_v16  ;;  %v2502_v56 = vld [vmem:[#allocation3 + $0x78] sm:$0xff] }
 0x4c2   : > { %v2126_v45 = vpack.c.bf16 %v3546_v40, %v3544_v16  ;;  %v3548_v41 = vpop.eup %3547  ;;  %v1493_v7 = vpop.permute.xlu0 %1492  ;;  %3553 = vrcp.f32 %v2502_v56 }
 0x4c3   : > { %1540 = vst.msk [vmem:[#allocation4 + $0x68] sm:$0xff] %vm779_vm0, %v1524_v38  ;;  %v1510_v59 = vmul.f32 %v4664_v28, %v1493_v7  ;;  %v2127_v34 = vpack.c.bf16 %v3548_v41, %v3542_v17  ;;  %v2028_v38 = vld [vmem:[#allocation3 + $0x90] sm:$0xff] }
 0x4c4   : > { %3280 = vmatprep.mubr.bf16.mxu0 %v2126_v45 }
 0x4c5   : > { %v1526_v49 = vadd.f32 %v4704_v18, %v1510_v59 }
 0x4c6   : > { %v5072_v25 = vpop.permute.xlu0 %2277 }
 0x4c7   : > { %1542 = vst.msk [vmem:[#allocation4 + $0x78] sm:$0xff] %vm779_vm0, %v1526_v49 }
 0x4c8   : > { %3281 = vmatmul.mubr.bf16.gmra.mxu0 %v2127_v34  ;;  %v3550_v51 = vpop.eup %3549  ;;  %v2027_v34 = vld [vmem:[#allocation3 + $0x88] sm:$0xff] }
 0x4c9   : > { %2086 = vadd.xlane.f32.xlu0 %v3550_v51  ;;  %v3552_v52 = vpop.eup %3551  ;;  %v2043_v56 = vmul.f32 %v5001_v6, %v2027_v34  ;;  %v2038_v34 = vld [vmem:[#allocation3 + $0xe0] sm:$0xff] }
 0x4ca   : > { %v5074_v0 = vpop.permute.xlu0 %2292 }
 0x4cd   : > { %2082 = vadd.xlane.f32.xlu0 %v3552_v52 }
 0x4ce   : > { %v5078_v18 = vpop.permute.xlu0 %2542 }
 0x4cf   : > { %v3554_v36 = vpop.eup %3553 }
 0x4d2   : > { %v5080_v1 = vpop.permute.xlu0 %2552 }
 0x4de   : > { %2058 = vadd.xlane.f32.xlu1 %v5048_v54  ;;  %v5084_v54 = vpop.permute.xlu0 %2562 }
 0x4e2   : > { %2064 = vadd.xlane.f32.xlu1 %v5050_v33  ;;  %v5088_v13 = vpop.permute.xlu0 %2572 }
 0x4e3   : > { %2612 = vperm.xlu0 %3397, %v3554_v36  }
 0x4e6   : > { %2072 = vadd.xlane.f32.xlu1 %v3540_v55  ;;  %v5094_v27 = vpop.permute.xlu0 %2582 }
 0x4e9   : > { %v1965_v10 = vpop.permute.xlu1 %1964 }
 0x4ea   : > { %v1990_v20 = vsub.f32 %v4810_v22, %v1965_v10  ;;  %2068 = vadd.xlane.f32.xlu1 %v3538_v11  ;;  %v2032_v10 = vld [vmem:[#allocation3 + $0xb0] sm:$0xff] }
 0x4ec   : > { %v2019_v53 = vmul.f32 1.442695, %v1990_v20 }
 0x4ed   : > { %v1975_v26 = vpop.permute.xlu1 %1974 }
 0x4ee   : > { %3555 = vpow2.f32 %v2019_v53  ;;  %v1992_v58 = vsub.f32 %v4804_v60, %v1975_v26  ;;  %2080 = vadd.xlane.f32.xlu1 %v3548_v41  ;;  %v2044_v41 = vmul.f32 %v5007_v43, %v2028_v38  ;;  %v2048_v43 = vmul.f32 %v5016_v14, %v2032_v10  ;;  %v2034_v14 = vld [vmem:[#allocation3 + $0xc0] sm:$0xff] }
 0x4f0   : > { %v2023_v5 = vmul.f32 1.442695, %v1992_v58  ;;  %v2030_v58 = vld [vmem:[#allocation3 + $0xa0] sm:$0xff] }
 0x4f1   : > { %v1478_v33 = vpop.permute.xlu1 %1477 }
 0x4f2   : > { %3557 = vpow2.f32 %v2023_v5  ;;  %v1507_v48 = vmul.f32 %v4664_v28, %v1478_v33  ;;  %2076 = vadd.xlane.f32.xlu1 %v3546_v40  ;;  %v2046_v33 = vmul.f32 %v5013_v50, %v2030_v58 }
 0x4f4   : > { %v1523_v44 = vadd.f32 %v1507_v48, %v4702_v24  ;;  %v5096_v24 = vpop.permute.xlu0 %2592 }
 0x4f5   : > { %v1488_v61 = vpop.permute.xlu1 %1487 }
 0x4f6   : > { %1539 = vst.msk [vmem:[#allocation4 + $0x60] sm:$0xff] %vm779_vm0, %v1523_v44  ;;  %v1509_v22 = vmul.f32 %v4664_v28, %v1488_v61  ;;  %v2036_v44 = vld [vmem:[#allocation3 + $0xd0] sm:$0xff] }
 0x4f8   : > { %v1525_v60 = vadd.f32 %v4700_v39, %v1509_v22  ;;  %v5098_v23 = vpop.permute.xlu0 %2602  ;;  %v2052_v22 = vmul.f32 %v5041_v62, %v2036_v44  ;;  %v2033_v44 = vld [vmem:[#allocation3 + $0xb8] sm:$0xff] }
 0x4f9   : > { %v5100_v47 = vpop.permute.xlu1 %2282 }
 0x4fa   : > { %1541 = vst.msk [vmem:[#allocation4 + $0x70] sm:$0xff] %vm779_vm0, %v1525_v60 }
 0x4fb   : > { %v3556_v9 = vpop.eup %3555 }
 0x4fc   : > { %v2128_v11 = vpack.c.bf16 %v3556_v9, %v3552_v52  ;;  %v5102_v28 = vpop.permute.xlu0 %2312 }
 0x4fd   : > { %v5104_v39 = vpop.permute.xlu1 %2287 }
 0x4fe   : > { %3284 = vmatprep.mubr.bf16.mxu0 %v2128_v11 }
 0x4ff   : > { %v3558_v46 = vpop.eup %3557 }
 0x500   : > { %2088 = vadd.xlane.f32.xlu1 %v3558_v46  ;;  %v2129_v55 = vpack.c.bf16 %v3558_v46, %v3550_v51  ;;  %v5106_v2 = vpop.permute.xlu0 %2302  ;;  %v2050_v46 = vmul.f32 %v5045_v21, %v2034_v14  ;;  %v2031_v14 = vld [vmem:[#allocation3 + $0xa8] sm:$0xff] }
 0x501   : > { %v5108_v35 = vpop.permute.xlu1 %2297 }
 0x502   : > { %3285 = vmatmul.mubr.bf16.gmra.mxu0 %v2129_v55 }
 0x504   : > { %2084 = vadd.xlane.f32.xlu1 %v3556_v9  ;;  %v5110_v17 = vpop.permute.xlu0 %2332 }
 0x505   : > { %v5112_v12 = vpop.permute.xlu1 %2307 }
 0x508   : > { %v5114_v37 = vpop.permute.xlu0 %2322 }
 0x509   : > { %v5116_v32 = vpop.permute.xlu1 %2537 }
 0x50c   : > { %v5118_v16 = vpop.permute.xlu0 %2352 }
 0x50d   : > { %v5120_v15 = vpop.permute.xlu1 %2547 }
 0x510   : > { %v5122_v40 = vpop.permute.xlu0 %2342 }
 0x511   : > { %v5124_v45 = vpop.permute.xlu1 %2557 }
 0x515   : > { %v5127_v49 = vpop.permute.xlu1 %2567 }
 0x519   : > { %v5130_v51 = vpop.permute.xlu1 %2577 }
 0x51d   : > { %v5135_v53 = vpop.permute.xlu1 %2587 }
 0x521   : > { %v5139_v61 = vpop.permute.xlu1 %2597 }
 0x525   : > { %v5145_v55 = vpop.permute.xlu1 %2607 }
 0x530   : > { %v2063_v7 = vpop.xlane.xlu0 %2062 }
 0x531   : > { %v2092_v59 = vadd.f32 %v2063_v7, %v2044_v41  ;;  %v2040_v41 = vld [vmem:[#allocation3 + $0xf0] sm:$0xff]  ;;  %v5148_v7 = vpop.permute.xlu1 %2327 }
 0x532   : > { %v2056_v62 = vmul.f32 %v5054_v3, %v2040_v41 }
 0x533   : > { %2108 = vst.msk [vmem:[#allocation3 + $0x90] sm:$0xff] %vm564_vm1, %v2092_v59 }
 0x535   : > { %v5153_v21 = vpop.permute.xlu1 %2317 }
 0x53a   : > { %v2634_v52 = vld [vmem:[#allocation3 + $0x90] sm:$0xff]  ;;  %v2061_v36 = vpop.xlane.xlu0 %2060 }
 0x53b   : > { %3559 = vrcp.f32 %v2634_v52  ;;  %v2091_v20 = vadd.f32 %v2061_v36, %v2043_v56  ;;  %v2054_v56 = vmul.f32 %v5058_v19, %v2038_v34 }
 0x53d   : > { %2107 = vst.msk [vmem:[#allocation3 + $0x88] sm:$0xff] %vm564_vm1, %v2091_v20  ;;  %v5156_v20 = vpop.permute.xlu1 %2347 }
 0x53e   : > { %v2071_v26 = vpop.xlane.xlu0 %2070 }
 0x53f   : > { %v2096_v5 = vadd.f32 %v2071_v26, %v2048_v43  ;;  %v2026_v26 = vld [vmem:[#allocation3 + $0x80] sm:$0xff] }
 0x540   : > { %v2042_v3 = vmul.f32 %v4959_v8, %v2026_v26  ;;  %v2047_v8 = vmul.f32 %v4984_v4, %v2031_v14 }
 0x541   : > { %2112 = vst.msk [vmem:[#allocation3 + $0xb0] sm:$0xff] %vm564_vm1, %v2096_v5  ;;  %v5158_v43 = vpop.permute.xlu1 %2337  ;;  %v2029_v5 = vld [vmem:[#allocation3 + $0x98] sm:$0xff] }
 0x542   : > { %v2067_v48 = vpop.xlane.xlu0 %2066  ;;  %v2045_v19 = vmul.f32 %v4962_v29, %v2029_v5 }
 0x543   : > { %v2094_v6 = vadd.f32 %v2067_v48, %v2046_v33 }
 0x545   : > { %2110 = vst.msk [vmem:[#allocation3 + $0xa0] sm:$0xff] %vm564_vm1, %v2094_v6 }
 0x546   : > { %v2079_v60 = vpop.xlane.xlu0 %2078 }
 0x547   : > { %v2100_v11 = vadd.f32 %v2079_v60, %v2052_v22  ;;  %v2049_v22 = vmul.f32 %v4977_v63, %v2033_v44 }
 0x548   : > { %v3560_v9 = vpop.eup %3559 }
 0x549   : > { %2676 = vperm.xlu1 %3398, %v3560_v9   ;;  %2116 = vst.msk [vmem:[#allocation3 + $0xd0] sm:$0xff] %vm564_vm1, %v2100_v11 }
 0x54a   : > { %v2075_v50 = vpop.xlane.xlu0 %2074 }
 0x54b   : > { %v2098_v38 = vadd.f32 %v2075_v50, %v2050_v46  ;;  %v2638_v46 = vld [vmem:[#allocation3 + $0xb0] sm:$0xff] }
 0x54d   : > { %2114 = vst.msk [vmem:[#allocation3 + $0xc0] sm:$0xff] %vm564_vm1, %v2098_v38  ;;  %v2037_v38 = vld [vmem:[#allocation3 + $0xd8] sm:$0xff] }
 0x54e   : > { %v2053_v63 = vmul.f32 %v4990_v42, %v2037_v38 }
 0x552   : > { %v2087_v59 = vpop.xlane.xlu0 %2086 }
 0x553   : > { %v2104_v52 = vadd.f32 %v2087_v59, %v2056_v62  ;;  %v2633_v62 = vld [vmem:[#allocation3 + $0x88] sm:$0xff]  ;;  %v2636_v59 = vld [vmem:[#allocation3 + $0xa0] sm:$0xff] }
 0x555   : > { %2120 = vst.msk [vmem:[#allocation3 + $0xf0] sm:$0xff] %vm564_vm1, %v2104_v52  ;;  %v2035_v52 = vld [vmem:[#allocation3 + $0xc8] sm:$0xff] }
 0x556   : > { %v2083_v36 = vpop.xlane.xlu0 %2082  ;;  %v2051_v4 = vmul.f32 %v4997_v57, %v2035_v52  ;;  %v2041_v57 = vld [vmem:[#allocation3 + $0xf8] sm:$0xff] }
 0x557   : > { %v2102_v10 = vadd.f32 %v2083_v36, %v2054_v56  ;;  %v2642_v36 = vld [vmem:[#allocation3 + $0xd0] sm:$0xff] }
 0x559   : > { %2118 = vst.msk [vmem:[#allocation3 + $0xe0] sm:$0xff] %vm564_vm1, %v2102_v10 }
 0x567   : > { %v2059_v58 = vpop.xlane.xlu1 %2058 }
 0x568   : > { %v2090_v33 = vadd.f32 %v2059_v58, %v2042_v3  ;;  %v2640_v58 = vld [vmem:[#allocation3 + $0xc0] sm:$0xff] }
 0x56a   : > { %2106 = vst.msk [vmem:[#allocation3 + $0x80] sm:$0xff] %vm564_vm1, %v2090_v33 }
 0x56b   : > { %v2065_v48 = vpop.xlane.xlu1 %2064 }
 0x56c   : > { %v2093_v6 = vadd.f32 %v2065_v48, %v2045_v19 }
 0x56e   : > { %2109 = vst.msk [vmem:[#allocation3 + $0x98] sm:$0xff] %vm564_vm1, %v2093_v6 }
 0x56f   : > { %v2073_v60 = vpop.xlane.xlu1 %2072 }
 0x570   : > { %v2097_v9 = vadd.f32 %v2073_v60, %v2049_v22 }
 0x571   : > { %v2632_v11 = vld [vmem:[#allocation3 + $0x80] sm:$0xff] }
 0x572   : > { %3561 = vrcp.f32 %v2632_v11  ;;  %2113 = vst.msk [vmem:[#allocation3 + $0xb8] sm:$0xff] %vm564_vm1, %v2097_v9  ;;  %v2057_v9 = vmul.f32 %v5003_v31, %v2041_v57 }
 0x573   : > { %v2069_v50 = vpop.xlane.xlu1 %2068  ;;  %3563 = vrcp.f32 %v2638_v46  ;;  %v2039_v46 = vld [vmem:[#allocation3 + $0xe8] sm:$0xff] }
 0x574   : > { %v2095_v29 = vadd.f32 %v2069_v50, %v2047_v8 }
 0x575   : > { %v2635_v41 = vld [vmem:[#allocation3 + $0x98] sm:$0xff] }
 0x576   : > { %3565 = vrcp.f32 %v2635_v41  ;;  %2111 = vst.msk [vmem:[#allocation3 + $0xa8] sm:$0xff] %vm564_vm1, %v2095_v29  ;;  %v2055_v41 = vmul.f32 %v5009_v30, %v2039_v46 }
 0x577   : > { %v2081_v34 = vpop.xlane.xlu1 %2080  ;;  %3567 = vrcp.f32 %v2633_v62 }
 0x578   : > { %v2101_v56 = vadd.f32 %v2081_v34, %v2053_v63  ;;  %3569 = vrcp.f32 %v2636_v59  ;;  %v3274_v48 = vpop.f32.mrf.mxu0 }
 0x579   : > { %v2639_v10 = vld [vmem:[#allocation3 + $0xb8] sm:$0xff]  ;;  %3571 = vrcp.f32 %v2642_v36 }
 0x57a   : > { %2117 = vst.msk [vmem:[#allocation3 + $0xd8] sm:$0xff] %vm564_vm1, %v2101_v56  ;;  %3573 = vrcp.f32 %v2639_v10  ;;  %v2196_v60 = vpop.f32.mrf.mxu0 }
 0x57b   : > { %v2077_v26 = vpop.xlane.xlu1 %2076  ;;  %3575 = vrcp.f32 %v2640_v58 }
 0x57c   : > { %v2099_v3 = vadd.f32 %v2077_v26, %v2051_v4  ;;  %v3275_v29 = vpop.f32.mrf.mxu0 }
 0x57d   : > { %v2637_v5 = vld [vmem:[#allocation3 + $0xa8] sm:$0xff] }
 0x57e   : > { %2115 = vst.msk [vmem:[#allocation3 + $0xc8] sm:$0xff] %vm564_vm1, %v2099_v3  ;;  %3577 = vrcp.f32 %v2637_v5  ;;  %v2199_v52 = vpop.f32.mrf.mxu0  ;;  %v2644_v5 = vld [vmem:[#allocation3 + $0xe0] sm:$0xff] }
 0x57f   : > { %v3562_v42 = vpop.eup %3561 }
 0x580   : > { %2666 = vperm.xlu1 %3398, %v3562_v42   ;;  %v3564_v33 = vpop.eup %3563  ;;  %v3278_v56 = vpop.f32.mrf.mxu0 }
 0x581   : > { %v2643_v44 = vld [vmem:[#allocation3 + $0xd8] sm:$0xff] }
 0x582   : > { %3579 = vrcp.f32 %v2643_v44  ;;  %v2212_v4 = vpop.f32.mrf.mxu0 }
 0x583   : > { %v3566_v19 = vpop.eup %3565 }
 0x584   : > { %2696 = vperm.xlu1 %3398, %v3564_v33   ;;  %2681 = vperm.xlu0 %3397, %v3566_v19   ;;  %v3568_v6 = vpop.eup %3567  ;;  %v3279_v30 = vpop.f32.mrf.mxu0  ;;  %v2646_v33 = vld [vmem:[#allocation3 + $0xf0] sm:$0xff] }
 0x585   : > { %v3570_v22 = vpop.eup %3569  ;;  %v2641_v14 = vld [vmem:[#allocation3 + $0xc8] sm:$0xff] }
 0x586   : > { %v3572_v8 = vpop.eup %3571  ;;  %3581 = vrcp.f32 %v2641_v14  ;;  %v2215_v10 = vpop.f32.mrf.mxu0 }
 0x587   : > { %v3574_v38 = vpop.eup %3573  ;;  %3583 = vrcp.f32 %v2644_v5  ;;  %v2262_v5 = vld [vmem:[#allocation4 + $0x18] sm:$0xff] }
 0x588   : > { %2686 = vperm.xlu1 %3398, %v3570_v22   ;;  %2671 = vperm.xlu0 %3397, %v3568_v6   ;;  %v3576_v63 = vpop.eup %3575  ;;  %v3282_v26 = vpop.f32.mrf.mxu0  ;;  %3585 = vrcp.f32 %v2646_v33  ;;  %v2265_v33 = vld [vmem:[#allocation4 + $0x30] sm:$0xff] }
 0x589   : > { %v2089_v11 = vpop.xlane.xlu1 %2088 }
 0x58a   : > { %v2105_v50 = vadd.f32 %v2089_v11, %v2057_v9  ;;  %v2228_v3 = vpop.f32.mrf.mxu0 }
 0x58b   : > { %v3578_v34 = vpop.eup %3577 }
 0x58c   : > { %2121 = vst.msk [vmem:[#allocation3 + $0xf8] sm:$0xff] %vm564_vm1, %v2105_v50  ;;  %2716 = vperm.xlu1 %3398, %v3572_v8   ;;  %2701 = vperm.xlu0 %3397, %v3574_v38   ;;  %v3283_v58 = vpop.f32.mrf.mxu0  ;;  %v5192_v8 = vpop.permute.xlu0 %2612 }
 0x58d   : > { %v2085_v62 = vpop.xlane.xlu1 %2084 }
 0x58e   : > { %v2103_v59 = vadd.f32 %v2085_v62, %v2055_v41  ;;  %v2231_v42 = vpop.f32.mrf.mxu0 }
 0x58f   : > { %v3580_v31 = vpop.eup %3579 }
 0x590   : > { %2119 = vst.msk [vmem:[#allocation3 + $0xe8] sm:$0xff] %vm564_vm1, %v2103_v59  ;;  %2706 = vperm.xlu1 %3398, %v3576_v63   ;;  %2691 = vperm.xlu0 %3397, %v3578_v34   ;;  %vm2451_vm1 = vcmask 1048064  }
 0x593   : > { %v3582_v36 = vpop.eup %3581 }
 0x594   : > { %2391 = vrot.lane.b32.xlu1 %v3274_v48, %s3683_s12  ;;  %2721 = vperm.xlu0 %3397, %v3580_v31   ;;  %v2647_v48 = vld [vmem:[#allocation3 + $0xf8] sm:$0xff]  ;;  %v3584_v22 = vpop.eup %3583  ;;  %v2261_v31 = vld [vmem:[#allocation4 + $0x10] sm:$0xff] }
 0x595   : > { %v3586_v14 = vpop.eup %3585 }
 0x597   : > { %v2645_v19 = vld [vmem:[#allocation3 + $0xe8] sm:$0xff] }
 0x598   : > { %2387 = vrot.lane.b32.xlu1 %v2196_v60, %s3683_s12  ;;  %2711 = vperm.xlu0 %3397, %v3582_v36   ;;  %3587 = vrcp.f32 %v2645_v19  ;;  %v2358_v19 = vmul.f32 %v5074_v0, %v2262_v5 }
 0x599   : > { %3589 = vrcp.f32 %v2647_v48 }
 0x59c   : > { %2399 = vrot.lane.b32.xlu1 %v3278_v56, %s3683_s12  ;;  %2393 = vrot.lane.b32.xlu0 %v3275_v29, %s3683_s12  ;;  %v2357_v56 = vmul.f32 %v5104_v39, %v2261_v31  ;;  %v2361_v39 = vmul.f32 %v5112_v12, %v2265_v33  ;;  %v2264_v33 = vld [vmem:[#allocation4 + $0x28] sm:$0xff] }
 0x5a0   : > { %2395 = vrot.lane.b32.xlu1 %v2212_v4, %s3683_s12  ;;  %2389 = vrot.lane.b32.xlu0 %v2199_v52, %s3683_s12 }
 0x5a4   : > { %2407 = vrot.lane.b32.xlu1 %v3282_v26, %s3683_s12  ;;  %2401 = vrot.lane.b32.xlu0 %v3279_v30, %s3683_s12 }
 0x5a5   : > { %v3588_v9 = vpop.eup %3587 }
 0x5a6   : > { %v3590_v11 = vpop.eup %3589 }
 0x5a8   : > { %2403 = vrot.lane.b32.xlu1 %v2228_v3, %s3683_s12  ;;  %2397 = vrot.lane.b32.xlu0 %v2215_v10, %s3683_s12  ;;  %v2259_v10 = vld [vmem:[#allocation4] sm:$0xff] }
 0x5a9   : > { %v2355_v26 = vmul.f32 %v5072_v25, %v2259_v10  ;;  %v2263_v25 = vld [vmem:[#allocation4 + $0x20] sm:$0xff]  ;;  %v2266_v10 = vld [vmem:[#allocation4 + $0x38] sm:$0xff] }
 0x5ac   : > { %2409 = vrot.lane.b32.xlu0 %v3283_v58, %s3683_s12 }
 0x5b0   : > { %2405 = vrot.lane.b32.xlu0 %v2231_v42, %s3683_s12 }
 0x5c2   : > { %v3286_v44 = vpop.f32.mrf.mxu0 }
 0x5c3   : > { %2415 = vrot.lane.b32.xlu1 %v3286_v44, %s3683_s12 }
 0x5c4   : > { %v2244_v57 = vpop.f32.mrf.mxu0  ;;  %v2677_v46 = vpop.permute.xlu1 %2676 }
 0x5c6   : > { %v3287_v6 = vpop.f32.mrf.mxu0 }
 0x5c7   : > { %2411 = vrot.lane.b32.xlu1 %v2244_v57, %s3683_s12  ;;  %2417 = vrot.lane.b32.xlu0 %v3287_v6, %s3683_s12 }
 0x5c8   : > { %v2247_v60 = vpop.f32.mrf.mxu0 }
 0x5cb   : > { %2726 = vperm.xlu1 %3398, %v3584_v22   ;;  %2413 = vrot.lane.b32.xlu0 %v2247_v60, %s3683_s12  ;;  %v2260_v22 = vld [vmem:[#allocation4 + $0x8] sm:$0xff] }
 0x5cf   : > { %2736 = vperm.xlu1 %3398, %v3586_v14   ;;  %2731 = vperm.xlu0 %3397, %v3588_v9   ;;  %v2356_v14 = vmul.f32 %v5100_v47, %v2260_v22  ;;  %v2359_v9 = vmul.f32 %v5108_v35, %v2263_v25  ;;  %v2362_v35 = vmul.f32 %v5102_v28, %v2266_v10 }
 0x5d3   : > { %2741 = vperm.xlu0 %3397, %v3590_v11  }
 0x5fb   : > { %v2667_v50 = vpop.permute.xlu1 %2666 }
 0x5ff   : > { %v5194_v38 = vpop.permute.xlu0 %2681  ;;  %v5196_v29 = vpop.permute.xlu1 %2696 }
 0x603   : > { %v5198_v41 = vpop.permute.xlu0 %2671  ;;  %v5200_v62 = vpop.permute.xlu1 %2686 }
 0x607   : > { %v5202_v63 = vpop.permute.xlu0 %2701  ;;  %v5204_v59 = vpop.permute.xlu1 %2716 }
 0x60b   : > { %v5206_v34 = vpop.permute.xlu0 %2691  ;;  %v5208_v52 = vpop.permute.xlu1 %2706 }
 0x60f   : > { %v5211_v36 = vpop.permute.xlu0 %2721  ;;  %v2392_v4 = vpop.permute.xlu1 %2391 }
 0x610   : > { %v2437_v30 = vadd.f32 %v2392_v4, %v2357_v56 }
 0x612   : > { %2454 = vst.msk [vmem:[#allocation4 + $0x10] sm:$0xff] %vm2451_vm1, %v2437_v30 }
 0x613   : > { %v5215_v3 = vpop.permute.xlu0 %2711  ;;  %v2388_v58 = vpop.permute.xlu1 %2387 }
 0x614   : > { %v2435_v42 = vadd.f32 %v2388_v58, %v2355_v26  ;;  %v2269_v26 = vld [vmem:[#allocation4 + $0x50] sm:$0xff] }
 0x616   : > { %2452 = vst.msk [vmem:[#allocation4] sm:$0xff] %vm2451_vm1, %v2435_v42 }
 0x617   : > { %v2394_v48 = vpop.permute.xlu0 %2393  ;;  %v2400_v44 = vpop.permute.xlu1 %2399 }
 0x618   : > { %v2438_v57 = vadd.f32 %v2394_v48, %v2358_v19  ;;  %v2441_v6 = vadd.f32 %v2400_v44, %v2361_v39  ;;  %v2267_v19 = vld [vmem:[#allocation4 + $0x40] sm:$0xff] }
 0x619   : > { %v2521_v60 = vld [vmem:[#allocation4 + $0x10] sm:$0xff]  ;;  %v2363_v28 = vmul.f32 %v5153_v21, %v2267_v19  ;;  %v2270_v21 = vld [vmem:[#allocation4 + $0x58] sm:$0xff] }
 0x61a   : > { %v2617_v11 = vmul.f32 %v5120_v15, %v2521_v60  ;;  %v2746_v31 = vmul.f32 %v2677_v46, %v2521_v60  ;;  %2455 = vst.msk [vmem:[#allocation4 + $0x18] sm:$0xff] %vm2451_vm1, %v2438_v57  ;;  %2458 = vst.msk [vmem:[#allocation4 + $0x30] sm:$0xff] %vm2451_vm1, %v2441_v6  ;;  %v2365_v15 = vmul.f32 %v5148_v7, %v2269_v26 }
 0x61b   : > { %v2390_v0 = vpop.permute.xlu0 %2389  ;;  %v2396_v12 = vpop.permute.xlu1 %2395  ;;  %v2360_v57 = vmul.f32 %v5106_v2, %v2264_v33 }
 0x61c   : > { %v2763_v56 = vsel %vm779_vm0, %v2617_v11, %v2746_v31  ;;  %v2436_v4 = vadd.f32 %v2390_v0, %v2356_v14  ;;  %v2439_v30 = vadd.f32 %v2396_v12, %v2359_v9 }
 0x61d   : > { %2779 = vst [vmem:[%s5227_s25 + $0x10] sm:$0xff] %v2763_v56  ;;  %v2519_v47 = vld [vmem:[#allocation4] sm:$0xff] }
 0x61e   : > { %v2615_v46 = vmul.f32 %v5116_v32, %v2519_v47  ;;  %v2744_v58 = vmul.f32 %v2667_v50, %v2519_v47  ;;  %2453 = vst.msk [vmem:[#allocation4 + $0x8] sm:$0xff] %vm2451_vm1, %v2436_v4  ;;  %2456 = vst.msk [vmem:[#allocation4 + $0x20] sm:$0xff] %vm2451_vm1, %v2439_v30 }
 0x61f   : > { %v2402_v42 = vpop.permute.xlu0 %2401  ;;  %v2408_v5 = vpop.permute.xlu1 %2407 }
 0x620   : > { %v2761_v39 = vsel %vm779_vm0, %v2615_v46, %v2744_v58  ;;  %v2442_v48 = vadd.f32 %v2402_v42, %v2362_v35  ;;  %v2445_v44 = vadd.f32 %v2408_v5, %v2365_v15 }
 0x621   : > { %2777 = vst [vmem:[%s5227_s25] sm:$0xff] %v2761_v39  ;;  %v2522_v7 = vld [vmem:[#allocation4 + $0x18] sm:$0xff]  ;;  %v2525_v32 = vld [vmem:[#allocation4 + $0x30] sm:$0xff] }
 0x622   : > { %v2618_v50 = vmul.f32 %v5080_v1, %v2522_v7  ;;  %v2747_v6 = vmul.f32 %v5194_v38, %v2522_v7  ;;  %v2621_v22 = vmul.f32 %v5127_v49, %v2525_v32  ;;  %v2750_v25 = vmul.f32 %v5196_v29, %v2525_v32  ;;  %2459 = vst.msk [vmem:[#allocation4 + $0x38] sm:$0xff] %vm2451_vm1, %v2442_v48 }
 0x623   : > { %2462 = vst.msk [vmem:[#allocation4 + $0x50] sm:$0xff] %vm2451_vm1, %v2445_v44  ;;  %v2398_v2 = vpop.permute.xlu0 %2397  ;;  %v2404_v60 = vpop.permute.xlu1 %2403  ;;  %v2366_v1 = vmul.f32 %v5110_v17, %v2270_v21  ;;  %v2268_v17 = vld [vmem:[#allocation4 + $0x48] sm:$0xff] }
 0x624   : > { %v2764_v14 = vsel %vm779_vm0, %v2618_v50, %v2747_v6  ;;  %v2767_v9 = vsel %vm779_vm0, %v2621_v22, %v2750_v25  ;;  %v2440_v11 = vadd.f32 %v2398_v2, %v2360_v57  ;;  %v2443_v31 = vadd.f32 %v2404_v60, %v2363_v28  ;;  %v2274_v6 = vld [vmem:[#allocation4 + $0x78] sm:$0xff]  ;;  %v2271_v22 = vld [vmem:[#allocation4 + $0x60] sm:$0xff] }
 0x625   : > { %2780 = vst [vmem:[%s5227_s25 + $0x18] sm:$0xff] %v2764_v14  ;;  %2783 = vst [vmem:[%s5227_s25 + $0x30] sm:$0xff] %v2767_v9  ;;  %v2520_v49 = vld [vmem:[#allocation4 + $0x8] sm:$0xff]  ;;  %v2523_v38 = vld [vmem:[#allocation4 + $0x20] sm:$0xff] }
 0x626   : > { %v2616_v29 = vmul.f32 %v5078_v18, %v2520_v49  ;;  %v2745_v0 = vmul.f32 %v5198_v41, %v2520_v49  ;;  %v2619_v12 = vmul.f32 %v5124_v45, %v2523_v38  ;;  %v2748_v56 = vmul.f32 %v5200_v62, %v2523_v38  ;;  %2457 = vst.msk [vmem:[#allocation4 + $0x28] sm:$0xff] %vm2451_vm1, %v2440_v11 }
 0x627   : > { %2460 = vst.msk [vmem:[#allocation4 + $0x40] sm:$0xff] %vm2451_vm1, %v2443_v31  ;;  %v2410_v4 = vpop.permute.xlu0 %2409  ;;  %v2364_v18 = vmul.f32 %v5114_v37, %v2268_v17 }
 0x628   : > { %v2762_v30 = vsel %vm779_vm0, %v2616_v29, %v2745_v0  ;;  %v2765_v10 = vsel %vm779_vm0, %v2619_v12, %v2748_v56  ;;  %v2446_v26 = vadd.f32 %v2410_v4, %v2366_v1 }
 0x629   : > { %2778 = vst [vmem:[%s5227_s25 + $0x8] sm:$0xff] %v2762_v30  ;;  %2781 = vst [vmem:[%s5227_s25 + $0x20] sm:$0xff] %v2765_v10  ;;  %v2526_v45 = vld [vmem:[#allocation4 + $0x38] sm:$0xff] }
 0x62a   : > { %v2529_v41 = vld [vmem:[#allocation4 + $0x50] sm:$0xff]  ;;  %v2622_v62 = vmul.f32 %v5088_v13, %v2526_v45  ;;  %v2751_v47 = vmul.f32 %v5202_v63, %v2526_v45  ;;  %2463 = vst.msk [vmem:[#allocation4 + $0x58] sm:$0xff] %vm2451_vm1, %v2446_v26 }
 0x62b   : > { %v2625_v35 = vmul.f32 %v5135_v53, %v2529_v41  ;;  %v2754_v15 = vmul.f32 %v5204_v59, %v2529_v41  ;;  %v2406_v46 = vpop.permute.xlu0 %2405 }
 0x62c   : > { %v2768_v58 = vsel %vm779_vm0, %v2622_v62, %v2751_v47  ;;  %v2444_v42 = vadd.f32 %v2406_v46, %v2364_v18  ;;  %v2871_v41 = vld [vmem:[%s5227_s25 + $0x18] sm:$0xff] (%p3817_p13) }
 0x62d   : > { %v2771_v37 = vsel %vm779_vm0, %v2625_v35, %v2754_v15  ;;  %2784 = vst [vmem:[%s5227_s25 + $0x38] sm:$0xff] %v2768_v58  ;;  %v2524_v5 = vld [vmem:[#allocation4 + $0x28] sm:$0xff]  ;;  %v2877_v35 = vld [vmem:[%s5227_s25 + $0x30] sm:$0xff] (%p3817_p13)  ;;  %2872 = vst [vmem:[%s2806_s30 + $0x30] sm:$0xff] (%p3817_p13), %v2871_v41 }
 0x62e   : > { %2787 = vst [vmem:[%s5227_s25 + $0x50] sm:$0xff] %v2771_v37  ;;  %v2527_v13 = vld [vmem:[#allocation4 + $0x40] sm:$0xff]  ;;  %v2620_v63 = vmul.f32 %v5084_v54, %v2524_v5  ;;  %v2749_v53 = vmul.f32 %v5206_v34, %v2524_v5  ;;  %2461 = vst.msk [vmem:[#allocation4 + $0x48] sm:$0xff] %vm2451_vm1, %v2444_v42  ;;  %v2273_v54 = vld [vmem:[#allocation4 + $0x70] sm:$0xff] }
 0x62f   : > { %v2623_v59 = vmul.f32 %v5130_v51, %v2527_v13  ;;  %v2752_v33 = vmul.f32 %v5208_v52, %v2527_v13  ;;  %v2369_v34 = vmul.f32 %v5156_v20, %v2273_v54  ;;  %2878 = vst [vmem:[%s2806_s30 + $0x60] sm:$0xff] (%p3817_p13), %v2877_v35 }
 0x630   : > { %v2766_v19 = vsel %vm779_vm0, %v2620_v63, %v2749_v53  ;;  %v2873_v62 = vld [vmem:[%s5227_s25 + $0x20] sm:$0xff] (%p3817_p13) }
 0x631   : > { %v2769_v39 = vsel %vm779_vm0, %v2623_v59, %v2752_v33  ;;  %2782 = vst [vmem:[%s5227_s25 + $0x28] sm:$0xff] %v2766_v19  ;;  %v2530_v48 = vld [vmem:[#allocation4 + $0x58] sm:$0xff]  ;;  %2874 = vst [vmem:[%s2806_s30 + $0x40] sm:$0xff] (%p3817_p13), %v2873_v62 }
 0x632   : > { %2785 = vst [vmem:[%s5227_s25 + $0x40] sm:$0xff] %v2769_v39  ;;  %v2626_v44 = vmul.f32 %v5096_v24, %v2530_v48  ;;  %v2755_v57 = vmul.f32 %v5211_v36, %v2530_v48  ;;  %v2370_v24 = vmul.f32 %v5118_v16, %v2274_v6  ;;  %v2367_v36 = vmul.f32 %v5158_v43, %v2271_v22 }
 0x634   : > { %v2772_v51 = vsel %vm779_vm0, %v2626_v44, %v2755_v57  ;;  %v2879_v15 = vld [vmem:[%s5227_s25 + $0x38] sm:$0xff] (%p3817_p13) }
 0x635   : > { %2788 = vst [vmem:[%s5227_s25 + $0x58] sm:$0xff] %v2772_v51  ;;  %v2528_v52 = vld [vmem:[#allocation4 + $0x48] sm:$0xff]  ;;  %v2416_v28 = vpop.permute.xlu1 %2415  ;;  %v2885_v37 = vld [vmem:[%s5227_s25 + $0x50] sm:$0xff] (%p3817_p13)  ;;  %2880 = vst [vmem:[%s2806_s30 + $0x70] sm:$0xff] (%p3817_p13), %v2879_v15 }
 0x636   : > { %v2624_v7 = vmul.f32 %v5094_v27, %v2528_v52  ;;  %v2753_v32 = vmul.f32 %v5215_v3, %v2528_v52  ;;  %v2449_v50 = vadd.f32 %v2416_v28, %v2369_v34  ;;  %v2272_v27 = vld [vmem:[#allocation4 + $0x68] sm:$0xff]  ;;  %2886 = vst [vmem:[%s2806_s30 + $0xa0] sm:$0xff] (%p3817_p13), %v2885_v37 }
 0x637   : > { %v2368_v3 = vmul.f32 %v5122_v40, %v2272_v27 }
 0x638   : > { %v2770_v25 = vsel %vm779_vm0, %v2624_v7, %v2753_v32  ;;  %2466 = vst.msk [vmem:[#allocation4 + $0x70] sm:$0xff] %vm2451_vm1, %v2449_v50  ;;  %v2875_v47 = vld [vmem:[%s5227_s25 + $0x28] sm:$0xff] (%p3817_p13) }
 0x639   : > { %2786 = vst [vmem:[%s5227_s25 + $0x48] sm:$0xff] %v2770_v25  ;;  %v2418_v20 = vpop.permute.xlu0 %2417  ;;  %v2412_v2 = vpop.permute.xlu1 %2411  ;;  %v2881_v46 = vld [vmem:[%s5227_s25 + $0x40] sm:$0xff] (%p3817_p13)  ;;  %2876 = vst [vmem:[%s2806_s30 + $0x50] sm:$0xff] (%p3817_p13), %v2875_v47 }
 0x63a   : > { %v2450_v60 = vadd.f32 %v2418_v20, %v2370_v24  ;;  %v2447_v21 = vadd.f32 %v2412_v2, %v2367_v36  ;;  %2882 = vst [vmem:[%s2806_s30 + $0x80] sm:$0xff] (%p3817_p13), %v2881_v46 }
 0x63c   : > { %2467 = vst.msk [vmem:[#allocation4 + $0x78] sm:$0xff] %vm2451_vm1, %v2450_v60  ;;  %2464 = vst.msk [vmem:[#allocation4 + $0x60] sm:$0xff] %vm2451_vm1, %v2447_v21  ;;  %v2887_v42 = vld [vmem:[%s5227_s25 + $0x58] sm:$0xff] (%p3817_p13) }
 0x63d   : > { %v2414_v16 = vpop.permute.xlu0 %2413  ;;  %2888 = vst [vmem:[%s2806_s30 + $0xb0] sm:$0xff] (%p3817_p13), %v2887_v42 }
 0x63e   : > { %v2448_v14 = vadd.f32 %v2414_v16, %v2368_v3 }
 0x63f   : > { %v2533_v49 = vld [vmem:[#allocation4 + $0x70] sm:$0xff] }
 0x640   : > { %2465 = vst.msk [vmem:[#allocation4 + $0x68] sm:$0xff] %vm2451_vm1, %v2448_v14  ;;  %v2629_v56 = vmul.f32 %v5145_v55, %v2533_v49  ;;  %v2867_v55 = vld [vmem:[%s5227_s25 + $0x8] sm:$0xff] (%p3817_p13) }
 0x641   : > { %v2883_v58 = vld [vmem:[%s5227_s25 + $0x48] sm:$0xff] (%p3817_p13)  ;;  %2868 = vst [vmem:[%s2806_s30 + $0x10] sm:$0xff] (%p3817_p13), %v2867_v55 }
 0x642   : > { %2884 = vst [vmem:[%s2806_s30 + $0x90] sm:$0xff] (%p3817_p13), %v2883_v58 }
 0x643   : > { %v2531_v43 = vld [vmem:[#allocation4 + $0x60] sm:$0xff]  ;;  %v2534_v17 = vld [vmem:[#allocation4 + $0x78] sm:$0xff] }
 0x644   : > { %v2627_v11 = vmul.f32 %v5139_v61, %v2531_v43  ;;  %v2630_v26 = vmul.f32 %v5192_v8, %v2534_v17  ;;  %v2869_v8 = vld [vmem:[%s5227_s25 + $0x10] sm:$0xff] (%p3817_p13) }
 0x645   : > { %2870 = vst [vmem:[%s2806_s30 + $0x20] sm:$0xff] (%p3817_p13), %v2869_v8 }
 0x646   : > { %v2727_v9 = vpop.permute.xlu1 %2726 }
 0x647   : > { %v2756_v31 = vmul.f32 %v2727_v9, %v2531_v43  ;;  %v2532_v1 = vld [vmem:[#allocation4 + $0x68] sm:$0xff] }
 0x648   : > { %v2628_v0 = vmul.f32 %v5098_v23, %v2532_v1  ;;  %v2865_v23 = vld [vmem:[%s5227_s25] sm:$0xff] (%p3817_p13) }
 0x649   : > { %v2773_v38 = vsel %vm779_vm0, %v2627_v11, %v2756_v31  ;;  %2866 = vst [vmem:[%s2806_s30] sm:$0xff] (%p3817_p13), %v2865_v23 }
 0x64a   : > { %2789 = vst [vmem:[%s5227_s25 + $0x60] sm:$0xff] %v2773_v38  ;;  %v2732_v40 = vpop.permute.xlu0 %2731  ;;  %v2737_v29 = vpop.permute.xlu1 %2736 }
 0x64b   : > { %v2757_v12 = vmul.f32 %v2732_v40, %v2532_v1  ;;  %v2758_v4 = vmul.f32 %v2737_v29, %v2533_v49 }
 0x64d   : > { %v2774_v30 = vsel %vm779_vm0, %v2628_v0, %v2757_v12  ;;  %v2775_v61 = vsel %vm779_vm0, %v2629_v56, %v2758_v4 }
 0x64e   : > { %2790 = vst [vmem:[%s5227_s25 + $0x68] sm:$0xff] %v2774_v30  ;;  %2791 = vst [vmem:[%s5227_s25 + $0x70] sm:$0xff] %v2775_v61  ;;  %v2742_v10 = vpop.permute.xlu0 %2741  ;;  %2799 = sbr.rel (!%p3817_p13) target bundleno = 1627 (0x65b), region = 162 }
 0x64f   : > { %v2759_v18 = vmul.f32 %v2742_v10, %v2534_v17 }
 0x651   : > { %v2776_v45 = vsel %vm779_vm0, %v2630_v26, %v2759_v18  ;;  %v2889_v5 = vld [vmem:[%s5227_s25 + $0x60] sm:$0xff] (%p3817_p13) }
 0x652   : > { %2792 = vst [vmem:[%s5227_s25 + $0x78] sm:$0xff] %v2776_v45  ;;  %2890 = vst [vmem:[%s2806_s30 + $0xc0] sm:$0xff] (%p3817_p13), %v2889_v5 }
 0x655   : > { %v2891_v13 = vld [vmem:[%s5227_s25 + $0x68] sm:$0xff]  ;;  %v2893_v63 = vld [vmem:[%s5227_s25 + $0x70] sm:$0xff] }
 0x656   : > { %2892 = vst [vmem:[%s2806_s30 + $0xd0] sm:$0xff] %v2891_v13  ;;  %2894 = vst [vmem:[%s2806_s30 + $0xe0] sm:$0xff] %v2893_v63 }
 0x659   : > { %v2895_v53 = vld [vmem:[%s5227_s25 + $0x78] sm:$0xff] }
 0x65a   : > { %2896 = vst [vmem:[%s2806_s30 + $0xf0] sm:$0xff] %v2895_v53 }
 0x65b PF: > { %s13_s22 = sadd.s32 1, %s3678_s22   ;;  %s5471_s9 = sld [smem:[#allocation9_spill]] }
 0x65c   : > { %p10_p4 = scmp.ge.s32.totalorder %s13_s22, 6   ;;  %s5472_s12 = smov %s3642_s13 }
 0x65d   : > { %s5473_s13 = smov %s3822_s26  ;;  %s5474_s14 = smov %s3650_s15 }
 0x65e   : > { %s5475_s15 = smov %s3800_s28  ;;  %s5476_s16 = smov %s3658_s17 }
 0x65f   : > { %s5477_s17 = smov %s3797_s11  ;;  %s5478_s18 = smov %s3670_s20 }
 0x660   : > { %s5479_s19 = smov %s3674_s21  ;;  %s5480_s20 = smov %s5483_s24 }
 0x661   : > { %s5481_s21 = smov %s5471_s9  ;;  %12 = sbr.rel (!%p10_p4) target bundleno = 8 (0x8), region = 250 }

// kernel: causal_self_attention.3
= control target key start
LH: loop header
LB: loop body
LE: loop exit
PB: predicated region body
PF: predicated region fallthrough
CT: control target
= control target key end

     0   :  { %s2942_s0 = inlined_call_operand.hbm [shape: f32[256,256], index: 0, kind: input, shape index: {}]   ;;  %s2943_s1 = inlined_call_operand.hbm [shape: f32[256,768], index: 1, kind: input, shape index: {}]   ;;  %s2944_s2 = inlined_call_operand.hbm [shape: f32[1,768], index: 2, kind: input, shape index: {}]   ;;  %s2945_s3 = inlined_call_operand.vmem [shape: f32[256,768], index: 3, kind: output, shape index: {}]  }
   0x1   :  { %2948 = sst [smem:[#allocation12_spill]] %s2943_s1 }
   0x2   :  { %8 = vsyncpa [#allocation4], 0 }
   0x3   :  { %9 = vsyncpa [#allocation6], 0 }
   0x4   :  { %11 = vsyncpa [#allocation6 + $0x1], 0  ;;  %s2281_s12 = smov 0   ;;  %s2283_s13 = smov 0  }
   0x5   :  { %s2285_s14 = smov 0   ;;  %s2287_s15 = smov 0  }
   0x6   :  { %s2289_s16 = smov 0   ;;  %s2291_s17 = smov 0  }
   0x7 LB: > { %s32_s18 = sadd.s32 1, %s2247_s16  ;;  %s73_s19 = sadd.s32 1, %s2239_s14  ;;  %s2251_s17 = sphi %s2291_s17, %s17_s17   ;;  %s2247_s16 = sphi %s2289_s16, %s2963_s16   ;;  %s2243_s15 = sphi %s2287_s15, %s2962_s15   ;;  %s2239_s14 = sphi %s2285_s14, %s2961_s14   ;;  %s2235_s13 = sphi %s2283_s13, %s2960_s13   ;;  %s2231_s12 = sphi %s2281_s12, %s2959_s12  }
   0x8   : > { %p34_p0 = scmp.ge.s32.totalorder %s32_s18, 2  ;;  %p80_p1 = scmp.ne.s32.totalorder %s2239_s14, %s2235_s13 }
   0x9   : > { %p81_p2 = scmp.eq.s32.totalorder %s2251_s17, 0  ;;  %p2059_p4 = scmp.lt.s32.totalorder %s2251_s17, 2 }
   0xa   : > { %s2965_s18 = smov (%p34_p0, %s32_s18), 0  ;;  %s183_s21 = sand.u32 1, %s2251_s17  }
   0xb   : > { %2949 = sst [smem:[#allocation11_spill]] %s2965_s18  ;;  %p82_p3 = por %p81_p2, %p80_p1 }
   0xc   : > { %s69_s20 = ssub.s32 %s2247_s16, %s2965_s18  ;;  %s185_s22 = sand.u32 1, %s2239_s14  }
   0xd   : > { %p71_p5 = scmp.eq.s32.totalorder %s69_s20, 0  ;;  %s1920_s23 = smul.u32 384, %s2247_s16 }
   0xe   : > { %s2035_s25 = smul.u32 768, %s185_s22  ;;  %s2950_s1 = sld [smem:[#allocation12_spill]] }
   0xf   : > { %s2328_s24 = scalar_select %p71_p5, %s2239_s14, %s73_s19  }
  0x10   : > { %p2335_p6 = pnand %p2059_p4, %p82_p3  ;;  %s187_s30 = scalar_lea.vmem [#allocation5], %s2035_s25 }
  0x11   : > { %s197_s4 = sshll.u32 %s187_s30, 4  ;;  %s2339_s5 = scalar_lea.sflag [#allocation6], %s183_s21  ;;  %s198_s4 = int_to_ptr.vmem [resolvable:$true] %s197_s4 }
  0x12   : > { %p2946_p7 = pneg %p2335_p6  ;;  %s2128_s6 = scalar_lea.vmem %s198_s4, 12288 }
  0x13   : > { %p2129_p8 = scmp.ne.s32.totalorder %s198_s4, %s2128_s6  ;;  %s2253_s7 = smov [#allocation5]  }
  0x14   : > { %s196_s28 = scalar_lea.hbm %s2950_s1, %s1920_s23  ;;  %s2133_s8 = sshll.u32 %s2253_s7, 4  ;;  %s2134_s8 = int_to_ptr.vmem [resolvable:$false] %s2133_s8 }
  0x15   : > { %p2131_p9 = pnand %p2129_p8, %p2946_p7  ;;  %s2135_s9 = scalar_lea.vmem %s2134_s8, 24576 }
  0x16   : > { %p2136_p11 = scmp.lt.s32.totalorder %s198_s4, %s2134_s8  ;;  %p2137_p12 = scmp.lt.s32.totalorder %s2135_s9, %s2128_s6 }
  0x17   : > { %p2132_p10 = pneg %p2131_p9 }
  0x18   : > { %p2138_p13 = por %p2137_p12, %p2136_p11 }
  0x1a   : > { %p2139_p0 = pnand %p2138_p13, %p2132_p10 }
  0x1c   : > { %2142 = shalt.err (!%p2139_p0)
}
  0x1d   : > { %s2254_s10 = smov 768   ;;  %s2255_s11 = smov 384  }
  0x1e   : > { %s2256_s19 = smov 24   ;;  %s2350_s20 = sadd.s32 4294967295, %s2251_s17  }
  0x1f   : > { %2054 = dma.hbm_to_vmem [thread:$0]  (!%p2335_p6), %s196_s28, 12288, %s198_s4, %s2339_s5, %s2254_s10, %s2255_s11, %s2256_s19  }
  0x20   : > { %p86_p2 = scmp.ne.s32.totalorder %s2235_s13, %s2231_s12  ;;  %p87_p3 = scmp.eq.s32.totalorder %s2350_s20, 0 }
  0x21   : > { %p138_p4 = scmp.eq.s32.totalorder %s2350_s20, 1  ;;  %p1910_p5 = scmp.ge.s32.totalorder %s2251_s17, 1 }
  0x22   : > { %p151_p8 = scmp.lt.s32.totalorder %s2251_s17, 3  ;;  %p2360_p9 = por %p87_p3, %p86_p2 }
  0x23   : > { %p2367_p10 = por %p138_p4, %p80_p1  ;;  %s2257_s12 = smov [#allocation3]  }
  0x24   : > { %p2371_p11 = pnand %p1910_p5, %p151_p8  ;;  %s169_s26 = sshll.u32 %s2257_s12, 4  ;;  %s170_s26 = int_to_ptr.vmem [resolvable:$true] %s169_s26 }
  0x25   : > { %s2953_s23 = scalar_select %p2367_p10, 1, 0 }
  0x26   : > { %p2047_p12 = pneg %p2371_p11  ;;  %s2036_s28 = smul.u32 3, %s185_s22 }
  0x27   : > { %s1921_s30 = smul.u32 48, %s2247_s16  ;;  %s2154_s4 = scalar_lea.vmem %s170_s26, 8192 }
  0x28   : > { %p2379_p13 = pnand %p2047_p12, %p87_p3  ;;  %p2155_p0 = scmp.ne.s32.totalorder %s170_s26, %s2154_s4 }
  0x29   : > { %p2162_p5 = scmp.lt.s32.totalorder %s170_s26, %s170_s26  ;;  %p2163_p8 = scmp.lt.s32.totalorder %s2154_s4, %s2154_s4 }
  0x2a   : > { %p2145_p1 = pneg %p2379_p13 }
  0x2b   : > { %p2164_p7 = por %p2163_p8, %p2162_p5 }
  0x2c   : > { %p2157_p2 = pnand %p2155_p0, %p2145_p1 }
  0x2e   : > { %p2158_p4 = pneg %p2157_p2 }
  0x30   : > { %p2165_p10 = pnand %p2164_p7, %p2158_p4 }
  0x32   : > { %2168 = shalt.err (!%p2165_p10)
}
  0x33   : > { %s2258_s6 = smov 256   ;;  %s2259_s7 = smov 16  }
  0x34   : > { %2050 = dma.hbm_to_vmem [thread:$0]  (!%p2379_p13), %s2942_s0, 8192, %s170_s26, [#allocation4], %s2258_s6, %s2258_s6, %s2259_s7  }
  0x35   : > { %s217_s11 = scalar_lea.hbm %s2944_s2, %s1921_s30  ;;  %s211_s19 = scalar_lea.vmem [#allocation7], %s2036_s28 }
  0x36   : > { %s219_s12 = sshll.u32 %s211_s19, 4  ;;  %p2956_p7 = pneg %p2335_p6  ;;  %s220_s12 = int_to_ptr.vmem [resolvable:$true] %s219_s12 }
  0x37   : > { %s2182_s4 = scalar_lea.vmem %s220_s12, 48  ;;  %s2260_s1 = smov [#allocation7]  }
  0x38   : > { %p2183_p12 = scmp.ne.s32.totalorder %s220_s12, %s2182_s4  ;;  %s2187_s18 = sshll.u32 %s2260_s1, 4  ;;  %s2188_s18 = int_to_ptr.vmem [resolvable:$false] %s2187_s18 }
  0x39   : > { %s2189_s27 = scalar_lea.vmem %s2188_s18, 96  ;;  %p2190_p0 = scmp.lt.s32.totalorder %s220_s12, %s2188_s18 }
  0x3a   : > { %p2185_p10 = pnand %p2183_p12, %p2956_p7  ;;  %p2191_p2 = scmp.lt.s32.totalorder %s2189_s27, %s2182_s4 }
  0x3c   : > { %p2186_p1 = pneg %p2185_p10  ;;  %p2192_p13 = por %p2191_p2, %p2190_p0 }
  0x3e   : > { %p2193_p4 = pnand %p2192_p13, %p2186_p1 }
  0x40   : > { %2196 = shalt.err (!%p2193_p4)
}
  0x41   : > { %2057 = dma.hbm_to_vmem [thread:$0]  (!%p2335_p6), %s217_s11, 48, %s220_s12, %s2339_s5  }
  0x42   : > { %228 = sbr.rel (%p2371_p11) target bundleno = 485 (0x1e5), region = 32 }
  0x47   : > { %2222 = dma.done.wait (%p87_p3), [#allocation4], 8192  }
  0x48   : > { %2224 = vsyncadd (%p87_p3), [#allocation4], 4294959104  ;;  %s234_s1 = sand.u32 1, %s2350_s20   ;;  %s236_s18 = sand.u32 1, %s2235_s13  }
  0x49   : > { %s2412_s26 = smul.u32 768, %s236_s18  ;;  %s235_s29 = scalar_lea.sflag [#allocation6], %s234_s1 }
  0x4b   : > { %s2415_s5 = scalar_lea.vmem [#allocation5], %s2412_s26 }
  0x4c   : > { %2226 = dma.done.wait (%p2360_p9), %s235_s29, 12336  }
  0x4d   : > { %2228 = vsyncadd (%p2360_p9), %s235_s29, 4294954960  ;;  %v617_v0 = vld [vmem:[%s2415_s5 + $0x158] sm:$0xff]  ;;  %v620_v1 = vld [vmem:[%s2415_s5 + $0x170] sm:$0xff]  ;;  %s2038_s20 = smul.u32 3, %s236_s18  ;;  %s2527_s25 = scalar_lea.vmem [#allocation8], %s2412_s26 }
  0x4e   : > { %v616_v2 = vld [vmem:[%s2415_s5 + $0x150] sm:$0xff]  ;;  %v692_v3 = vpack.c.bf16 %v620_v1, %v617_v0  ;;  %v619_v4 = vld [vmem:[%s2415_s5 + $0x168] sm:$0xff]  ;;  %v614_v6 = vld [vmem:[%s2415_s5 + $0x140] sm:$0xff]  ;;  %p2957_p6 = scmp.ne.s32.totalorder %s2953_s23, 0 }
  0x4f   : > { %v611_v5 = vld [vmem:[%s2415_s5 + $0x128] sm:$0xff]  ;;  %v691_v7 = vpack.c.bf16 %v619_v4, %v616_v2  ;;  %v610_v9 = vld [vmem:[%s2415_s5 + $0x120] sm:$0xff]  ;;  %v613_v10 = vld [vmem:[%s2415_s5 + $0x138] sm:$0xff]  ;;  %s247_s21 = scalar_lea.vmem [#allocation7], %s2038_s20  ;;  %s1922_s28 = smul.u32 (%p2957_p6), 24, %s2243_s15 }
  0x50   : > { %v689_v8 = vpack.c.bf16 %v614_v6, %v611_v5  ;;  %v605_v11 = vld [vmem:[%s2415_s5 + $0xf8] sm:$0xff]  ;;  %718 = vmatprep.subr.bf16.mxu0 %v692_v3  ;;  %v608_v12 = vld [vmem:[%s2415_s5 + $0x110] sm:$0xff]  ;;  %v688_v13 = vpack.c.bf16 %v613_v10, %v610_v9  ;;  %v607_v16 = vld [vmem:[%s2415_s5 + $0x108] sm:$0xff] }
  0x51   : > { %719 = vmatpush1.bf16.msra.mxu0 %v691_v7  ;;  %v686_v14 = vpack.c.bf16 %v608_v12, %v605_v11  ;;  %v604_v15 = vld [vmem:[%s2415_s5 + $0xf0] sm:$0xff]  ;;  %v599_v17 = vld [vmem:[%s2415_s5 + $0xc8] sm:$0xff]  ;;  %v602_v18 = vld [vmem:[%s2415_s5 + $0xe0] sm:$0xff]  ;;  %s2736_s6 = scalar_lea.vmem (%p2957_p6), %s2945_s3, %s1922_s28 }
  0x52   : > { %720 = vmatprep.subr.bf16.mxu0 %v689_v8  ;;  %v685_v19 = vpack.c.bf16 %v607_v16, %v604_v15  ;;  %v598_v20 = vld [vmem:[%s2415_s5 + $0xc0] sm:$0xff]  ;;  %v683_v22 = vpack.c.bf16 %v602_v18, %v599_v17  ;;  %v601_v23 = vld [vmem:[%s2415_s5 + $0xd8] sm:$0xff]  ;;  %v596_v26 = vld [vmem:[%s2415_s5 + $0xb0] sm:$0xff] }
  0x53   : > { %v666_v21 = vld [vmem:[%s2415_s5 + $0x2e0] sm:$0xff]  ;;  %v593_v24 = vld [vmem:[%s2415_s5 + $0x98] sm:$0xff]  ;;  %v660_v31 = vld [vmem:[%s2415_s5 + $0x2b0] sm:$0xff]  ;;  %v682_v33 = vpack.c.bf16 %v601_v23, %v598_v20 }
  0x54   : > { %v669_v25 = vld [vmem:[%s2415_s5 + $0x2f8] sm:$0xff]  ;;  %v618_v28 = vld [vmem:[%s2415_s5 + $0x160] sm:$0xff]  ;;  %v663_v32 = vld [vmem:[%s2415_s5 + $0x2c8] sm:$0xff]  ;;  %v680_v37 = vpack.c.bf16 %v596_v26, %v593_v24 }
  0x55   : > { %721 = vmatpush1.bf16.msra.mxu0 %v688_v13  ;;  %v717_v27 = vpack.c.bf16 %v669_v25, %v666_v21  ;;  %v621_v29 = vld [vmem:[%s2415_s5 + $0x178] sm:$0xff]  ;;  %v592_v34 = vld [vmem:[%s2415_s5 + $0x90] sm:$0xff]  ;;  %v714_v35 = vpack.c.bf16 %v663_v32, %v660_v31  ;;  %v595_v38 = vld [vmem:[%s2415_s5 + $0xa8] sm:$0xff] }
  0x56   : > { %722 = vmatprep.subr.bf16.mxu0 %v686_v14  ;;  %v693_v30 = vpack.c.bf16 %v621_v29, %v618_v28  ;;  %v612_v36 = vld [vmem:[%s2415_s5 + $0x130] sm:$0xff]  ;;  %v587_v39 = vld [vmem:[%s2415_s5 + $0x68] sm:$0xff]  ;;  %v590_v41 = vld [vmem:[%s2415_s5 + $0x80] sm:$0xff]  ;;  %v679_v48 = vpack.c.bf16 %v595_v38, %v592_v34 }
  0x57   : > { %1923 = vmatprep.subr.bf16.mxu1 %v717_v27  ;;  %v615_v40 = vld [vmem:[%s2415_s5 + $0x148] sm:$0xff]  ;;  %v654_v43 = vld [vmem:[%s2415_s5 + $0x280] sm:$0xff]  ;;  %v657_v44 = vld [vmem:[%s2415_s5 + $0x298] sm:$0xff]  ;;  %v677_v51 = vpack.c.bf16 %v590_v41, %v587_v39 }
  0x58   : > { %1924 = vmatpush3.bf16.msra.mxu1 %v693_v30  ;;  %v690_v42 = vpack.c.bf16 %v615_v40, %v612_v36  ;;  %v711_v45 = vpack.c.bf16 %v657_v44, %v654_v43  ;;  %v606_v46 = vld [vmem:[%s2415_s5 + $0x100] sm:$0xff]  ;;  %v609_v47 = vld [vmem:[%s2415_s5 + $0x118] sm:$0xff]  ;;  %v648_v50 = vld [vmem:[%s2415_s5 + $0x250] sm:$0xff] }
  0x59   : > { %723 = vmatpush1.bf16.msra.mxu0 %v685_v19  ;;  %1925 = vmatprep.subr.bf16.mxu1 %v714_v35  ;;  %v586_v49 = vld [vmem:[%s2415_s5 + $0x60] sm:$0xff]  ;;  %v589_v52 = vld [vmem:[%s2415_s5 + $0x78] sm:$0xff]  ;;  %v687_v54 = vpack.c.bf16 %v609_v47, %v606_v46  ;;  %v651_v55 = vld [vmem:[%s2415_s5 + $0x268] sm:$0xff] }
  0x5a   : > { %724 = vmatprep.subr.bf16.mxu0 %v683_v22  ;;  %v581_v53 = vld [vmem:[%s2415_s5 + $0x38] sm:$0xff]  ;;  %v584_v56 = vld [vmem:[%s2415_s5 + $0x50] sm:$0xff]  ;;  %v708_v57 = vpack.c.bf16 %v651_v55, %v648_v50  ;;  %v603_v59 = vld [vmem:[%s2415_s5 + $0xe8] sm:$0xff]  ;;  %v676_v62 = vpack.c.bf16 %v589_v52, %v586_v49 }
  0x5b   : > { %v600_v58 = vld [vmem:[%s2415_s5 + $0xd0] sm:$0xff]  ;;  %v642_v60 = vld [vmem:[%s2415_s5 + $0x220] sm:$0xff]  ;;  %v645_v61 = vld [vmem:[%s2415_s5 + $0x238] sm:$0xff]  ;;  %v674_v63 = vpack.c.bf16 %v584_v56, %v581_v53 }
  0x5c   : > { %1926 = vmatpush3.bf16.msra.mxu1 %v690_v42  ;;  %v580_v0 = vld [vmem:[%s2415_s5 + $0x30] sm:$0xff]  ;;  %v583_v1 = vld [vmem:[%s2415_s5 + $0x48] sm:$0xff]  ;;  %v684_v3 = vpack.c.bf16 %v603_v59, %v600_v58  ;;  %v578_v4 = vld [vmem:[%s2415_s5 + $0x20] sm:$0xff]  ;;  %v705_v5 = vpack.c.bf16 %v645_v61, %v642_v60 }
  0x5d   : > { %725 = vmatpush1.bf16.msra.mxu0 %v682_v33  ;;  %1927 = vmatprep.subr.bf16.mxu1 %v711_v45  ;;  %v575_v2 = vld [vmem:[%s2415_s5 + $0x8] sm:$0xff]  ;;  %v594_v6 = vld [vmem:[%s2415_s5 + $0xa0] sm:$0xff]  ;;  %v597_v7 = vld [vmem:[%s2415_s5 + $0xb8] sm:$0xff]  ;;  %v673_v10 = vpack.c.bf16 %v583_v1, %v580_v0 }
  0x5e   : > { %726 = vmatprep.subr.bf16.mxu0 %v680_v37  ;;  %v636_v8 = vld [vmem:[%s2415_s5 + $0x1f0] sm:$0xff]  ;;  %v639_v9 = vld [vmem:[%s2415_s5 + $0x208] sm:$0xff]  ;;  %v671_v11 = vpack.c.bf16 %v578_v4, %v575_v2  ;;  %v574_v12 = vld [vmem:[%s2415_s5] sm:$0xff]  ;;  %v681_v15 = vpack.c.bf16 %v597_v7, %v594_v6 }
  0x5f   : > { %v577_v13 = vld [vmem:[%s2415_s5 + $0x18] sm:$0xff]  ;;  %v668_v16 = vld [vmem:[%s2415_s5 + $0x2f0] sm:$0xff]  ;;  %v702_v17 = vpack.c.bf16 %v639_v9, %v636_v8  ;;  %v591_v19 = vld [vmem:[%s2415_s5 + $0x88] sm:$0xff] }
  0x60   : > { %1928 = vmatpush3.bf16.msra.mxu1 %v687_v54  ;;  %v665_v14 = vld [vmem:[%s2415_s5 + $0x2d8] sm:$0xff]  ;;  %v588_v18 = vld [vmem:[%s2415_s5 + $0x70] sm:$0xff]  ;;  %v630_v20 = vld [vmem:[%s2415_s5 + $0x1c0] sm:$0xff]  ;;  %v670_v22 = vpack.c.bf16 %v577_v13, %v574_v12 }
  0x61   : > { %727 = vmatpush1.bf16.msra.mxu0 %v679_v48  ;;  %1929 = vmatprep.subr.bf16.mxu1 %v708_v57  ;;  %v633_v21 = vld [vmem:[%s2415_s5 + $0x1d8] sm:$0xff]  ;;  %v664_v23 = vld [vmem:[%s2415_s5 + $0x2d0] sm:$0xff]  ;;  %v667_v24 = vld [vmem:[%s2415_s5 + $0x2e8] sm:$0xff]  ;;  %v716_v25 = vpack.c.bf16 %v668_v16, %v665_v14  ;;  %v678_v27 = vpack.c.bf16 %v591_v19, %v588_v18 }
  0x62   : > { %728 = vmatprep.subr.bf16.mxu0 %v677_v51  ;;  %v659_v26 = vld [vmem:[%s2415_s5 + $0x2a8] sm:$0xff]  ;;  %v481_v29 = vld [vmem:[#allocation3 + $0x18] sm:$0xff]  ;;  %v662_v30 = vld [vmem:[%s2415_s5 + $0x2c0] sm:$0xff]  ;;  %v699_v31 = vpack.c.bf16 %v633_v21, %v630_v20  ;;  %v715_v37 = vpack.c.bf16 %v667_v24, %v664_v23 }
  0x63   : > { %v479_v28 = vld [vmem:[#allocation3 + $0x8] sm:$0xff]  ;;  %v582_v32 = vld [vmem:[%s2415_s5 + $0x40] sm:$0xff]  ;;  %v585_v33 = vld [vmem:[%s2415_s5 + $0x58] sm:$0xff]  ;;  %v713_v38 = vpack.c.bf16 %v662_v30, %v659_v26 }
  0x64   : > { %1930 = vmatpush3.bf16.msra.mxu1 %v684_v3  ;;  %v543_v34 = vpack.c.bf16 %v481_v29, %v479_v28  ;;  %v624_v35 = vld [vmem:[%s2415_s5 + $0x190] sm:$0xff]  ;;  %v627_v36 = vld [vmem:[%s2415_s5 + $0x1a8] sm:$0xff]  ;;  %v658_v39 = vld [vmem:[%s2415_s5 + $0x2a0] sm:$0xff]  ;;  %v675_v42 = vpack.c.bf16 %v585_v33, %v582_v32 }
  0x65   : > { %729 = vmatpush1.bf16.msra.mxu0 %v676_v62  ;;  %1931 = vmatprep.subr.bf16.mxu1 %v705_v5  ;;  %v661_v40 = vld [vmem:[%s2415_s5 + $0x2b8] sm:$0xff]  ;;  %v656_v43 = vld [vmem:[%s2415_s5 + $0x290] sm:$0xff]  ;;  %v696_v44 = vpack.c.bf16 %v627_v36, %v624_v35  ;;  %v579_v46 = vld [vmem:[%s2415_s5 + $0x28] sm:$0xff] }
  0x66   : > { %730 = vmatprep.subr.bf16.mxu0 %v674_v63  ;;  %943 = vmatprep.mubr.bf16.mxu1 %v543_v34  ;;  %v653_v41 = vld [vmem:[%s2415_s5 + $0x278] sm:$0xff]  ;;  %v576_v45 = vld [vmem:[%s2415_s5 + $0x10] sm:$0xff]  ;;  %v712_v47 = vpack.c.bf16 %v661_v40, %v658_v39  ;;  %v655_v49 = vld [vmem:[%s2415_s5 + $0x288] sm:$0xff] }
  0x67   : > { %750 = vmatprep.mubr.bf16.mxu0 %v543_v34  ;;  %v652_v48 = vld [vmem:[%s2415_s5 + $0x270] sm:$0xff]  ;;  %v710_v50 = vpack.c.bf16 %v656_v43, %v653_v41  ;;  %v647_v51 = vld [vmem:[%s2415_s5 + $0x248] sm:$0xff]  ;;  %v672_v52 = vpack.c.bf16 %v579_v46, %v576_v45  ;;  %v478_v53 = vld [vmem:[#allocation3] sm:$0xff] }
  0x68   : > { %1932 = vmatpush3.bf16.msra.mxu1 %v681_v15  ;;  %v480_v54 = vld [vmem:[#allocation3 + $0x10] sm:$0xff]  ;;  %v650_v55 = vld [vmem:[%s2415_s5 + $0x260] sm:$0xff]  ;;  %v483_v56 = vld [vmem:[#allocation3 + $0x28] sm:$0xff]  ;;  %v709_v58 = vpack.c.bf16 %v655_v49, %v652_v48 }
  0x69   : > { %731 = vmatpush1.bf16.msra.mxu0 %v673_v10  ;;  %1933 = vmatprep.subr.bf16.mxu1 %v702_v17  ;;  %v485_v57 = vld [vmem:[#allocation3 + $0x38] sm:$0xff]  ;;  %v2499_v59 = vpack.c.bf16 %v480_v54, %v478_v53  ;;  %v707_v60 = vpack.c.bf16 %v650_v55, %v647_v51  ;;  %v646_v61 = vld [vmem:[%s2415_s5 + $0x240] sm:$0xff]  ;;  %v644_v1 = vld [vmem:[%s2415_s5 + $0x230] sm:$0xff] }
  0x6a   : > { %732 = vmatprep.subr.bf16.mxu0 %v671_v11  ;;  %v649_v62 = vld [vmem:[%s2415_s5 + $0x258] sm:$0xff]  ;;  %v545_v63 = vpack.c.bf16 %v485_v57, %v483_v56  ;;  %v640_v3 = vld [vmem:[%s2415_s5 + $0x210] sm:$0xff]  ;;  %v643_v4 = vld [vmem:[%s2415_s5 + $0x228] sm:$0xff] }
  0x6b   : > { %v641_v0 = vld [vmem:[%s2415_s5 + $0x218] sm:$0xff]  ;;  %v706_v2 = vpack.c.bf16 %v649_v62, %v646_v61  ;;  %v635_v6 = vld [vmem:[%s2415_s5 + $0x1e8] sm:$0xff]  ;;  %v482_v7 = vld [vmem:[#allocation3 + $0x20] sm:$0xff]  ;;  %v703_v12 = vpack.c.bf16 %v643_v4, %v640_v3 }
  0x6c   : > { %1934 = vmatpush3.bf16.msra.mxu1 %v678_v27  ;;  %v704_v5 = vpack.c.bf16 %v644_v1, %v641_v0  ;;  %v484_v8 = vld [vmem:[#allocation3 + $0x30] sm:$0xff]  ;;  %v638_v9 = vld [vmem:[%s2415_s5 + $0x200] sm:$0xff]  ;;  %v487_v10 = vld [vmem:[#allocation3 + $0x48] sm:$0xff] }
  0x6d   : > { %733 = vmatpush1.bf16.msra.mxu0 %v670_v22  ;;  %1935 = vmatprep.subr.bf16.mxu1 %v699_v31  ;;  %v489_v11 = vld [vmem:[#allocation3 + $0x58] sm:$0xff]  ;;  %v544_v13 = vpack.c.bf16 %v484_v8, %v482_v7  ;;  %v701_v14 = vpack.c.bf16 %v638_v9, %v635_v6  ;;  %v634_v15 = vld [vmem:[%s2415_s5 + $0x1e0] sm:$0xff]  ;;  %v632_v19 = vld [vmem:[%s2415_s5 + $0x1d0] sm:$0xff] }
  0x6e   : > { %734 = vmatprep.subr.bf16.mxu0 %v716_v25  ;;  %v637_v16 = vld [vmem:[%s2415_s5 + $0x1f8] sm:$0xff]  ;;  %v547_v17 = vpack.c.bf16 %v489_v11, %v487_v10  ;;  %v628_v21 = vld [vmem:[%s2415_s5 + $0x1b0] sm:$0xff]  ;;  %v631_v22 = vld [vmem:[%s2415_s5 + $0x1c8] sm:$0xff] }
  0x6f   : > { %v629_v18 = vld [vmem:[%s2415_s5 + $0x1b8] sm:$0xff]  ;;  %v700_v20 = vpack.c.bf16 %v637_v16, %v634_v15  ;;  %v623_v24 = vld [vmem:[%s2415_s5 + $0x188] sm:$0xff]  ;;  %v486_v25 = vld [vmem:[#allocation3 + $0x40] sm:$0xff]  ;;  %v697_v30 = vpack.c.bf16 %v631_v22, %v628_v21 }
  0x70   : > { %1936 = vmatpush3.bf16.msra.mxu1 %v675_v42  ;;  %v698_v23 = vpack.c.bf16 %v632_v19, %v629_v18  ;;  %v488_v26 = vld [vmem:[#allocation3 + $0x50] sm:$0xff]  ;;  %v626_v27 = vld [vmem:[%s2415_s5 + $0x1a0] sm:$0xff]  ;;  %v491_v28 = vld [vmem:[#allocation3 + $0x68] sm:$0xff] }
  0x71   : > { %735 = vmatpush2.bf16.msra.mxu0 %v715_v37  ;;  %1937 = vmatprep.subr.bf16.mxu1 %v696_v44  ;;  %v493_v29 = vld [vmem:[#allocation3 + $0x78] sm:$0xff]  ;;  %v546_v31 = vpack.c.bf16 %v488_v26, %v486_v25  ;;  %v695_v32 = vpack.c.bf16 %v626_v27, %v623_v24  ;;  %v622_v33 = vld [vmem:[%s2415_s5 + $0x180] sm:$0xff]  ;;  %v495_v39 = vld [vmem:[#allocation3 + $0x88] sm:$0xff] }
  0x72   : > { %736 = vmatprep.subr.bf16.mxu0 %v713_v38  ;;  %v625_v34 = vld [vmem:[%s2415_s5 + $0x198] sm:$0xff]  ;;  %v549_v35 = vpack.c.bf16 %v493_v29, %v491_v28  ;;  %v490_v37 = vld [vmem:[#allocation3 + $0x60] sm:$0xff]  ;;  %v492_v38 = vld [vmem:[#allocation3 + $0x70] sm:$0xff] }
  0x73   : > { %v694_v36 = vpack.c.bf16 %v625_v34, %v622_v33  ;;  %v497_v40 = vld [vmem:[#allocation3 + $0x98] sm:$0xff]  ;;  %v548_v41 = vpack.c.bf16 %v492_v38, %v490_v37  ;;  %v494_v43 = vld [vmem:[#allocation3 + $0x80] sm:$0xff]  ;;  %v496_v44 = vld [vmem:[#allocation3 + $0x90] sm:$0xff] }
  0x74   : > { %1938 = vmatpush3.bf16.msra.mxu1 %v672_v52  ;;  %v551_v42 = vpack.c.bf16 %v497_v40, %v495_v39  ;;  %v499_v45 = vld [vmem:[#allocation3 + $0xa8] sm:$0xff]  ;;  %v501_v46 = vld [vmem:[#allocation3 + $0xb8] sm:$0xff]  ;;  %v498_v49 = vld [vmem:[#allocation3 + $0xa0] sm:$0xff] }
  0x75   : > { %737 = vmatpush2.bf16.msra.mxu0 %v712_v47  ;;  %v550_v47 = vpack.c.bf16 %v496_v44, %v494_v43  ;;  %v553_v48 = vpack.c.bf16 %v501_v46, %v499_v45  ;;  %v503_v51 = vld [vmem:[#allocation3 + $0xc8] sm:$0xff]  ;;  %v505_v52 = vld [vmem:[#allocation3 + $0xd8] sm:$0xff]  ;;  %v502_v55 = vld [vmem:[#allocation3 + $0xc0] sm:$0xff] }
  0x76   : > { %738 = vmatprep.subr.bf16.mxu0 %v710_v50  ;;  %v500_v50 = vld [vmem:[#allocation3 + $0xb0] sm:$0xff]  ;;  %v555_v54 = vpack.c.bf16 %v505_v52, %v503_v51  ;;  %v507_v57 = vld [vmem:[#allocation3 + $0xe8] sm:$0xff]  ;;  %v506_v61 = vld [vmem:[#allocation3 + $0xe0] sm:$0xff] }
  0x77   : > { %944 = vmatmul.mubr.bf16.vlgmr.msra.gmra.mxu1 %v2499_v59  ;;  %v552_v53 = vpack.c.bf16 %v500_v50, %v498_v49  ;;  %v504_v56 = vld [vmem:[#allocation3 + $0xd0] sm:$0xff]  ;;  %v513_v0 = vld [vmem:[#allocation3 + $0x118] sm:$0xff]  ;;  %v510_v3 = vld [vmem:[#allocation3 + $0x100] sm:$0xff] }
  0x78   : > { %951 = vmatprep.mubr.bf16.mxu1 %v545_v63  ;;  %v508_v62 = vld [vmem:[#allocation3 + $0xf0] sm:$0xff]  ;;  %v517_v6 = vld [vmem:[#allocation3 + $0x138] sm:$0xff]  ;;  %v514_v9 = vld [vmem:[#allocation3 + $0x120] sm:$0xff] }
  0x79   : > { %739 = vmatpush2.bf16.msra.mxu0 %v709_v58  ;;  %v509_v58 = vld [vmem:[#allocation3 + $0xf8] sm:$0xff]  ;;  %v556_v1 = vpack.c.bf16 %v508_v62, %v506_v61  ;;  %v512_v4 = vld [vmem:[#allocation3 + $0x110] sm:$0xff]  ;;  %v519_v11 = vld [vmem:[#allocation3 + $0x148] sm:$0xff] }
  0x7a   : > { %740 = vmatprep.subr.bf16.mxu0 %v707_v60  ;;  %v557_v60 = vpack.c.bf16 %v509_v58, %v507_v57  ;;  %v558_v7 = vpack.c.bf16 %v512_v4, %v510_v3  ;;  %v516_v10 = vld [vmem:[#allocation3 + $0x130] sm:$0xff]  ;;  %v518_v15 = vld [vmem:[#allocation3 + $0x140] sm:$0xff]  ;;  %v525_v18 = vld [vmem:[#allocation3 + $0x178] sm:$0xff] }
  0x7b   : > { %v520_v16 = vld [vmem:[#allocation3 + $0x150] sm:$0xff]  ;;  %v522_v21 = vld [vmem:[#allocation3 + $0x160] sm:$0xff]  ;;  %v529_v24 = vld [vmem:[#allocation3 + $0x198] sm:$0xff] }
  0x7c   : > { %v562_v19 = vpack.c.bf16 %v520_v16, %v518_v15  ;;  %v524_v22 = vld [vmem:[#allocation3 + $0x170] sm:$0xff]  ;;  %v526_v27 = vld [vmem:[#allocation3 + $0x180] sm:$0xff]  ;;  %v531_v29 = vld [vmem:[#allocation3 + $0x1a8] sm:$0xff] }
  0x7d   : > { %741 = vmatpush2.bf16.msra.mxu0 %v706_v2  ;;  %v564_v25 = vpack.c.bf16 %v524_v22, %v522_v21  ;;  %v528_v28 = vld [vmem:[#allocation3 + $0x190] sm:$0xff]  ;;  %v530_v33 = vld [vmem:[#allocation3 + $0x1a0] sm:$0xff] }
  0x7e   : > { %742 = vmatprep.subr.bf16.mxu0 %v704_v5  ;;  %v515_v5 = vld [vmem:[#allocation3 + $0x128] sm:$0xff]  ;;  %v532_v34 = vld [vmem:[#allocation3 + $0x1b0] sm:$0xff]  ;;  %v534_v39 = vld [vmem:[#allocation3 + $0x1c0] sm:$0xff] }
  0x7f   : > { %952 = vmatmul.mubr.bf16.gmra.mxu1 %v544_v13  ;;  %v561_v8 = vpack.c.bf16 %v517_v6, %v515_v5  ;;  %v568_v37 = vpack.c.bf16 %v532_v34, %v530_v33  ;;  %v536_v40 = vld [vmem:[#allocation3 + $0x1d0] sm:$0xff]  ;;  %v538_v45 = vld [vmem:[#allocation3 + $0x1e0] sm:$0xff] }
  0x80   : > { %959 = vmatprep.mubr.bf16.mxu1 %v547_v17  ;;  %v570_v43 = vpack.c.bf16 %v536_v40, %v534_v39  ;;  %v540_v46 = vld [vmem:[#allocation3 + $0x1f0] sm:$0xff]  ;;  %v1363_v51 = vld [vmem:[%s247_s21] sm:$0x7] }
  0x81   : > { %743 = vmatpush2.bf16.msra.mxu0 %v703_v12  ;;  %v521_v12 = vld [vmem:[#allocation3 + $0x158] sm:$0xff] }
  0x82   : > { %744 = vmatprep.subr.bf16.mxu0 %v701_v14  ;;  %v563_v14 = vpack.c.bf16 %v521_v12, %v519_v11 }
  0x85   : > { %745 = vmatpush2.bf16.msra.mxu0 %v700_v20 }
  0x86   : > { %746 = vmatprep.subr.bf16.mxu0 %v698_v23  ;;  %v527_v23 = vld [vmem:[#allocation3 + $0x188] sm:$0xff] }
  0x87   : > { %960 = vmatmul.mubr.bf16.gmra.mxu1 %v546_v31  ;;  %v567_v26 = vpack.c.bf16 %v529_v24, %v527_v23 }
  0x88   : > { %967 = vmatprep.mubr.bf16.mxu1 %v549_v35 }
  0x89   : > { %747 = vmatpush2.bf16.msra.mxu0 %v697_v30  ;;  %v533_v30 = vld [vmem:[#allocation3 + $0x1b8] sm:$0xff] }
  0x8a   : > { %748 = vmatprep.subr.bf16.mxu0 %v695_v32  ;;  %v569_v32 = vpack.c.bf16 %v533_v30, %v531_v29 }
  0x8d   : > { %749 = vmatpush2.bf16.msra.mxu0 %v694_v36  ;;  %v537_v36 = vld [vmem:[#allocation3 + $0x1d8] sm:$0xff] }
  0x8f   : > { %968 = vmatmul.mubr.bf16.gmra.mxu1 %v548_v41 }
  0x90   : > { %751 = vmatmul.mubr.bf16.vlgmr.msra.gmra.mxu0 %v2499_v59  ;;  %975 = vmatprep.mubr.bf16.mxu1 %v551_v42  ;;  %v554_v59 = vpack.c.bf16 %v504_v56, %v502_v55 }
  0x91   : > { %760 = vmatprep.mubr.bf16.mxu0 %v545_v63  ;;  %v511_v63 = vld [vmem:[#allocation3 + $0x108] sm:$0xff] }
  0x92   : > { %v559_v2 = vpack.c.bf16 %v513_v0, %v511_v63 }
  0x97   : > { %976 = vmatmul.mubr.bf16.gmra.mxu1 %v550_v47 }
  0x98   : > { %761 = vmatmul.mubr.bf16.gmra.mxu0 %v544_v13  ;;  %983 = vmatprep.mubr.bf16.mxu1 %v553_v48  ;;  %v560_v13 = vpack.c.bf16 %v516_v10, %v514_v9 }
  0x99   : > { %770 = vmatprep.mubr.bf16.mxu0 %v547_v17  ;;  %v523_v17 = vld [vmem:[#allocation3 + $0x168] sm:$0xff] }
  0x9a   : > { %v565_v20 = vpack.c.bf16 %v525_v18, %v523_v17 }
  0x9f   : > { %984 = vmatmul.mubr.bf16.gmra.mxu1 %v552_v53 }
  0xa0   : > { %771 = vmatmul.mubr.bf16.gmra.mxu0 %v546_v31  ;;  %991 = vmatprep.mubr.bf16.mxu1 %v555_v54  ;;  %v566_v31 = vpack.c.bf16 %v528_v28, %v526_v27 }
  0xa1   : > { %780 = vmatprep.mubr.bf16.mxu0 %v549_v35  ;;  %v535_v35 = vld [vmem:[#allocation3 + $0x1c8] sm:$0xff] }
  0xa2   : > { %v571_v38 = vpack.c.bf16 %v537_v36, %v535_v35 }
  0xa7   : > { %992 = vmatmul.mubr.bf16.gmra.mxu1 %v554_v59 }
  0xa8   : > { %781 = vmatmul.mubr.bf16.gmra.mxu0 %v548_v41  ;;  %999 = vmatprep.mubr.bf16.mxu1 %v557_v60  ;;  %v539_v41 = vld [vmem:[#allocation3 + $0x1e8] sm:$0xff] }
  0xa9   : > { %790 = vmatprep.mubr.bf16.mxu0 %v551_v42  ;;  %v541_v42 = vld [vmem:[#allocation3 + $0x1f8] sm:$0xff] }
  0xaa   : > { %v573_v44 = vpack.c.bf16 %v541_v42, %v539_v41 }
  0xaf   : > { %1000 = vmatmul.mubr.bf16.gmra.mxu1 %v556_v1 }
  0xb0   : > { %791 = vmatmul.mubr.bf16.gmra.mxu0 %v550_v47  ;;  %1007 = vmatprep.mubr.bf16.mxu1 %v559_v2  ;;  %v572_v47 = vpack.c.bf16 %v540_v46, %v538_v45 }
  0xb1   : > { %800 = vmatprep.mubr.bf16.mxu0 %v553_v48  ;;  %v1365_v48 = vlaneseq }
  0xb3   : > { %v1366_v49 = vshrl.u32 %v1365_v48, 7 }
  0xb5   : > { %v1375_v50 = vsub.s32 2, %v1366_v49  ;;  %v1367_v4 = vsub.s32 0, %v1366_v49 }
  0xb7   : > { %1008 = vmatmul.mubr.bf16.gmra.mxu1 %v558_v7  ;;  %v2536_v10 = vrot.slane %v1363_v51, %v1367_v4 }
  0xb8   : > { %801 = vmatmul.mubr.bf16.gmra.mxu0 %v552_v53  ;;  %1015 = vmatprep.mubr.bf16.mxu1 %v561_v8  ;;  %v2523_v53 = vrot.slane %v1363_v51, %v1375_v50 }
  0xb9   : > { %810 = vmatprep.mubr.bf16.mxu0 %v555_v54 }
  0xbf   : > { %1016 = vmatmul.mubr.bf16.gmra.mxu1 %v560_v13 }
  0xc0   : > { %811 = vmatmul.mubr.bf16.gmra.mxu0 %v554_v59  ;;  %1023 = vmatprep.mubr.bf16.mxu1 %v563_v14 }
  0xc1   : > { %820 = vmatprep.mubr.bf16.mxu0 %v557_v60 }
  0xc7   : > { %1024 = vmatmul.mubr.bf16.gmra.mxu1 %v562_v19 }
  0xc8   : > { %821 = vmatmul.mubr.bf16.gmra.mxu0 %v556_v1  ;;  %1031 = vmatprep.mubr.bf16.mxu1 %v565_v20 }
  0xc9   : > { %830 = vmatprep.mubr.bf16.mxu0 %v559_v2 }
  0xcf   : > { %1032 = vmatmul.mubr.bf16.gmra.mxu1 %v564_v25 }
  0xd0   : > { %831 = vmatmul.mubr.bf16.gmra.mxu0 %v558_v7  ;;  %1039 = vmatprep.mubr.bf16.mxu1 %v567_v26  ;;  %v1371_v7 = vsub.s32 1, %v1366_v49 }
  0xd1   : > { %840 = vmatprep.mubr.bf16.mxu0 %v561_v8 }
  0xd7   : > { %1040 = vmatmul.mubr.bf16.gmra.mxu1 %v566_v31 }
  0xd8   : > { %841 = vmatmul.mubr.bf16.gmra.mxu0 %v560_v13  ;;  %1047 = vmatprep.mubr.bf16.mxu1 %v569_v32  ;;  %v2539_v13 = vrot.slane %v1363_v51, %v1371_v7 }
  0xd9   : > { %850 = vmatprep.mubr.bf16.mxu0 %v563_v14 }
  0xdf   : > { %1048 = vmatmul.mubr.bf16.gmra.mxu1 %v568_v37 }
  0xe0   : > { %851 = vmatmul.mubr.bf16.gmra.mxu0 %v562_v19  ;;  %1055 = vmatprep.mubr.bf16.mxu1 %v571_v38 }
  0xe1   : > { %860 = vmatprep.mubr.bf16.mxu0 %v565_v20 }
  0xe7   : > { %1056 = vmatmul.mubr.bf16.gmra.mxu1 %v570_v43 }
  0xe8   : > { %861 = vmatmul.mubr.bf16.gmra.mxu0 %v564_v25  ;;  %1063 = vmatprep.mubr.bf16.mxu1 %v573_v44 }
  0xe9   : > { %870 = vmatprep.mubr.bf16.mxu0 %v567_v26 }
  0xef   : > { %1064 = vmatmul.mubr.bf16.gmra.mxu1 %v572_v47 }
  0xf0   : > { %871 = vmatmul.mubr.bf16.gmra.mxu0 %v566_v31 }
  0xf1   : > { %880 = vmatprep.mubr.bf16.mxu0 %v569_v32 }
  0xf8   : > { %881 = vmatmul.mubr.bf16.gmra.mxu0 %v568_v37 }
  0xf9   : > { %890 = vmatprep.mubr.bf16.mxu0 %v571_v38 }
 0x100   : > { %891 = vmatmul.mubr.bf16.gmra.mxu0 %v570_v43 }
 0x101   : > { %900 = vmatprep.mubr.bf16.mxu0 %v573_v44 }
 0x108   : > { %901 = vmatmul.mubr.bf16.gmra.mxu0 %v572_v47 }
 0x137   : > { %v1939_v52 = vpop.f32.mrf.mxu1 }
 0x139   : > { %v1940_v54 = vpop.f32.mrf.mxu1 }
 0x13a   : > { %v1941_v55 = vadd.f32 %v1940_v54, %v1939_v52 }
 0x13b   : > { %v1942_v56 = vpop.f32.mrf.mxu1 }
 0x13c   : > { %v1382_v57 = vadd.f32 %v1941_v55, %v2523_v53 }
 0x13d   : > { %v1943_v58 = vpop.f32.mrf.mxu1 }
 0x13e   : > { %1478 = vst [vmem:[%s2527_s25 + $0x10] sm:$0xff] %v1382_v57  ;;  %v1944_v59 = vadd.f32 %v1943_v58, %v1942_v56 }
 0x13f   : > { %v1945_v60 = vpop.f32.mrf.mxu1 }
 0x140   : > { %v1385_v61 = vadd.f32 %v1944_v59, %v2523_v53 }
 0x141   : > { %v1946_v62 = vpop.f32.mrf.mxu1 }
 0x142   : > { %1481 = vst [vmem:[%s2527_s25 + $0x28] sm:$0xff] %v1385_v61  ;;  %v1947_v63 = vadd.f32 %v1946_v62, %v1945_v60 }
 0x143   : > { %v1948_v0 = vpop.f32.mrf.mxu1 }
 0x144   : > { %v1388_v1 = vadd.f32 %v1947_v63, %v2523_v53 }
 0x145   : > { %v1949_v2 = vpop.f32.mrf.mxu1 }
 0x146   : > { %1484 = vst [vmem:[%s2527_s25 + $0x40] sm:$0xff] %v1388_v1  ;;  %v1950_v3 = vadd.f32 %v1949_v2, %v1948_v0 }
 0x147   : > { %v1951_v5 = vpop.f32.mrf.mxu1 }
 0x148   : > { %v1391_v6 = vadd.f32 %v1950_v3, %v2523_v53 }
 0x149   : > { %v1952_v8 = vpop.f32.mrf.mxu1 }
 0x14a   : > { %1487 = vst [vmem:[%s2527_s25 + $0x58] sm:$0xff] %v1391_v6  ;;  %v1953_v9 = vadd.f32 %v1952_v8, %v1951_v5 }
 0x14b   : > { %v1954_v11 = vpop.f32.mrf.mxu1 }
 0x14c   : > { %v1394_v12 = vadd.f32 %v1953_v9, %v2523_v53 }
 0x14d   : > { %v1955_v14 = vpop.f32.mrf.mxu1 }
 0x14e   : > { %1490 = vst [vmem:[%s2527_s25 + $0x70] sm:$0xff] %v1394_v12  ;;  %v1956_v16 = vadd.f32 %v1955_v14, %v1954_v11 }
 0x14f   : > { %v1957_v18 = vpop.f32.mrf.mxu1 }
 0x150   : > { %v752_v15 = vpop.f32.mrf.mxu0  ;;  %v1397_v20 = vadd.f32 %v1956_v16, %v2523_v53 }
 0x151   : > { %v1380_v17 = vadd.f32 %v2536_v10, %v752_v15  ;;  %v1958_v22 = vpop.f32.mrf.mxu1 }
 0x152   : > { %v754_v19 = vpop.f32.mrf.mxu0  ;;  %1493 = vst [vmem:[%s2527_s25 + $0x88] sm:$0xff] %v1397_v20  ;;  %v1959_v24 = vadd.f32 %v1958_v22, %v1957_v18 }
 0x153   : > { %1476 = vst [vmem:[%s2527_s25] sm:$0xff] %v1380_v17  ;;  %v1381_v21 = vadd.f32 %v2539_v13, %v754_v19  ;;  %v1960_v26 = vpop.f32.mrf.mxu1 }
 0x154   : > { %v756_v23 = vpop.f32.mrf.mxu0  ;;  %v1400_v28 = vadd.f32 %v1959_v24, %v2523_v53 }
 0x155   : > { %1477 = vst [vmem:[%s2527_s25 + $0x8] sm:$0xff] %v1381_v21  ;;  %v1383_v25 = vadd.f32 %v2536_v10, %v756_v23  ;;  %v1961_v30 = vpop.f32.mrf.mxu1 }
 0x156   : > { %v758_v27 = vpop.f32.mrf.mxu0  ;;  %1496 = vst [vmem:[%s2527_s25 + $0xa0] sm:$0xff] %v1400_v28  ;;  %v1962_v32 = vadd.f32 %v1961_v30, %v1960_v26 }
 0x157   : > { %1479 = vst [vmem:[%s2527_s25 + $0x18] sm:$0xff] %v1383_v25  ;;  %v1384_v29 = vadd.f32 %v2539_v13, %v758_v27  ;;  %v1963_v34 = vpop.f32.mrf.mxu1 }
 0x158   : > { %v762_v31 = vpop.f32.mrf.mxu0  ;;  %v1403_v36 = vadd.f32 %v1962_v32, %v2523_v53 }
 0x159   : > { %1480 = vst [vmem:[%s2527_s25 + $0x20] sm:$0xff] %v1384_v29  ;;  %v1386_v33 = vadd.f32 %v2536_v10, %v762_v31  ;;  %v1964_v38 = vpop.f32.mrf.mxu1 }
 0x15a   : > { %v764_v35 = vpop.f32.mrf.mxu0  ;;  %1499 = vst [vmem:[%s2527_s25 + $0xb8] sm:$0xff] %v1403_v36  ;;  %v1965_v40 = vadd.f32 %v1964_v38, %v1963_v34 }
 0x15b   : > { %1482 = vst [vmem:[%s2527_s25 + $0x30] sm:$0xff] %v1386_v33  ;;  %v1387_v37 = vadd.f32 %v2539_v13, %v764_v35  ;;  %v1966_v42 = vpop.f32.mrf.mxu1 }
 0x15c   : > { %v766_v39 = vpop.f32.mrf.mxu0  ;;  %v1406_v44 = vadd.f32 %v1965_v40, %v2523_v53 }
 0x15d   : > { %1483 = vst [vmem:[%s2527_s25 + $0x38] sm:$0xff] %v1387_v37  ;;  %v1389_v41 = vadd.f32 %v2536_v10, %v766_v39  ;;  %v1967_v46 = vpop.f32.mrf.mxu1 }
 0x15e   : > { %v768_v43 = vpop.f32.mrf.mxu0  ;;  %1502 = vst [vmem:[%s2527_s25 + $0xd0] sm:$0xff] %v1406_v44  ;;  %v1968_v48 = vadd.f32 %v1967_v46, %v1966_v42 }
 0x15f   : > { %1485 = vst [vmem:[%s2527_s25 + $0x48] sm:$0xff] %v1389_v41  ;;  %v1390_v45 = vadd.f32 %v2539_v13, %v768_v43  ;;  %v1969_v50 = vpop.f32.mrf.mxu1 }
 0x160   : > { %v772_v47 = vpop.f32.mrf.mxu0  ;;  %v1409_v52 = vadd.f32 %v1968_v48, %v2523_v53 }
 0x161   : > { %1486 = vst [vmem:[%s2527_s25 + $0x50] sm:$0xff] %v1390_v45  ;;  %v1392_v49 = vadd.f32 %v2536_v10, %v772_v47  ;;  %v1970_v55 = vpop.f32.mrf.mxu1 }
 0x162   : > { %v774_v51 = vpop.f32.mrf.mxu0  ;;  %1505 = vst [vmem:[%s2527_s25 + $0xe8] sm:$0xff] %v1409_v52  ;;  %v1971_v57 = vadd.f32 %v1970_v55, %v1969_v50 }
 0x163   : > { %1488 = vst [vmem:[%s2527_s25 + $0x60] sm:$0xff] %v1392_v49  ;;  %v1393_v54 = vadd.f32 %v2539_v13, %v774_v51  ;;  %v1972_v59 = vpop.f32.mrf.mxu1 }
 0x164   : > { %v776_v56 = vpop.f32.mrf.mxu0  ;;  %v1412_v61 = vadd.f32 %v1971_v57, %v2523_v53 }
 0x165   : > { %1489 = vst [vmem:[%s2527_s25 + $0x68] sm:$0xff] %v1393_v54  ;;  %v1395_v58 = vadd.f32 %v2536_v10, %v776_v56  ;;  %v1973_v63 = vpop.f32.mrf.mxu1 }
 0x166   : > { %v778_v60 = vpop.f32.mrf.mxu0  ;;  %1508 = vst [vmem:[%s2527_s25 + $0x100] sm:$0xff] %v1412_v61  ;;  %v1974_v1 = vadd.f32 %v1973_v63, %v1972_v59 }
 0x167   : > { %1491 = vst [vmem:[%s2527_s25 + $0x78] sm:$0xff] %v1395_v58  ;;  %v1396_v62 = vadd.f32 %v2539_v13, %v778_v60  ;;  %v1975_v3 = vpop.f32.mrf.mxu1 }
 0x168   : > { %v782_v0 = vpop.f32.mrf.mxu0  ;;  %v1415_v5 = vadd.f32 %v1974_v1, %v2523_v53 }
 0x169   : > { %1492 = vst [vmem:[%s2527_s25 + $0x80] sm:$0xff] %v1396_v62  ;;  %v1398_v2 = vadd.f32 %v2536_v10, %v782_v0  ;;  %v1976_v7 = vpop.f32.mrf.mxu1 }
 0x16a   : > { %v784_v4 = vpop.f32.mrf.mxu0  ;;  %1511 = vst [vmem:[%s2527_s25 + $0x118] sm:$0xff] %v1415_v5  ;;  %v1977_v9 = vadd.f32 %v1976_v7, %v1975_v3 }
 0x16b   : > { %1494 = vst [vmem:[%s2527_s25 + $0x90] sm:$0xff] %v1398_v2  ;;  %v1399_v6 = vadd.f32 %v2539_v13, %v784_v4  ;;  %v1978_v12 = vpop.f32.mrf.mxu1 }
 0x16c   : > { %v786_v8 = vpop.f32.mrf.mxu0  ;;  %v1418_v15 = vadd.f32 %v1977_v9, %v2523_v53 }
 0x16d   : > { %1495 = vst [vmem:[%s2527_s25 + $0x98] sm:$0xff] %v1399_v6  ;;  %v1401_v11 = vadd.f32 %v2536_v10, %v786_v8  ;;  %v1979_v17 = vpop.f32.mrf.mxu1 }
 0x16e   : > { %v788_v14 = vpop.f32.mrf.mxu0  ;;  %1514 = vst [vmem:[%s2527_s25 + $0x130] sm:$0xff] %v1418_v15  ;;  %v1980_v19 = vadd.f32 %v1979_v17, %v1978_v12 }
 0x16f   : > { %1497 = vst [vmem:[%s2527_s25 + $0xa8] sm:$0xff] %v1401_v11  ;;  %v1402_v16 = vadd.f32 %v2539_v13, %v788_v14  ;;  %v1981_v21 = vpop.f32.mrf.mxu1 }
 0x170   : > { %v792_v18 = vpop.f32.mrf.mxu0  ;;  %v1421_v23 = vadd.f32 %v1980_v19, %v2523_v53 }
 0x171   : > { %1498 = vst [vmem:[%s2527_s25 + $0xb0] sm:$0xff] %v1402_v16  ;;  %v1404_v20 = vadd.f32 %v2536_v10, %v792_v18  ;;  %v1982_v25 = vpop.f32.mrf.mxu1 }
 0x172   : > { %v794_v22 = vpop.f32.mrf.mxu0  ;;  %1517 = vst [vmem:[%s2527_s25 + $0x148] sm:$0xff] %v1421_v23  ;;  %v1983_v27 = vadd.f32 %v1982_v25, %v1981_v21 }
 0x173   : > { %1500 = vst [vmem:[%s2527_s25 + $0xc0] sm:$0xff] %v1404_v20  ;;  %v1405_v24 = vadd.f32 %v2539_v13, %v794_v22  ;;  %v1984_v29 = vpop.f32.mrf.mxu1 }
 0x174   : > { %v796_v26 = vpop.f32.mrf.mxu0  ;;  %v1424_v31 = vadd.f32 %v1983_v27, %v2523_v53 }
 0x175   : > { %1501 = vst [vmem:[%s2527_s25 + $0xc8] sm:$0xff] %v1405_v24  ;;  %v1407_v28 = vadd.f32 %v2536_v10, %v796_v26  ;;  %v1985_v33 = vpop.f32.mrf.mxu1 }
 0x176   : > { %v798_v30 = vpop.f32.mrf.mxu0  ;;  %1520 = vst [vmem:[%s2527_s25 + $0x160] sm:$0xff] %v1424_v31  ;;  %v1986_v35 = vadd.f32 %v1985_v33, %v1984_v29 }
 0x177   : > { %1503 = vst [vmem:[%s2527_s25 + $0xd8] sm:$0xff] %v1407_v28  ;;  %v1408_v32 = vadd.f32 %v2539_v13, %v798_v30  ;;  %v1987_v37 = vpop.f32.mrf.mxu1 }
 0x178   : > { %v802_v34 = vpop.f32.mrf.mxu0  ;;  %v1427_v39 = vadd.f32 %v1986_v35, %v2523_v53 }
 0x179   : > { %1504 = vst [vmem:[%s2527_s25 + $0xe0] sm:$0xff] %v1408_v32  ;;  %v1410_v36 = vadd.f32 %v2536_v10, %v802_v34  ;;  %v1988_v41 = vpop.f32.mrf.mxu1 }
 0x17a   : > { %v804_v38 = vpop.f32.mrf.mxu0  ;;  %1523 = vst [vmem:[%s2527_s25 + $0x178] sm:$0xff] %v1427_v39  ;;  %v1989_v43 = vadd.f32 %v1988_v41, %v1987_v37 }
 0x17b   : > { %1506 = vst [vmem:[%s2527_s25 + $0xf0] sm:$0xff] %v1410_v36  ;;  %v1411_v40 = vadd.f32 %v2539_v13, %v804_v38  ;;  %v1990_v45 = vpop.f32.mrf.mxu1 }
 0x17c   : > { %v806_v42 = vpop.f32.mrf.mxu0  ;;  %v1430_v47 = vadd.f32 %v1989_v43, %v2523_v53 }
 0x17d   : > { %1507 = vst [vmem:[%s2527_s25 + $0xf8] sm:$0xff] %v1411_v40  ;;  %v1413_v44 = vadd.f32 %v2536_v10, %v806_v42  ;;  %v1991_v49 = vpop.f32.mrf.mxu1 }
 0x17e   : > { %v808_v46 = vpop.f32.mrf.mxu0  ;;  %1526 = vst [vmem:[%s2527_s25 + $0x190] sm:$0xff] %v1430_v47  ;;  %v1992_v51 = vadd.f32 %v1991_v49, %v1990_v45 }
 0x17f   : > { %1509 = vst [vmem:[%s2527_s25 + $0x108] sm:$0xff] %v1413_v44  ;;  %v1414_v48 = vadd.f32 %v2539_v13, %v808_v46  ;;  %v1993_v54 = vpop.f32.mrf.mxu1 }
 0x180   : > { %v812_v50 = vpop.f32.mrf.mxu0  ;;  %v1433_v56 = vadd.f32 %v1992_v51, %v2523_v53 }
 0x181   : > { %1510 = vst [vmem:[%s2527_s25 + $0x110] sm:$0xff] %v1414_v48  ;;  %v1416_v52 = vadd.f32 %v2536_v10, %v812_v50  ;;  %v1994_v58 = vpop.f32.mrf.mxu1 }
 0x182   : > { %v814_v55 = vpop.f32.mrf.mxu0  ;;  %1529 = vst [vmem:[%s2527_s25 + $0x1a8] sm:$0xff] %v1433_v56  ;;  %v1995_v60 = vadd.f32 %v1994_v58, %v1993_v54 }
 0x183   : > { %1512 = vst [vmem:[%s2527_s25 + $0x120] sm:$0xff] %v1416_v52  ;;  %v1417_v57 = vadd.f32 %v2539_v13, %v814_v55  ;;  %v1996_v62 = vpop.f32.mrf.mxu1 }
 0x184   : > { %v816_v59 = vpop.f32.mrf.mxu0  ;;  %v1436_v0 = vadd.f32 %v1995_v60, %v2523_v53 }
 0x185   : > { %1513 = vst [vmem:[%s2527_s25 + $0x128] sm:$0xff] %v1417_v57  ;;  %v1419_v61 = vadd.f32 %v2536_v10, %v816_v59  ;;  %v1997_v2 = vpop.f32.mrf.mxu1 }
 0x186   : > { %v818_v63 = vpop.f32.mrf.mxu0  ;;  %1532 = vst [vmem:[%s2527_s25 + $0x1c0] sm:$0xff] %v1436_v0  ;;  %v1998_v4 = vadd.f32 %v1997_v2, %v1996_v62 }
 0x187   : > { %1515 = vst [vmem:[%s2527_s25 + $0x138] sm:$0xff] %v1419_v61  ;;  %v1420_v1 = vadd.f32 %v2539_v13, %v818_v63  ;;  %v1999_v6 = vpop.f32.mrf.mxu1 }
 0x188   : > { %v822_v3 = vpop.f32.mrf.mxu0  ;;  %v1439_v8 = vadd.f32 %v1998_v4, %v2523_v53 }
 0x189   : > { %1516 = vst [vmem:[%s2527_s25 + $0x140] sm:$0xff] %v1420_v1  ;;  %v1422_v5 = vadd.f32 %v2536_v10, %v822_v3  ;;  %v2000_v11 = vpop.f32.mrf.mxu1 }
 0x18a   : > { %v824_v7 = vpop.f32.mrf.mxu0  ;;  %1535 = vst [vmem:[%s2527_s25 + $0x1d8] sm:$0xff] %v1439_v8  ;;  %v2001_v14 = vadd.f32 %v2000_v11, %v1999_v6 }
 0x18b   : > { %1518 = vst [vmem:[%s2527_s25 + $0x150] sm:$0xff] %v1422_v5  ;;  %v1423_v9 = vadd.f32 %v2539_v13, %v824_v7  ;;  %v2002_v16 = vpop.f32.mrf.mxu1 }
 0x18c   : > { %v826_v12 = vpop.f32.mrf.mxu0  ;;  %v1442_v18 = vadd.f32 %v2001_v14, %v2523_v53 }
 0x18d   : > { %1519 = vst [vmem:[%s2527_s25 + $0x158] sm:$0xff] %v1423_v9  ;;  %v1425_v15 = vadd.f32 %v2536_v10, %v826_v12  ;;  %v2003_v20 = vpop.f32.mrf.mxu1 }
 0x18e   : > { %v828_v17 = vpop.f32.mrf.mxu0  ;;  %1538 = vst [vmem:[%s2527_s25 + $0x1f0] sm:$0xff] %v1442_v18  ;;  %v2004_v22 = vadd.f32 %v2003_v20, %v2002_v16 }
 0x18f   : > { %1521 = vst [vmem:[%s2527_s25 + $0x168] sm:$0xff] %v1425_v15  ;;  %v1426_v19 = vadd.f32 %v2539_v13, %v828_v17  ;;  %v2005_v24 = vpop.f32.mrf.mxu1 }
 0x190   : > { %v832_v21 = vpop.f32.mrf.mxu0  ;;  %v1445_v26 = vadd.f32 %v2004_v22, %v2523_v53 }
 0x191   : > { %1522 = vst [vmem:[%s2527_s25 + $0x170] sm:$0xff] %v1426_v19  ;;  %v1428_v23 = vadd.f32 %v2536_v10, %v832_v21  ;;  %v2006_v28 = vpop.f32.mrf.mxu1 }
 0x192   : > { %v834_v25 = vpop.f32.mrf.mxu0  ;;  %1541 = vst [vmem:[%s2527_s25 + $0x208] sm:$0xff] %v1445_v26  ;;  %v2007_v30 = vadd.f32 %v2006_v28, %v2005_v24 }
 0x193   : > { %1524 = vst [vmem:[%s2527_s25 + $0x180] sm:$0xff] %v1428_v23  ;;  %v1429_v27 = vadd.f32 %v2539_v13, %v834_v25  ;;  %v2008_v32 = vpop.f32.mrf.mxu1 }
 0x194   : > { %v836_v29 = vpop.f32.mrf.mxu0  ;;  %v1448_v34 = vadd.f32 %v2007_v30, %v2523_v53 }
 0x195   : > { %1525 = vst [vmem:[%s2527_s25 + $0x188] sm:$0xff] %v1429_v27  ;;  %v1431_v31 = vadd.f32 %v2536_v10, %v836_v29  ;;  %v2009_v36 = vpop.f32.mrf.mxu1 }
 0x196   : > { %v838_v33 = vpop.f32.mrf.mxu0  ;;  %1544 = vst [vmem:[%s2527_s25 + $0x220] sm:$0xff] %v1448_v34  ;;  %v2010_v38 = vadd.f32 %v2009_v36, %v2008_v32 }
 0x197   : > { %1527 = vst [vmem:[%s2527_s25 + $0x198] sm:$0xff] %v1431_v31  ;;  %v1432_v35 = vadd.f32 %v2539_v13, %v838_v33  ;;  %v2011_v40 = vpop.f32.mrf.mxu1 }
 0x198   : > { %v842_v37 = vpop.f32.mrf.mxu0  ;;  %v1451_v42 = vadd.f32 %v2010_v38, %v2523_v53 }
 0x199   : > { %1528 = vst [vmem:[%s2527_s25 + $0x1a0] sm:$0xff] %v1432_v35  ;;  %v1434_v39 = vadd.f32 %v2536_v10, %v842_v37  ;;  %v2012_v44 = vpop.f32.mrf.mxu1 }
 0x19a   : > { %v844_v41 = vpop.f32.mrf.mxu0  ;;  %1547 = vst [vmem:[%s2527_s25 + $0x238] sm:$0xff] %v1451_v42  ;;  %v2013_v46 = vadd.f32 %v2012_v44, %v2011_v40 }
 0x19b   : > { %1530 = vst [vmem:[%s2527_s25 + $0x1b0] sm:$0xff] %v1434_v39  ;;  %v1435_v43 = vadd.f32 %v2539_v13, %v844_v41  ;;  %v2014_v48 = vpop.f32.mrf.mxu1 }
 0x19c   : > { %v846_v45 = vpop.f32.mrf.mxu0  ;;  %v1454_v50 = vadd.f32 %v2013_v46, %v2523_v53 }
 0x19d   : > { %1531 = vst [vmem:[%s2527_s25 + $0x1b8] sm:$0xff] %v1435_v43  ;;  %v1437_v47 = vadd.f32 %v2536_v10, %v846_v45  ;;  %v2015_v52 = vpop.f32.mrf.mxu1 }
 0x19e   : > { %v848_v49 = vpop.f32.mrf.mxu0  ;;  %1550 = vst [vmem:[%s2527_s25 + $0x250] sm:$0xff] %v1454_v50  ;;  %v2016_v55 = vadd.f32 %v2015_v52, %v2014_v48 }
 0x19f   : > { %1533 = vst [vmem:[%s2527_s25 + $0x1c8] sm:$0xff] %v1437_v47  ;;  %v1438_v51 = vadd.f32 %v2539_v13, %v848_v49  ;;  %v2017_v57 = vpop.f32.mrf.mxu1 }
 0x1a0   : > { %v852_v54 = vpop.f32.mrf.mxu0  ;;  %v1457_v59 = vadd.f32 %v2016_v55, %v2523_v53 }
 0x1a1   : > { %1534 = vst [vmem:[%s2527_s25 + $0x1d0] sm:$0xff] %v1438_v51  ;;  %v1440_v56 = vadd.f32 %v2536_v10, %v852_v54  ;;  %v2018_v61 = vpop.f32.mrf.mxu1 }
 0x1a2   : > { %v854_v58 = vpop.f32.mrf.mxu0  ;;  %1553 = vst [vmem:[%s2527_s25 + $0x268] sm:$0xff] %v1457_v59  ;;  %v2019_v63 = vadd.f32 %v2018_v61, %v2017_v57 }
 0x1a3   : > { %1536 = vst [vmem:[%s2527_s25 + $0x1e0] sm:$0xff] %v1440_v56  ;;  %v1441_v60 = vadd.f32 %v2539_v13, %v854_v58  ;;  %v2020_v1 = vpop.f32.mrf.mxu1 }
 0x1a4   : > { %v856_v62 = vpop.f32.mrf.mxu0  ;;  %v1460_v3 = vadd.f32 %v2019_v63, %v2523_v53 }
 0x1a5   : > { %1537 = vst [vmem:[%s2527_s25 + $0x1e8] sm:$0xff] %v1441_v60  ;;  %v1443_v0 = vadd.f32 %v2536_v10, %v856_v62  ;;  %v2021_v5 = vpop.f32.mrf.mxu1 }
 0x1a6   : > { %v858_v2 = vpop.f32.mrf.mxu0  ;;  %1556 = vst [vmem:[%s2527_s25 + $0x280] sm:$0xff] %v1460_v3  ;;  %v2022_v7 = vadd.f32 %v2021_v5, %v2020_v1  ;;  %v1601_v3 = vld [vmem:[%s2527_s25 + $0x10] sm:$0xff] (%p2957_p6)  ;;  %v1607_v5 = vld [vmem:[%s2527_s25 + $0x28] sm:$0xff] (%p2957_p6) }
 0x1a7   : > { %1539 = vst [vmem:[%s2527_s25 + $0x1f8] sm:$0xff] %v1443_v0  ;;  %v1444_v4 = vadd.f32 %v2539_v13, %v858_v2  ;;  %v2023_v9 = vpop.f32.mrf.mxu1  ;;  %v1599_v2 = vld [vmem:[%s2527_s25 + $0x8] sm:$0xff] (%p2957_p6)  ;;  %1602 = vst [vmem:[%s2736_s6 + $0x10] sm:$0xff] (%p2957_p6), %v1601_v3 }
 0x1a8   : > { %v862_v6 = vpop.f32.mrf.mxu0  ;;  %v1463_v12 = vadd.f32 %v2022_v7, %v2523_v53  ;;  %v1611_v7 = vld [vmem:[%s2527_s25 + $0x38] sm:$0xff] (%p2957_p6)  ;;  %1600 = vst [vmem:[%s2736_s6 + $0x8] sm:$0xff] (%p2957_p6), %v1599_v2  ;;  %1608 = vst [vmem:[%s2736_s6 + $0x40] sm:$0xff] (%p2957_p6), %v1607_v5  ;;  %v1727_v2 = vld [vmem:[%s2527_s25 + $0x208] sm:$0xff] (%p2957_p6) }
 0x1a9   : > { %1540 = vst [vmem:[%s2527_s25 + $0x200] sm:$0xff] %v1444_v4  ;;  %v1446_v8 = vadd.f32 %v2536_v10, %v862_v6  ;;  %v2024_v15 = vpop.f32.mrf.mxu1  ;;  %v1603_v4 = vld [vmem:[%s2527_s25 + $0x18] sm:$0xff] (%p2957_p6)  ;;  %v1609_v6 = vld [vmem:[%s2527_s25 + $0x30] sm:$0xff] (%p2957_p6)  ;;  %1612 = vst [vmem:[%s2736_s6 + $0x68] sm:$0xff] (%p2957_p6), %v1611_v7 }
 0x1aa   : > { %v864_v11 = vpop.f32.mrf.mxu0  ;;  %1559 = vst [vmem:[%s2527_s25 + $0x298] sm:$0xff] %v1463_v12  ;;  %v2025_v17 = vadd.f32 %v2024_v15, %v2023_v9  ;;  %1604 = vst [vmem:[%s2736_s6 + $0x30] sm:$0xff] (%p2957_p6), %v1603_v4  ;;  %v1615_v9 = vld [vmem:[%s2527_s25 + $0x48] sm:$0xff] (%p2957_p6)  ;;  %v1619_v12 = vld [vmem:[%s2527_s25 + $0x58] sm:$0xff] (%p2957_p6) }
 0x1ab   : > { %1542 = vst [vmem:[%s2527_s25 + $0x210] sm:$0xff] %v1446_v8  ;;  %v1447_v14 = vadd.f32 %v2539_v13, %v864_v11  ;;  %v2026_v19 = vpop.f32.mrf.mxu1  ;;  %v1613_v8 = vld [vmem:[%s2527_s25 + $0x40] sm:$0xff] (%p2957_p6)  ;;  %1610 = vst [vmem:[%s2736_s6 + $0x60] sm:$0xff] (%p2957_p6), %v1609_v6  ;;  %v1617_v11 = vld [vmem:[%s2527_s25 + $0x50] sm:$0xff] (%p2957_p6) }
 0x1ac   : > { %v866_v16 = vpop.f32.mrf.mxu0  ;;  %v1466_v21 = vadd.f32 %v2025_v17, %v2523_v53  ;;  %1614 = vst [vmem:[%s2736_s6 + $0x70] sm:$0xff] (%p2957_p6), %v1613_v8  ;;  %1616 = vst [vmem:[%s2736_s6 + $0x90] sm:$0xff] (%p2957_p6), %v1615_v9  ;;  %v1623_v15 = vld [vmem:[%s2527_s25 + $0x68] sm:$0xff] (%p2957_p6)  ;;  %v1627_v17 = vld [vmem:[%s2527_s25 + $0x78] sm:$0xff] (%p2957_p6) }
 0x1ad   : > { %1543 = vst [vmem:[%s2527_s25 + $0x218] sm:$0xff] %v1447_v14  ;;  %v1449_v18 = vadd.f32 %v2536_v10, %v866_v16  ;;  %v2027_v23 = vpop.f32.mrf.mxu1  ;;  %1618 = vst [vmem:[%s2736_s6 + $0x98] sm:$0xff] (%p2957_p6), %v1617_v11  ;;  %v1621_v14 = vld [vmem:[%s2527_s25 + $0x60] sm:$0xff] (%p2957_p6)  ;;  %v1625_v16 = vld [vmem:[%s2527_s25 + $0x70] sm:$0xff] (%p2957_p6) }
 0x1ae   : > { %v868_v20 = vpop.f32.mrf.mxu0  ;;  %1562 = vst [vmem:[%s2527_s25 + $0x2b0] sm:$0xff] %v1466_v21  ;;  %v2028_v25 = vadd.f32 %v2027_v23, %v2026_v19  ;;  %1620 = vst [vmem:[%s2736_s6 + $0xa0] sm:$0xff] (%p2957_p6), %v1619_v12  ;;  %v1631_v19 = vld [vmem:[%s2527_s25 + $0x88] sm:$0xff] (%p2957_p6)  ;;  %v1635_v21 = vld [vmem:[%s2527_s25 + $0x98] sm:$0xff] (%p2957_p6) }
 0x1af   : > { %1545 = vst [vmem:[%s2527_s25 + $0x228] sm:$0xff] %v1449_v18  ;;  %v1450_v22 = vadd.f32 %v2539_v13, %v868_v20  ;;  %v2029_v27 = vpop.f32.mrf.mxu1  ;;  %1622 = vst [vmem:[%s2736_s6 + $0xc0] sm:$0xff] (%p2957_p6), %v1621_v14  ;;  %v1629_v18 = vld [vmem:[%s2527_s25 + $0x80] sm:$0xff] (%p2957_p6)  ;;  %v1633_v20 = vld [vmem:[%s2527_s25 + $0x90] sm:$0xff] (%p2957_p6) }
 0x1b0   : > { %v872_v24 = vpop.f32.mrf.mxu0  ;;  %v1469_v29 = vadd.f32 %v2028_v25, %v2523_v53  ;;  %1624 = vst [vmem:[%s2736_s6 + $0xc8] sm:$0xff] (%p2957_p6), %v1623_v15  ;;  %1626 = vst [vmem:[%s2736_s6 + $0xd0] sm:$0xff] (%p2957_p6), %v1625_v16  ;;  %v1639_v23 = vld [vmem:[%s2527_s25 + $0xa8] sm:$0xff] (%p2957_p6)  ;;  %v1643_v25 = vld [vmem:[%s2527_s25 + $0xb8] sm:$0xff] (%p2957_p6) }
 0x1b1   : > { %1546 = vst [vmem:[%s2527_s25 + $0x230] sm:$0xff] %v1450_v22  ;;  %v1452_v26 = vadd.f32 %v2536_v10, %v872_v24  ;;  %v2030_v31 = vpop.f32.mrf.mxu1  ;;  %1628 = vst [vmem:[%s2736_s6 + $0xf0] sm:$0xff] (%p2957_p6), %v1627_v17  ;;  %v1637_v22 = vld [vmem:[%s2527_s25 + $0xa0] sm:$0xff] (%p2957_p6)  ;;  %v1641_v24 = vld [vmem:[%s2527_s25 + $0xb0] sm:$0xff] (%p2957_p6) }
 0x1b2   : > { %v874_v28 = vpop.f32.mrf.mxu0  ;;  %1565 = vst [vmem:[%s2527_s25 + $0x2c8] sm:$0xff] %v1469_v29  ;;  %v2031_v33 = vadd.f32 %v2030_v31, %v2029_v27  ;;  %1630 = vst [vmem:[%s2736_s6 + $0xf8] sm:$0xff] (%p2957_p6), %v1629_v18  ;;  %v1647_v27 = vld [vmem:[%s2527_s25 + $0xc8] sm:$0xff] (%p2957_p6)  ;;  %v1651_v29 = vld [vmem:[%s2527_s25 + $0xd8] sm:$0xff] (%p2957_p6) }
 0x1b3   : > { %1548 = vst [vmem:[%s2527_s25 + $0x240] sm:$0xff] %v1452_v26  ;;  %v1453_v30 = vadd.f32 %v2539_v13, %v874_v28  ;;  %v2032_v35 = vpop.f32.mrf.mxu1  ;;  %1632 = vst [vmem:[%s2736_s6 + $0x100] sm:$0xff] (%p2957_p6), %v1631_v19  ;;  %v1645_v26 = vld [vmem:[%s2527_s25 + $0xc0] sm:$0xff] (%p2957_p6)  ;;  %v1649_v28 = vld [vmem:[%s2527_s25 + $0xd0] sm:$0xff] (%p2957_p6) }
 0x1b4   : > { %v876_v32 = vpop.f32.mrf.mxu0  ;;  %v1472_v37 = vadd.f32 %v2031_v33, %v2523_v53  ;;  %1634 = vst [vmem:[%s2736_s6 + $0x120] sm:$0xff] (%p2957_p6), %v1633_v20  ;;  %1636 = vst [vmem:[%s2736_s6 + $0x128] sm:$0xff] (%p2957_p6), %v1635_v21  ;;  %v1655_v31 = vld [vmem:[%s2527_s25 + $0xe8] sm:$0xff] (%p2957_p6)  ;;  %v1659_v33 = vld [vmem:[%s2527_s25 + $0xf8] sm:$0xff] (%p2957_p6) }
 0x1b5   : > { %1549 = vst [vmem:[%s2527_s25 + $0x248] sm:$0xff] %v1453_v30  ;;  %v1455_v34 = vadd.f32 %v2536_v10, %v876_v32  ;;  %v2033_v39 = vpop.f32.mrf.mxu1  ;;  %1638 = vst [vmem:[%s2736_s6 + $0x130] sm:$0xff] (%p2957_p6), %v1637_v22  ;;  %v1653_v30 = vld [vmem:[%s2527_s25 + $0xe0] sm:$0xff] (%p2957_p6)  ;;  %v1657_v32 = vld [vmem:[%s2527_s25 + $0xf0] sm:$0xff] (%p2957_p6) }
 0x1b6   : > { %v878_v36 = vpop.f32.mrf.mxu0  ;;  %1568 = vst [vmem:[%s2527_s25 + $0x2e0] sm:$0xff] %v1472_v37  ;;  %v2034_v41 = vadd.f32 %v2033_v39, %v2032_v35  ;;  %1640 = vst [vmem:[%s2736_s6 + $0x150] sm:$0xff] (%p2957_p6), %v1639_v23  ;;  %v1663_v35 = vld [vmem:[%s2527_s25 + $0x108] sm:$0xff] (%p2957_p6)  ;;  %v1667_v37 = vld [vmem:[%s2527_s25 + $0x118] sm:$0xff] (%p2957_p6) }
 0x1b7   : > { %1551 = vst [vmem:[%s2527_s25 + $0x258] sm:$0xff] %v1455_v34  ;;  %v1456_v38 = vadd.f32 %v2539_v13, %v878_v36  ;;  %1642 = vst [vmem:[%s2736_s6 + $0x158] sm:$0xff] (%p2957_p6), %v1641_v24  ;;  %v1661_v34 = vld [vmem:[%s2527_s25 + $0x100] sm:$0xff] (%p2957_p6)  ;;  %v1665_v36 = vld [vmem:[%s2527_s25 + $0x110] sm:$0xff] (%p2957_p6) }
 0x1b8   : > { %v882_v40 = vpop.f32.mrf.mxu0  ;;  %v1475_v44 = vadd.f32 %v2034_v41, %v2523_v53  ;;  %1644 = vst [vmem:[%s2736_s6 + $0x160] sm:$0xff] (%p2957_p6), %v1643_v25  ;;  %1646 = vst [vmem:[%s2736_s6 + $0x180] sm:$0xff] (%p2957_p6), %v1645_v26  ;;  %v1671_v39 = vld [vmem:[%s2527_s25 + $0x128] sm:$0xff] (%p2957_p6)  ;;  %v1675_v41 = vld [vmem:[%s2527_s25 + $0x138] sm:$0xff] (%p2957_p6) }
 0x1b9   : > { %1552 = vst [vmem:[%s2527_s25 + $0x260] sm:$0xff] %v1456_v38  ;;  %v1458_v42 = vadd.f32 %v2536_v10, %v882_v40  ;;  %1648 = vst [vmem:[%s2736_s6 + $0x188] sm:$0xff] (%p2957_p6), %v1647_v27  ;;  %v1669_v38 = vld [vmem:[%s2527_s25 + $0x120] sm:$0xff] (%p2957_p6)  ;;  %v1673_v40 = vld [vmem:[%s2527_s25 + $0x130] sm:$0xff] (%p2957_p6) }
 0x1ba   : > { %v884_v43 = vpop.f32.mrf.mxu0  ;;  %1571 = vst [vmem:[%s2527_s25 + $0x2f8] sm:$0xff] %v1475_v44  ;;  %1650 = vst [vmem:[%s2736_s6 + $0x190] sm:$0xff] (%p2957_p6), %v1649_v28  ;;  %v1681_v44 = vld [vmem:[%s2527_s25 + $0x150] sm:$0xff] (%p2957_p6)  ;;  %v1731_v4 = vld [vmem:[%s2527_s25 + $0x218] sm:$0xff] (%p2957_p6) }
 0x1bb   : > { %1554 = vst [vmem:[%s2527_s25 + $0x270] sm:$0xff] %v1458_v42  ;;  %v1459_v45 = vadd.f32 %v2539_v13, %v884_v43  ;;  %1652 = vst [vmem:[%s2736_s6 + $0x1b0] sm:$0xff] (%p2957_p6), %v1651_v29  ;;  %v1677_v42 = vld [vmem:[%s2527_s25 + $0x140] sm:$0xff] (%p2957_p6)  ;;  %v1679_v43 = vld [vmem:[%s2527_s25 + $0x148] sm:$0xff] (%p2957_p6) }
 0x1bc   : > { %v886_v46 = vpop.f32.mrf.mxu0  ;;  %1654 = vst [vmem:[%s2736_s6 + $0x1b8] sm:$0xff] (%p2957_p6), %v1653_v30  ;;  %1656 = vst [vmem:[%s2736_s6 + $0x1c0] sm:$0xff] (%p2957_p6), %v1655_v31  ;;  %v1729_v3 = vld [vmem:[%s2527_s25 + $0x210] sm:$0xff] (%p2957_p6)  ;;  %v1735_v5 = vld [vmem:[%s2527_s25 + $0x228] sm:$0xff] (%p2957_p6) }
 0x1bd   : > { %1555 = vst [vmem:[%s2527_s25 + $0x278] sm:$0xff] %v1459_v45  ;;  %v1461_v47 = vadd.f32 %v2536_v10, %v886_v46  ;;  %1658 = vst [vmem:[%s2736_s6 + $0x1e0] sm:$0xff] (%p2957_p6), %v1657_v32  ;;  %v1683_v45 = vld [vmem:[%s2527_s25 + $0x158] sm:$0xff] (%p2957_p6)  ;;  %v1685_v46 = vld [vmem:[%s2527_s25 + $0x160] sm:$0xff] (%p2957_p6) }
 0x1be   : > { %v888_v48 = vpop.f32.mrf.mxu0  ;;  %1660 = vst [vmem:[%s2736_s6 + $0x1e8] sm:$0xff] (%p2957_p6), %v1659_v33  ;;  %1662 = vst [vmem:[%s2736_s6 + $0x1f0] sm:$0xff] (%p2957_p6), %v1661_v34  ;;  %v1737_v6 = vld [vmem:[%s2527_s25 + $0x230] sm:$0xff] (%p2957_p6)  ;;  %v1739_v7 = vld [vmem:[%s2527_s25 + $0x238] sm:$0xff] (%p2957_p6) }
 0x1bf   : > { %1557 = vst [vmem:[%s2527_s25 + $0x288] sm:$0xff] %v1461_v47  ;;  %v1462_v49 = vadd.f32 %v2539_v13, %v888_v48  ;;  %1664 = vst [vmem:[%s2736_s6 + $0x210] sm:$0xff] (%p2957_p6), %v1663_v35  ;;  %v1687_v47 = vld [vmem:[%s2527_s25 + $0x168] sm:$0xff] (%p2957_p6)  ;;  %v1689_v48 = vld [vmem:[%s2527_s25 + $0x170] sm:$0xff] (%p2957_p6) }
 0x1c0   : > { %v892_v50 = vpop.f32.mrf.mxu0  ;;  %1666 = vst [vmem:[%s2736_s6 + $0x218] sm:$0xff] (%p2957_p6), %v1665_v36  ;;  %1668 = vst [vmem:[%s2736_s6 + $0x220] sm:$0xff] (%p2957_p6), %v1667_v37  ;;  %v1741_v8 = vld [vmem:[%s2527_s25 + $0x240] sm:$0xff] (%p2957_p6)  ;;  %v1743_v9 = vld [vmem:[%s2527_s25 + $0x248] sm:$0xff] (%p2957_p6) }
 0x1c1   : > { %1558 = vst [vmem:[%s2527_s25 + $0x290] sm:$0xff] %v1462_v49  ;;  %v1464_v53 = vadd.f32 %v2536_v10, %v892_v50  ;;  %1670 = vst [vmem:[%s2736_s6 + $0x240] sm:$0xff] (%p2957_p6), %v1669_v38  ;;  %v1691_v49 = vld [vmem:[%s2527_s25 + $0x178] sm:$0xff] (%p2957_p6)  ;;  %v1693_v50 = vld [vmem:[%s2527_s25 + $0x180] sm:$0xff] (%p2957_p6) }
 0x1c2   : > { %v894_v51 = vpop.f32.mrf.mxu0  ;;  %1672 = vst [vmem:[%s2736_s6 + $0x248] sm:$0xff] (%p2957_p6), %v1671_v39  ;;  %1674 = vst [vmem:[%s2736_s6 + $0x250] sm:$0xff] (%p2957_p6), %v1673_v40  ;;  %v1745_v11 = vld [vmem:[%s2527_s25 + $0x250] sm:$0xff] (%p2957_p6)  ;;  %v1747_v12 = vld [vmem:[%s2527_s25 + $0x258] sm:$0xff] (%p2957_p6) }
 0x1c3   : > { %1560 = vst [vmem:[%s2527_s25 + $0x2a0] sm:$0xff] %v1464_v53  ;;  %v1465_v52 = vadd.f32 %v2539_v13, %v894_v51  ;;  %1676 = vst [vmem:[%s2736_s6 + $0x270] sm:$0xff] (%p2957_p6), %v1675_v41  ;;  %v1695_v53 = vld [vmem:[%s2527_s25 + $0x188] sm:$0xff] (%p2957_p6)  ;;  %v1697_v51 = vld [vmem:[%s2527_s25 + $0x190] sm:$0xff] (%p2957_p6) }
 0x1c4   : > { %v896_v54 = vpop.f32.mrf.mxu0  ;;  %1678 = vst [vmem:[%s2736_s6 + $0x278] sm:$0xff] (%p2957_p6), %v1677_v42  ;;  %1680 = vst [vmem:[%s2736_s6 + $0x280] sm:$0xff] (%p2957_p6), %v1679_v43  ;;  %v1749_v14 = vld [vmem:[%s2527_s25 + $0x260] sm:$0xff] (%p2957_p6)  ;;  %v1751_v15 = vld [vmem:[%s2527_s25 + $0x268] sm:$0xff] (%p2957_p6) }
 0x1c5   : > { %1561 = vst [vmem:[%s2527_s25 + $0x2a8] sm:$0xff] %v1465_v52  ;;  %v1467_v55 = vadd.f32 %v2536_v10, %v896_v54  ;;  %1682 = vst [vmem:[%s2736_s6 + $0x2a0] sm:$0xff] (%p2957_p6), %v1681_v44  ;;  %v1699_v52 = vld [vmem:[%s2527_s25 + $0x198] sm:$0xff] (%p2957_p6)  ;;  %v1701_v54 = vld [vmem:[%s2527_s25 + $0x1a0] sm:$0xff] (%p2957_p6) }
 0x1c6   : > { %v898_v56 = vpop.f32.mrf.mxu0  ;;  %1684 = vst [vmem:[%s2736_s6 + $0x2a8] sm:$0xff] (%p2957_p6), %v1683_v45  ;;  %1686 = vst [vmem:[%s2736_s6 + $0x2b0] sm:$0xff] (%p2957_p6), %v1685_v46  ;;  %v1753_v16 = vld [vmem:[%s2527_s25 + $0x270] sm:$0xff] (%p2957_p6)  ;;  %v1755_v17 = vld [vmem:[%s2527_s25 + $0x278] sm:$0xff] (%p2957_p6) }
 0x1c7   : > { %1563 = vst [vmem:[%s2527_s25 + $0x2b8] sm:$0xff] %v1467_v55  ;;  %v1468_v57 = vadd.f32 %v2539_v13, %v898_v56  ;;  %1688 = vst [vmem:[%s2736_s6 + $0x2d0] sm:$0xff] (%p2957_p6), %v1687_v47  ;;  %v1703_v55 = vld [vmem:[%s2527_s25 + $0x1a8] sm:$0xff] (%p2957_p6)  ;;  %v1705_v56 = vld [vmem:[%s2527_s25 + $0x1b0] sm:$0xff] (%p2957_p6) }
 0x1c8   : > { %v902_v58 = vpop.f32.mrf.mxu0  ;;  %1690 = vst [vmem:[%s2736_s6 + $0x2d8] sm:$0xff] (%p2957_p6), %v1689_v48  ;;  %1692 = vst [vmem:[%s2736_s6 + $0x2e0] sm:$0xff] (%p2957_p6), %v1691_v49  ;;  %v1757_v18 = vld [vmem:[%s2527_s25 + $0x280] sm:$0xff] (%p2957_p6)  ;;  %v1759_v19 = vld [vmem:[%s2527_s25 + $0x288] sm:$0xff] (%p2957_p6) }
 0x1c9   : > { %1564 = vst [vmem:[%s2527_s25 + $0x2c0] sm:$0xff] %v1468_v57  ;;  %v1470_v59 = vadd.f32 %v2536_v10, %v902_v58  ;;  %1694 = vst [vmem:[%s2736_s6 + $0x300] sm:$0xff] (%p2957_p6), %v1693_v50  ;;  %v1707_v57 = vld [vmem:[%s2527_s25 + $0x1b8] sm:$0xff] (%p2957_p6)  ;;  %v1709_v58 = vld [vmem:[%s2527_s25 + $0x1c0] sm:$0xff] (%p2957_p6) }
 0x1ca   : > { %v904_v60 = vpop.f32.mrf.mxu0  ;;  %1696 = vst [vmem:[%s2736_s6 + $0x308] sm:$0xff] (%p2957_p6), %v1695_v53  ;;  %1698 = vst [vmem:[%s2736_s6 + $0x310] sm:$0xff] (%p2957_p6), %v1697_v51  ;;  %v1761_v20 = vld [vmem:[%s2527_s25 + $0x290] sm:$0xff] (%p2957_p6)  ;;  %v1763_v21 = vld [vmem:[%s2527_s25 + $0x298] sm:$0xff] (%p2957_p6) }
 0x1cb   : > { %1566 = vst [vmem:[%s2527_s25 + $0x2d0] sm:$0xff] %v1470_v59  ;;  %v1471_v61 = vadd.f32 %v2539_v13, %v904_v60  ;;  %1700 = vst [vmem:[%s2736_s6 + $0x330] sm:$0xff] (%p2957_p6), %v1699_v52  ;;  %v1711_v59 = vld [vmem:[%s2527_s25 + $0x1c8] sm:$0xff] (%p2957_p6)  ;;  %v1713_v60 = vld [vmem:[%s2527_s25 + $0x1d0] sm:$0xff] (%p2957_p6) }
 0x1cc   : > { %v906_v62 = vpop.f32.mrf.mxu0  ;;  %1702 = vst [vmem:[%s2736_s6 + $0x338] sm:$0xff] (%p2957_p6), %v1701_v54  ;;  %1704 = vst [vmem:[%s2736_s6 + $0x340] sm:$0xff] (%p2957_p6), %v1703_v55  ;;  %v1765_v22 = vld [vmem:[%s2527_s25 + $0x2a0] sm:$0xff] (%p2957_p6)  ;;  %v1767_v23 = vld [vmem:[%s2527_s25 + $0x2a8] sm:$0xff] (%p2957_p6) }
 0x1cd   : > { %1567 = vst [vmem:[%s2527_s25 + $0x2d8] sm:$0xff] %v1471_v61  ;;  %v1473_v63 = vadd.f32 %v2536_v10, %v906_v62  ;;  %1578 = sbr.rel (!%p2957_p6) target bundleno = 485 (0x1e5), region = 56  ;;  %v1597_v10 = vld [vmem:[%s2527_s25] sm:$0xff] (%p2957_p6)  ;;  %1706 = vst [vmem:[%s2736_s6 + $0x360] sm:$0xff] (%p2957_p6), %v1705_v56  ;;  %v1715_v61 = vld [vmem:[%s2527_s25 + $0x1d8] sm:$0xff] (%p2957_p6) }
 0x1ce   : > { %v908_v0 = vpop.f32.mrf.mxu0  ;;  %1598 = vst [vmem:[%s2736_s6] sm:$0xff] (%p2957_p6), %v1597_v10  ;;  %1708 = vst [vmem:[%s2736_s6 + $0x368] sm:$0xff] (%p2957_p6), %v1707_v57  ;;  %v1717_v62 = vld [vmem:[%s2527_s25 + $0x1e0] sm:$0xff] (%p2957_p6)  ;;  %v1769_v24 = vld [vmem:[%s2527_s25 + $0x2b0] sm:$0xff] (%p2957_p6) }
 0x1cf   : > { %1569 = vst [vmem:[%s2527_s25 + $0x2e8] sm:$0xff] %v1473_v63  ;;  %v1474_v1 = vadd.f32 %v2539_v13, %v908_v0  ;;  %v1605_v13 = vld [vmem:[%s2527_s25 + $0x20] sm:$0xff] (%p2957_p6)  ;;  %1710 = vst [vmem:[%s2736_s6 + $0x370] sm:$0xff] (%p2957_p6), %v1709_v58  ;;  %v1719_v63 = vld [vmem:[%s2527_s25 + $0x1e8] sm:$0xff] (%p2957_p6) }
 0x1d0   : > { %1606 = vst [vmem:[%s2736_s6 + $0x38] sm:$0xff] (%p2957_p6), %v1605_v13  ;;  %1712 = vst [vmem:[%s2736_s6 + $0x390] sm:$0xff] (%p2957_p6), %v1711_v59  ;;  %v1721_v0 = vld [vmem:[%s2527_s25 + $0x1f0] sm:$0xff] (%p2957_p6)  ;;  %v1725_v10 = vld [vmem:[%s2527_s25 + $0x200] sm:$0xff] (%p2957_p6) }
 0x1d1   : > { %1570 = vst [vmem:[%s2527_s25 + $0x2f0] sm:$0xff] %v1474_v1  ;;  %1714 = vst [vmem:[%s2736_s6 + $0x398] sm:$0xff] (%p2957_p6), %v1713_v60  ;;  %v1723_v1 = vld [vmem:[%s2527_s25 + $0x1f8] sm:$0xff] (%p2957_p6)  ;;  %v1733_v13 = vld [vmem:[%s2527_s25 + $0x220] sm:$0xff] (%p2957_p6) }
 0x1d2   : > { %1716 = vst [vmem:[%s2736_s6 + $0x3a0] sm:$0xff] %v1715_v61  ;;  %1718 = vst [vmem:[%s2736_s6 + $0x3c0] sm:$0xff] %v1717_v62  ;;  %v1771_v25 = vld [vmem:[%s2527_s25 + $0x2b8] sm:$0xff]  ;;  %v1773_v26 = vld [vmem:[%s2527_s25 + $0x2c0] sm:$0xff] }
 0x1d3   : > { %1720 = vst [vmem:[%s2736_s6 + $0x3c8] sm:$0xff] %v1719_v63  ;;  %1722 = vst [vmem:[%s2736_s6 + $0x3d0] sm:$0xff] %v1721_v0  ;;  %v1775_v27 = vld [vmem:[%s2527_s25 + $0x2c8] sm:$0xff]  ;;  %v1777_v28 = vld [vmem:[%s2527_s25 + $0x2d0] sm:$0xff] }
 0x1d4   : > { %1724 = vst [vmem:[%s2736_s6 + $0x3f0] sm:$0xff] %v1723_v1  ;;  %1726 = vst [vmem:[%s2736_s6 + $0x3f8] sm:$0xff] %v1725_v10  ;;  %v1779_v29 = vld [vmem:[%s2527_s25 + $0x2d8] sm:$0xff]  ;;  %v1781_v30 = vld [vmem:[%s2527_s25 + $0x2e0] sm:$0xff] }
 0x1d5   : > { %1728 = vst [vmem:[%s2736_s6 + $0x400] sm:$0xff] %v1727_v2  ;;  %1730 = vst [vmem:[%s2736_s6 + $0x420] sm:$0xff] %v1729_v3  ;;  %v1787_v33 = vld [vmem:[%s2527_s25 + $0x2f8] sm:$0xff] }
 0x1d6   : > { %1732 = vst [vmem:[%s2736_s6 + $0x428] sm:$0xff] %v1731_v4  ;;  %1734 = vst [vmem:[%s2736_s6 + $0x430] sm:$0xff] %v1733_v13  ;;  %v1783_v31 = vld [vmem:[%s2527_s25 + $0x2e8] sm:$0xff] }
 0x1d7   : > { %1736 = vst [vmem:[%s2736_s6 + $0x450] sm:$0xff] %v1735_v5  ;;  %1738 = vst [vmem:[%s2736_s6 + $0x458] sm:$0xff] %v1737_v6 }
 0x1d8   : > { %1740 = vst [vmem:[%s2736_s6 + $0x460] sm:$0xff] %v1739_v7  ;;  %1742 = vst [vmem:[%s2736_s6 + $0x480] sm:$0xff] %v1741_v8  ;;  %v1785_v32 = vld [vmem:[%s2527_s25 + $0x2f0] sm:$0xff] }
 0x1d9   : > { %1744 = vst [vmem:[%s2736_s6 + $0x488] sm:$0xff] %v1743_v9  ;;  %1746 = vst [vmem:[%s2736_s6 + $0x490] sm:$0xff] %v1745_v11 }
 0x1da   : > { %1748 = vst [vmem:[%s2736_s6 + $0x4b0] sm:$0xff] %v1747_v12  ;;  %1750 = vst [vmem:[%s2736_s6 + $0x4b8] sm:$0xff] %v1749_v14 }
 0x1db   : > { %1752 = vst [vmem:[%s2736_s6 + $0x4c0] sm:$0xff] %v1751_v15  ;;  %1754 = vst [vmem:[%s2736_s6 + $0x4e0] sm:$0xff] %v1753_v16 }
 0x1dc   : > { %1756 = vst [vmem:[%s2736_s6 + $0x4e8] sm:$0xff] %v1755_v17  ;;  %1758 = vst [vmem:[%s2736_s6 + $0x4f0] sm:$0xff] %v1757_v18 }
 0x1dd   : > { %1760 = vst [vmem:[%s2736_s6 + $0x510] sm:$0xff] %v1759_v19  ;;  %1762 = vst [vmem:[%s2736_s6 + $0x518] sm:$0xff] %v1761_v20 }
 0x1de   : > { %1764 = vst [vmem:[%s2736_s6 + $0x520] sm:$0xff] %v1763_v21  ;;  %1766 = vst [vmem:[%s2736_s6 + $0x540] sm:$0xff] %v1765_v22 }
 0x1df   : > { %1768 = vst [vmem:[%s2736_s6 + $0x548] sm:$0xff] %v1767_v23  ;;  %1770 = vst [vmem:[%s2736_s6 + $0x550] sm:$0xff] %v1769_v24 }
 0x1e0   : > { %1772 = vst [vmem:[%s2736_s6 + $0x570] sm:$0xff] %v1771_v25  ;;  %1774 = vst [vmem:[%s2736_s6 + $0x578] sm:$0xff] %v1773_v26 }
 0x1e1   : > { %1776 = vst [vmem:[%s2736_s6 + $0x580] sm:$0xff] %v1775_v27  ;;  %1778 = vst [vmem:[%s2736_s6 + $0x5a0] sm:$0xff] %v1777_v28 }
 0x1e2   : > { %1780 = vst [vmem:[%s2736_s6 + $0x5a8] sm:$0xff] %v1779_v29  ;;  %1782 = vst [vmem:[%s2736_s6 + $0x5b0] sm:$0xff] %v1781_v30 }
 0x1e3   : > { %1784 = vst [vmem:[%s2736_s6 + $0x5d0] sm:$0xff] %v1783_v31  ;;  %1786 = vst [vmem:[%s2736_s6 + $0x5d8] sm:$0xff] %v1785_v32 }
 0x1e4   : > { %1788 = vst [vmem:[%s2736_s6 + $0x5e0] sm:$0xff] %v1787_v33 }
 0x1e5 PF: > { %s17_s17 = sadd.s32 1, %s2251_s17   ;;  %s2958_s7 = sld [smem:[#allocation11_spill]] }
 0x1e6   : > { %p14_p3 = scmp.ge.s32.totalorder %s17_s17, 4   ;;  %s2959_s12 = smov %s2235_s13 }
 0x1e7   : > { %s2960_s13 = smov %s2239_s14  ;;  %s2961_s14 = smov %s2328_s24 }
 0x1e8   : > { %s2962_s15 = smov %s2247_s16  ;;  %16 = sbr.rel (!%p14_p3) target bundleno = 7 (0x7), region = 120 }
 0x1eb   : > { %s2963_s16 = smov %s2958_s7 }
 0x1ed   :  { %1804 = vsyncpa [#allocation4], 1 }
 0x1ee   :  { %1806 = vsyncpa [#allocation4 + $0x1], 1 }
 0x1ef   :  { %1807 = vsyncpa [#allocation6], 1 }
 0x1f0   :  { %1809 = vsyncpa [#allocation6 + $0x1], 1 }

</bundles_post_ra>
